<compile_context>
chip_gen: v7x
topology: tpu7x:2x2x1
jax: 0.10.0
libtpu: 0.0.40
codegen_flags: <defaults>
</compile_context>

<pallas_src>
import jax
import jax.numpy as jnp
from jax.experimental import pallas as pl
from jax.experimental.pallas import tpu as pltpu


def _silu(v):
    return v * jax.nn.sigmoid(v)


def trd_kernel(x_ref, w_cur_ref, w_up_ref, w_left_ref, w_ul_ref, b_ds_ref,
               w_enc_ref, b_enc_ref, w_wts_ref, b_wts_ref, w_dec_ref, b_dec_ref,
               o_ref):
    f32 = jnp.float32
    th = x_ref.shape[0] - 1            # output rows handled by this block
    wo = x_ref.shape[1] - 1            # output cols (full width, +1 = left pad)
    c4 = x_ref.shape[2]                # 4 * Cin space-to-depth channels
    cin = w_enc_ref.shape[0]
    m = th * wo

    # The block holds space-to-depth x for s2d rows [r*th - 1, (r+1)*th) plus a
    # zero column on the left.  Output pixel (a, j) of this block needs the
    # s2d 2x2 sub-blocks (a, j) "cur", (a, j-1) "left", (a-1, j) "up" and
    # (a-1, j-1) "up-left"; the four shifted slabs below are the in-VMEM im2col.
    cur = x_ref[pl.ds(1, th), pl.ds(1, wo), :].reshape(m, c4)
    left = x_ref[pl.ds(1, th), pl.ds(0, wo), :].reshape(m, c4)
    up = x_ref[pl.ds(0, th), pl.ds(1, wo), :].reshape(m, c4)
    ul = x_ref[pl.ds(0, th), pl.ds(0, wo), :].reshape(m, c4)

    # downsample: 3x3 stride-2 conv (+ folded BN) + SiLU as 4 slab matmuls.
    ds = jnp.dot(cur, w_cur_ref[...], preferred_element_type=f32)
    ds = ds + jnp.dot(up, w_up_ref[...], preferred_element_type=f32)
    ds = ds + jnp.dot(left, w_left_ref[...], preferred_element_type=f32)
    ds = ds + jnp.dot(ul, w_ul_ref[...], preferred_element_type=f32)
    ds = _silu(ds + b_ds_ref[...])                       # (m, Cp) f32

    # pooled = avgpool2(upsample2(ds) - code) == ds - 0.25 * sum_g SiLU(tap_g @ w_enc + b)
    # The 4 pool taps are exactly the 4 channel groups of `cur` (exact identity).
    w_enc = w_enc_ref[...]
    b_enc = b_enc_ref[...]
    code_sum = None
    for g in range(4):
        ct = _silu(jnp.dot(cur[:, g * cin:(g + 1) * cin], w_enc,
                           preferred_element_type=f32) + b_enc)
        code_sum = ct if code_sum is None else code_sum + ct
    pooled = ds - 0.25 * code_sum                        # (m, Cp) f32

    bf = x_ref.dtype
    dec = _silu(jnp.dot(pooled.astype(bf), w_dec_ref[...],
                        preferred_element_type=f32) + b_dec_ref[...])
    wts = _silu(jnp.dot(ds.astype(bf), w_wts_ref[...],
                        preferred_element_type=f32) + b_wts_ref[...])
    res = (dec + wts).reshape(th, wo, -1)                # (th, wo, Cp) f32

    cout = o_ref.shape[-1]
    o_ref[...] = res[:, :, :cout].astype(o_ref.dtype)


def _choose_row_tile(Ho, Wo, Cin, Cp, Cout, n_batch, out_itemsize, budget, max_m):
    """Largest divisor of Ho whose per-step VMEM footprint fits the budget."""
    def step_bytes(th):
        m = th * Wo
        in_blk = (th + 1) * (Wo + 1) * 4 * Cin * 2       # bf16 input block
        out_blk = th * Wo * Cout * out_itemsize          # output block
        slabs = 4 * m * Cp * 4                           # live f32 intermediates
        views = 4 * m * 4 * Cin * 2                      # shifted bf16 slabs
        return 2 * in_blk + 2 * out_blk + slabs + views  # in/out double-buffered
    need_multi = (n_batch == 1 and Ho > 1)               # keep both v7x TCs busy
    for th in sorted((d for d in range(1, Ho + 1) if Ho % d == 0), reverse=True):
        if need_multi and Ho // th < 2:
            continue
        if th * Wo > max_m:
            continue
        if step_bytes(th) <= budget:
            return th
    return 1


def trd_forward(x_nhwc, p, *, max_m=8192):
    N, H, W, Cin = x_nhwc.shape
    assert H % 2 == 0 and W % 2 == 0, "TRD requires even spatial dims"
    Ho, Wo = H // 2, W // 2
    Cout = p["w_enc"].shape[-1]
    Cp = ((Cout + 127) // 128) * 128                     # lane-dense compute width
    bf16, f32 = jnp.bfloat16, jnp.float32

    # ---- folded-BN weights in matmul form, zero-padded to Cp (bf16 MXU) ----
    def pad_n(w):                                        # (K, Cout) -> (K, Cp)
        return jnp.pad(w, ((0, 0), (0, Cp - Cout))).astype(bf16)

    def pad_kn(w):                                       # (Cout, Cout) -> (Cp, Cp)
        return jnp.pad(w, ((0, Cp - Cout), (0, Cp - Cout))).astype(bf16)

    def pad_b(b):                                        # (1, Cout) -> (1, Cp) f32
        return jnp.pad(b, ((0, 0), (0, Cp - Cout))).astype(f32)

    wds = p.get("w_ds_hwio", p["w_ds"].reshape(3, 3, Cin, Cout))
    z = jnp.zeros((Cin, Cout), wds.dtype)
    # channel-group order of the space-to-depth tensor: (sub_h, sub_w) = 00,01,10,11
    w_cur = pad_n(jnp.concatenate([wds[1, 1], wds[1, 2], wds[2, 1], wds[2, 2]], 0))
    w_up = pad_n(jnp.concatenate([z, z, wds[0, 1], wds[0, 2]], 0))
    w_left = pad_n(jnp.concatenate([z, wds[1, 0], z, wds[2, 0]], 0))
    w_ul = pad_n(jnp.concatenate([z, z, z, wds[0, 0]], 0))
    b_ds = pad_b(p["b_ds"])
    w_enc, b_enc = pad_n(p["w_enc"]), pad_b(p["b_enc"])
    w_wts, b_wts = pad_kn(p["w_wts"]), pad_b(p["b_wts"])
    w_dec, b_dec = pad_kn(p["w_dec"]), pad_b(p["b_dec"])
    const_ops = [w_cur, w_up, w_left, w_ul, b_ds,
                 w_enc, b_enc, w_wts, b_wts, w_dec, b_dec]

    # ---- per-generation VMEM budget and row-tile selection ----
    try:
        phys = int(pltpu.get_tpu_info().vmem_capacity_bytes)
    except Exception:
        phys = 0
    if phys >= (100 << 20):
        vmem_limit = 80 << 20        # v5e / v6e: 128 MiB physical VMEM
    elif phys > 0:
        vmem_limit = 44 << 20        # v7x: 64 MiB physical per TensorCore
    else:
        vmem_limit = 48 << 20        # unknown: safe on every generation
    out_isize = jnp.dtype(x_nhwc.dtype).itemsize
    w_bytes = sum(int(a.size) * a.dtype.itemsize for a in const_ops)
    budget = max(vmem_limit - 2 * w_bytes - (4 << 20), 2 << 20)
    th = _choose_row_tile(Ho, Wo, Cin, Cp, Cout, N, out_isize, budget, max_m)
    rb = Ho // th

    # ---- XLA-side layout glue: space-to-depth + top/left zero pad + halo row ----
    xb = x_nhwc.astype(bf16)
    x_s2d = xb.reshape(N, Ho, 2, Wo, 2, Cin).transpose(0, 1, 3, 2, 4, 5) \
              .reshape(N, Ho, Wo, 4 * Cin)
    xpad = jnp.pad(x_s2d, ((0, 0), (1, 0), (1, 0), (0, 0)))   # (N, Ho+1, Wo+1, 4C)
    main = xpad[:, :Ho].reshape(N, rb, th, Wo + 1, 4 * Cin)
    halo = xpad[:, th::th][:, :, None]                        # (N, rb, 1, Wo+1, 4C)
    xblk = jnp.concatenate([main, halo], axis=2)              # (N, rb, th+1, Wo+1, 4C)

    out_shape = jax.ShapeDtypeStruct((N, Ho, Wo, Cout), x_nhwc.dtype)

    def run(single_buffer):
        pm = pl.Buffered(1) if single_buffer else None

        def cspec(a):
            nd = a.ndim
            return pl.BlockSpec(a.shape, lambda n, r: (0,) * nd, pipeline_mode=pm)

        in_specs = [pl.BlockSpec((None, None, th + 1, Wo + 1, 4 * Cin),
                                 lambda n, r: (n, r, 0, 0, 0))]
        in_specs += [cspec(a) for a in const_ops]
        return pl.pallas_call(
            trd_kernel,
            out_shape=out_shape,
            grid=(N, rb),
            in_specs=in_specs,
            out_specs=pl.BlockSpec((None, th, Wo, Cout), lambda n, r: (n, r, 0, 0)),
            compiler_params=pltpu.CompilerParams(
                dimension_semantics=("parallel", "parallel"),
                vmem_limit_bytes=vmem_limit),
        )(xblk, *const_ops)

    try:
        return run(True)                     # single-buffered constant weights
    except Exception:
        return run(False)                    # fallback: default double buffering


def make_params(key, cin, cout):
    """Deterministic synthetic conv + BN params, BN folded into (weight, bias)."""
    eps = 1e-5

    def conv_bn(key, kh, kw, ci, co):
        k = jax.random.split(key, 5)
        w = 0.2 * jax.random.normal(k[0], (kh, kw, ci, co), jnp.float32)  # HWIO
        gamma = 1.0 + 0.1 * jax.random.normal(k[1], (co,), jnp.float32)
        beta = 0.1 * jax.random.normal(k[2], (co,), jnp.float32)
        mean = 0.1 * jax.random.normal(k[3], (co,), jnp.float32)
        var = 1.0 + 0.1 * jnp.abs(jax.random.normal(k[4], (co,), jnp.float32))
        s = gamma / jnp.sqrt(var + eps)
        w_f = w * s
        b_f = (beta - mean * s).reshape(1, co)
        return w_f, b_f

    ks = jax.random.split(key, 4)
    w_enc_hwio, b_enc = conv_bn(ks[0], 1, 1, cin, cout)
    w_wts_hwio, b_wts = conv_bn(ks[1], 1, 1, cout, cout)
    w_dec_hwio, b_dec = conv_bn(ks[2], 1, 1, cout, cout)
    w_ds_hwio, b_ds = conv_bn(ks[3], 3, 3, cin, cout)

    return {
        "w_enc": w_enc_hwio.reshape(cin, cout), "b_enc": b_enc,
        "w_wts": w_wts_hwio.reshape(cout, cout), "b_wts": b_wts,
        "w_dec": w_dec_hwio.reshape(cout, cout), "b_dec": b_dec,
        "w_ds": w_ds_hwio.reshape(9 * cin, cout), "b_ds": b_ds,
        "w_enc_hwio": w_enc_hwio, "w_wts_hwio": w_wts_hwio,
        "w_dec_hwio": w_dec_hwio, "w_ds_hwio": w_ds_hwio,
    }


def trd_reference(x_nhwc, p):
    """Pure-JAX reference (BN folded).  Conv operands round-trip through bf16
    to match the kernel's bf16 MXU inputs; all accumulation / epilogues f32."""
    def bf(a):
        return a.astype(jnp.bfloat16).astype(jnp.float32)

    def cbs(x, w_hwio, b, stride, pad):
        y = jax.lax.conv_general_dilated(
            bf(x), bf(w_hwio), window_strides=(stride, stride),
            padding=[(pad, pad), (pad, pad)],
            dimension_numbers=("NHWC", "HWIO", "NHWC"),
            precision=jax.lax.Precision.HIGHEST)
        y = y + b.reshape(1, 1, 1, -1)
        return y * jax.nn.sigmoid(y)

    code = cbs(x_nhwc, p["w_enc_hwio"], p["b_enc"], 1, 0)
    ds = cbs(x_nhwc, p["w_ds_hwio"], p["b_ds"], 2, 1)
    up = jnp.repeat(jnp.repeat(ds, 2, axis=1), 2, axis=2)
    res = up - code
    N, H, W, C = res.shape
    pooled = res.reshape(N, H // 2, 2, W // 2, 2, C).mean(axis=(2, 4))
    dec = cbs(pooled, p["w_dec_hwio"], p["b_dec"], 1, 0)
    wts = cbs(ds, p["w_wts_hwio"], p["b_wts"], 1, 0)
    return dec + wts


if __name__ == "__main__":
    key = jax.random.PRNGKey(0)
    k1, k2, k3, k4 = jax.random.split(key, 4)

    # Test 1: batch=2, Cin=4, Cout=8, 16x16 input (single row block per image).
    x1 = jax.random.normal(k1, (2, 16, 16, 4), jnp.float32)          # NHWC
    p1 = make_params(k2, 4, 8)
    out1 = jax.block_until_ready(trd_forward(x1, p1))
    ref1 = trd_reference(x1, p1)
    assert out1.shape == (2, 8, 8, 8), out1.shape
    err1 = float(jnp.max(jnp.abs(out1 - ref1)))
    assert jnp.allclose(out1, ref1, atol=2e-2, rtol=2e-2), err1

    # Test 2: batch=1, Cin=8, Cout=16, 32x32 input with max_m forcing multiple
    # row blocks (exercises the halo path and the rb>=2 megacore split).
    x2 = jax.random.normal(k3, (1, 32, 32, 8), jnp.float32)
    p2 = make_params(k4, 8, 16)
    out2 = jax.block_until_ready(trd_forward(x2, p2, max_m=64))
    ref2 = trd_reference(x2, p2)
    assert out2.shape == (1, 16, 16, 16), out2.shape
    err2 = float(jnp.max(jnp.abs(out2 - ref2)))
    assert jnp.allclose(out2, ref2, atol=2e-2, rtol=2e-2), err2

    print("KERNEL_OK")
</pallas_src>

<mosaic_0001>
module attributes {stable_mosaic.version = 11 : i64} {
  func.func @trd_kernel(%arg0: i32, %arg1: i32, %arg2: memref<1x1x9x9x16xbf16, #tpu.memory_space<vmem>>, %arg3: memref<16x128xbf16, #tpu.memory_space<vmem>>, %arg4: memref<16x128xbf16, #tpu.memory_space<vmem>>, %arg5: memref<16x128xbf16, #tpu.memory_space<vmem>>, %arg6: memref<16x128xbf16, #tpu.memory_space<vmem>>, %arg7: memref<1x128xf32, #tpu.memory_space<vmem>>, %arg8: memref<4x128xbf16, #tpu.memory_space<vmem>>, %arg9: memref<1x128xf32, #tpu.memory_space<vmem>>, %arg10: memref<128x128xbf16, #tpu.memory_space<vmem>>, %arg11: memref<1x128xf32, #tpu.memory_space<vmem>>, %arg12: memref<128x128xbf16, #tpu.memory_space<vmem>>, %arg13: memref<1x128xf32, #tpu.memory_space<vmem>>, %arg14: memref<1x8x8x8xf32, #tpu.memory_space<vmem>>) attributes {dimension_semantics = [#tpu.dimension_semantics<parallel>, #tpu.dimension_semantics<parallel>], iteration_bounds = array<i64: 2, 1>, scalar_prefetch = 0 : i64, scratch_operands = 0 : i64, tpu.core_type = #tpu.core_type<tc>, window_params = [{transform_indices = @transform_0, window_bounds = array<i64: 1, 1, 9, 9, 16>}, {pipeline_mode = #tpu.pipeline_mode<synchronous>, transform_indices = @transform_1, window_bounds = array<i64: 16, 128>}, {pipeline_mode = #tpu.pipeline_mode<synchronous>, transform_indices = @transform_2, window_bounds = array<i64: 16, 128>}, {pipeline_mode = #tpu.pipeline_mode<synchronous>, transform_indices = @transform_3, window_bounds = array<i64: 16, 128>}, {pipeline_mode = #tpu.pipeline_mode<synchronous>, transform_indices = @transform_4, window_bounds = array<i64: 16, 128>}, {pipeline_mode = #tpu.pipeline_mode<synchronous>, transform_indices = @transform_5, window_bounds = array<i64: 1, 128>}, {pipeline_mode = #tpu.pipeline_mode<synchronous>, transform_indices = @transform_6, window_bounds = array<i64: 4, 128>}, {pipeline_mode = #tpu.pipeline_mode<synchronous>, transform_indices = @transform_7, window_bounds = array<i64: 1, 128>}, {pipeline_mode = #tpu.pipeline_mode<synchronous>, transform_indices = @transform_8, window_bounds = array<i64: 128, 128>}, {pipeline_mode = #tpu.pipeline_mode<synchronous>, transform_indices = @transform_9, window_bounds = array<i64: 1, 128>}, {pipeline_mode = #tpu.pipeline_mode<synchronous>, transform_indices = @transform_10, window_bounds = array<i64: 128, 128>}, {pipeline_mode = #tpu.pipeline_mode<synchronous>, transform_indices = @transform_11, window_bounds = array<i64: 1, 128>}, {transform_indices = @transform_12, window_bounds = array<i64: 1, 8, 8, 8>}]} {
    %c0 = arith.constant 0 : index
    %c0_0 = arith.constant 0 : index
    %c1 = arith.constant 1 : index
    %c1_1 = arith.constant 1 : index
    %c0_2 = arith.constant 0 : index
    %0 = vector.load %arg2[%c0, %c0_0, %c1, %c1_1, %c0_2] : memref<1x1x9x9x16xbf16, #tpu.memory_space<vmem>>, vector<1x1x8x8x16xbf16>
    %1 = vector.shape_cast %0 : vector<1x1x8x8x16xbf16> to vector<8x8x16xbf16>
    %2 = vector.shape_cast %1 : vector<8x8x16xbf16> to vector<64x16xbf16>
    %c0_3 = arith.constant 0 : index
    %c0_4 = arith.constant 0 : index
    %c1_5 = arith.constant 1 : index
    %c0_6 = arith.constant 0 : index
    %c0_7 = arith.constant 0 : index
    %3 = vector.load %arg2[%c0_3, %c0_4, %c1_5, %c0_6, %c0_7] : memref<1x1x9x9x16xbf16, #tpu.memory_space<vmem>>, vector<1x1x8x8x16xbf16>
    %4 = vector.shape_cast %3 : vector<1x1x8x8x16xbf16> to vector<8x8x16xbf16>
    %5 = vector.shape_cast %4 : vector<8x8x16xbf16> to vector<64x16xbf16>
    %c0_8 = arith.constant 0 : index
    %c0_9 = arith.constant 0 : index
    %c0_10 = arith.constant 0 : index
    %c1_11 = arith.constant 1 : index
    %c0_12 = arith.constant 0 : index
    %6 = vector.load %arg2[%c0_8, %c0_9, %c0_10, %c1_11, %c0_12] : memref<1x1x9x9x16xbf16, #tpu.memory_space<vmem>>, vector<1x1x8x8x16xbf16>
    %7 = vector.shape_cast %6 : vector<1x1x8x8x16xbf16> to vector<8x8x16xbf16>
    %8 = vector.shape_cast %7 : vector<8x8x16xbf16> to vector<64x16xbf16>
    %c0_13 = arith.constant 0 : index
    %c0_14 = arith.constant 0 : index
    %c0_15 = arith.constant 0 : index
    %c0_16 = arith.constant 0 : index
    %c0_17 = arith.constant 0 : index
    %9 = vector.load %arg2[%c0_13, %c0_14, %c0_15, %c0_16, %c0_17] : memref<1x1x9x9x16xbf16, #tpu.memory_space<vmem>>, vector<1x1x8x8x16xbf16>
    %10 = vector.shape_cast %9 : vector<1x1x8x8x16xbf16> to vector<8x8x16xbf16>
    %11 = vector.shape_cast %10 : vector<8x8x16xbf16> to vector<64x16xbf16>
    %c0_18 = arith.constant 0 : index
    %c0_19 = arith.constant 0 : index
    %12 = vector.load %arg3[%c0_18, %c0_19] : memref<16x128xbf16, #tpu.memory_space<vmem>>, vector<16x128xbf16>
    %cst = arith.constant dense<0.000000e+00> : vector<64x128xf32>
    %13 = tpu.matmul %2, %12, %cst {dimension_numbers = #tpu.dot_dimension_numbers<[1], [0], [0], [1], [0, 0, 1, 1], [], []>} : vector<64x16xbf16>, vector<16x128xbf16>, vector<64x128xf32> -> vector<64x128xf32>
    %c0_20 = arith.constant 0 : index
    %c0_21 = arith.constant 0 : index
    %14 = vector.load %arg4[%c0_20, %c0_21] : memref<16x128xbf16, #tpu.memory_space<vmem>>, vector<16x128xbf16>
    %cst_22 = arith.constant dense<0.000000e+00> : vector<64x128xf32>
    %15 = tpu.matmul %8, %14, %cst_22 {dimension_numbers = #tpu.dot_dimension_numbers<[1], [0], [0], [1], [0, 0, 1, 1], [], []>} : vector<64x16xbf16>, vector<16x128xbf16>, vector<64x128xf32> -> vector<64x128xf32>
    %16 = arith.addf %13, %15 : vector<64x128xf32>
    %c0_23 = arith.constant 0 : index
    %c0_24 = arith.constant 0 : index
    %17 = vector.load %arg5[%c0_23, %c0_24] : memref<16x128xbf16, #tpu.memory_space<vmem>>, vector<16x128xbf16>
    %cst_25 = arith.constant dense<0.000000e+00> : vector<64x128xf32>
    %18 = tpu.matmul %5, %17, %cst_25 {dimension_numbers = #tpu.dot_dimension_numbers<[1], [0], [0], [1], [0, 0, 1, 1], [], []>} : vector<64x16xbf16>, vector<16x128xbf16>, vector<64x128xf32> -> vector<64x128xf32>
    %19 = arith.addf %16, %18 : vector<64x128xf32>
    %c0_26 = arith.constant 0 : index
    %c0_27 = arith.constant 0 : index
    %20 = vector.load %arg6[%c0_26, %c0_27] : memref<16x128xbf16, #tpu.memory_space<vmem>>, vector<16x128xbf16>
    %cst_28 = arith.constant dense<0.000000e+00> : vector<64x128xf32>
    %21 = tpu.matmul %11, %20, %cst_28 {dimension_numbers = #tpu.dot_dimension_numbers<[1], [0], [0], [1], [0, 0, 1, 1], [], []>} : vector<64x16xbf16>, vector<16x128xbf16>, vector<64x128xf32> -> vector<64x128xf32>
    %22 = arith.addf %19, %21 : vector<64x128xf32>
    %c0_29 = arith.constant 0 : index
    %c0_30 = arith.constant 0 : index
    %23 = vector.load %arg7[%c0_29, %c0_30] : memref<1x128xf32, #tpu.memory_space<vmem>>, vector<1x128xf32>
    %24 = vector.broadcast %23 : vector<1x128xf32> to vector<64x128xf32>
    %25 = arith.addf %22, %24 : vector<64x128xf32>
    %26 = arith.negf %25 : vector<64x128xf32>
    %27 = math.exp %26 : vector<64x128xf32>
    %cst_31 = arith.constant 1.000000e+00 : f32
    %28 = vector.broadcast %cst_31 : f32 to vector<64x128xf32>
    %29 = arith.addf %28, %27 : vector<64x128xf32>
    %30 = arith.divf %28, %29 : vector<64x128xf32>
    %31 = arith.mulf %25, %30 : vector<64x128xf32>
    %c0_32 = arith.constant 0 : index
    %c0_33 = arith.constant 0 : index
    %32 = vector.load %arg8[%c0_32, %c0_33] : memref<4x128xbf16, #tpu.memory_space<vmem>>, vector<4x128xbf16>
    %c0_34 = arith.constant 0 : index
    %c0_35 = arith.constant 0 : index
    %33 = vector.load %arg9[%c0_34, %c0_35] : memref<1x128xf32, #tpu.memory_space<vmem>>, vector<1x128xf32>
    %34 = vector.extract_strided_slice %2 {offsets = [0, 0], sizes = [64, 4], strides = [1, 1]} : vector<64x16xbf16> to vector<64x4xbf16>
    %cst_36 = arith.constant dense<0.000000e+00> : vector<64x128xf32>
    %35 = tpu.matmul %34, %32, %cst_36 {dimension_numbers = #tpu.dot_dimension_numbers<[1], [0], [0], [1], [0, 0, 1, 1], [], []>} : vector<64x4xbf16>, vector<4x128xbf16>, vector<64x128xf32> -> vector<64x128xf32>
    %36 = vector.broadcast %33 : vector<1x128xf32> to vector<64x128xf32>
    %37 = arith.addf %35, %36 : vector<64x128xf32>
    %38 = arith.negf %37 : vector<64x128xf32>
    %39 = math.exp %38 : vector<64x128xf32>
    %cst_37 = arith.constant 1.000000e+00 : f32
    %40 = vector.broadcast %cst_37 : f32 to vector<64x128xf32>
    %41 = arith.addf %40, %39 : vector<64x128xf32>
    %42 = arith.divf %40, %41 : vector<64x128xf32>
    %43 = arith.mulf %37, %42 : vector<64x128xf32>
    %44 = vector.extract_strided_slice %2 {offsets = [0, 4], sizes = [64, 4], strides = [1, 1]} : vector<64x16xbf16> to vector<64x4xbf16>
    %cst_38 = arith.constant dense<0.000000e+00> : vector<64x128xf32>
    %45 = tpu.matmul %44, %32, %cst_38 {dimension_numbers = #tpu.dot_dimension_numbers<[1], [0], [0], [1], [0, 0, 1, 1], [], []>} : vector<64x4xbf16>, vector<4x128xbf16>, vector<64x128xf32> -> vector<64x128xf32>
    %46 = vector.broadcast %33 : vector<1x128xf32> to vector<64x128xf32>
    %47 = arith.addf %45, %46 : vector<64x128xf32>
    %48 = arith.negf %47 : vector<64x128xf32>
    %49 = math.exp %48 : vector<64x128xf32>
    %cst_39 = arith.constant 1.000000e+00 : f32
    %50 = vector.broadcast %cst_39 : f32 to vector<64x128xf32>
    %51 = arith.addf %50, %49 : vector<64x128xf32>
    %52 = arith.divf %50, %51 : vector<64x128xf32>
    %53 = arith.mulf %47, %52 : vector<64x128xf32>
    %54 = arith.addf %43, %53 : vector<64x128xf32>
    %55 = vector.extract_strided_slice %2 {offsets = [0, 8], sizes = [64, 4], strides = [1, 1]} : vector<64x16xbf16> to vector<64x4xbf16>
    %cst_40 = arith.constant dense<0.000000e+00> : vector<64x128xf32>
    %56 = tpu.matmul %55, %32, %cst_40 {dimension_numbers = #tpu.dot_dimension_numbers<[1], [0], [0], [1], [0, 0, 1, 1], [], []>} : vector<64x4xbf16>, vector<4x128xbf16>, vector<64x128xf32> -> vector<64x128xf32>
    %57 = vector.broadcast %33 : vector<1x128xf32> to vector<64x128xf32>
    %58 = arith.addf %56, %57 : vector<64x128xf32>
    %59 = arith.negf %58 : vector<64x128xf32>
    %60 = math.exp %59 : vector<64x128xf32>
    %cst_41 = arith.constant 1.000000e+00 : f32
    %61 = vector.broadcast %cst_41 : f32 to vector<64x128xf32>
    %62 = arith.addf %61, %60 : vector<64x128xf32>
    %63 = arith.divf %61, %62 : vector<64x128xf32>
    %64 = arith.mulf %58, %63 : vector<64x128xf32>
    %65 = arith.addf %54, %64 : vector<64x128xf32>
    %66 = vector.extract_strided_slice %2 {offsets = [0, 12], sizes = [64, 4], strides = [1, 1]} : vector<64x16xbf16> to vector<64x4xbf16>
    %cst_42 = arith.constant dense<0.000000e+00> : vector<64x128xf32>
    %67 = tpu.matmul %66, %32, %cst_42 {dimension_numbers = #tpu.dot_dimension_numbers<[1], [0], [0], [1], [0, 0, 1, 1], [], []>} : vector<64x4xbf16>, vector<4x128xbf16>, vector<64x128xf32> -> vector<64x128xf32>
    %68 = vector.broadcast %33 : vector<1x128xf32> to vector<64x128xf32>
    %69 = arith.addf %67, %68 : vector<64x128xf32>
    %70 = arith.negf %69 : vector<64x128xf32>
    %71 = math.exp %70 : vector<64x128xf32>
    %cst_43 = arith.constant 1.000000e+00 : f32
    %72 = vector.broadcast %cst_43 : f32 to vector<64x128xf32>
    %73 = arith.addf %72, %71 : vector<64x128xf32>
    %74 = arith.divf %72, %73 : vector<64x128xf32>
    %75 = arith.mulf %69, %74 : vector<64x128xf32>
    %76 = arith.addf %65, %75 : vector<64x128xf32>
    %cst_44 = arith.constant 2.500000e-01 : f32
    %77 = vector.broadcast %cst_44 : f32 to vector<64x128xf32>
    %78 = arith.mulf %77, %76 : vector<64x128xf32>
    %79 = arith.subf %31, %78 : vector<64x128xf32>
    %80 = arith.truncf %79 : vector<64x128xf32> to vector<64x128xbf16>
    %c0_45 = arith.constant 0 : index
    %c0_46 = arith.constant 0 : index
    %81 = vector.load %arg12[%c0_45, %c0_46] : memref<128x128xbf16, #tpu.memory_space<vmem>>, vector<128x128xbf16>
    %cst_47 = arith.constant dense<0.000000e+00> : vector<64x128xf32>
    %82 = tpu.matmul %80, %81, %cst_47 {dimension_numbers = #tpu.dot_dimension_numbers<[1], [0], [0], [1], [0, 0, 1, 1], [], []>} : vector<64x128xbf16>, vector<128x128xbf16>, vector<64x128xf32> -> vector<64x128xf32>
    %c0_48 = arith.constant 0 : index
    %c0_49 = arith.constant 0 : index
    %83 = vector.load %arg13[%c0_48, %c0_49] : memref<1x128xf32, #tpu.memory_space<vmem>>, vector<1x128xf32>
    %84 = vector.broadcast %83 : vector<1x128xf32> to vector<64x128xf32>
    %85 = arith.addf %82, %84 : vector<64x128xf32>
    %86 = arith.negf %85 : vector<64x128xf32>
    %87 = math.exp %86 : vector<64x128xf32>
    %cst_50 = arith.constant 1.000000e+00 : f32
    %88 = vector.broadcast %cst_50 : f32 to vector<64x128xf32>
    %89 = arith.addf %88, %87 : vector<64x128xf32>
    %90 = arith.divf %88, %89 : vector<64x128xf32>
    %91 = arith.mulf %85, %90 : vector<64x128xf32>
    %92 = arith.truncf %31 : vector<64x128xf32> to vector<64x128xbf16>
    %c0_51 = arith.constant 0 : index
    %c0_52 = arith.constant 0 : index
    %93 = vector.load %arg10[%c0_51, %c0_52] : memref<128x128xbf16, #tpu.memory_space<vmem>>, vector<128x128xbf16>
    %cst_53 = arith.constant dense<0.000000e+00> : vector<64x128xf32>
    %94 = tpu.matmul %92, %93, %cst_53 {dimension_numbers = #tpu.dot_dimension_numbers<[1], [0], [0], [1], [0, 0, 1, 1], [], []>} : vector<64x128xbf16>, vector<128x128xbf16>, vector<64x128xf32> -> vector<64x128xf32>
    %c0_54 = arith.constant 0 : index
    %c0_55 = arith.constant 0 : index
    %95 = vector.load %arg11[%c0_54, %c0_55] : memref<1x128xf32, #tpu.memory_space<vmem>>, vector<1x128xf32>
    %96 = vector.broadcast %95 : vector<1x128xf32> to vector<64x128xf32>
    %97 = arith.addf %94, %96 : vector<64x128xf32>
    %98 = arith.negf %97 : vector<64x128xf32>
    %99 = math.exp %98 : vector<64x128xf32>
    %cst_56 = arith.constant 1.000000e+00 : f32
    %100 = vector.broadcast %cst_56 : f32 to vector<64x128xf32>
    %101 = arith.addf %100, %99 : vector<64x128xf32>
    %102 = arith.divf %100, %101 : vector<64x128xf32>
    %103 = arith.mulf %97, %102 : vector<64x128xf32>
    %104 = arith.addf %91, %103 : vector<64x128xf32>
    %105 = vector.shape_cast %104 : vector<64x128xf32> to vector<8x8x128xf32>
    %106 = vector.extract_strided_slice %105 {offsets = [0, 0, 0], sizes = [8, 8, 8], strides = [1, 1, 1]} : vector<8x8x128xf32> to vector<8x8x8xf32>
    %c0_57 = arith.constant 0 : index
    %c0_58 = arith.constant 0 : index
    %c0_59 = arith.constant 0 : index
    %c0_60 = arith.constant 0 : index
    %107 = vector.load %arg14[%c0_57, %c0_58, %c0_59, %c0_60] : memref<1x8x8x8xf32, #tpu.memory_space<vmem>>, vector<1x8x8x8xf32>
    %108 = vector.shape_cast %107 : vector<1x8x8x8xf32> to vector<8x8x8xf32>
    %109 = vector.shape_cast %106 : vector<8x8x8xf32> to vector<1x8x8x8xf32>
    tpu.vector_store %arg14[%c0_57, %c0_58, %c0_59, %c0_60], %109 {strides = array<i32>} : memref<1x8x8x8xf32, #tpu.memory_space<vmem>>, vector<1x8x8x8xf32>,
    return
  }
  func.func @transform_0(%arg0: i32, %arg1: i32) -> (i32, i32, i32, i32, i32) {
    %c0_i32 = arith.constant 0 : i32
    %c0_i32_0 = arith.constant 0 : i32
    %c0_i32_1 = arith.constant 0 : i32
    %c0_i32_2 = arith.constant 0 : i32
    return %arg0, %arg1, %c0_i32, %c0_i32_0, %c0_i32_1 : i32, i32, i32, i32, i32
  }
  func.func @transform_1(%arg0: i32, %arg1: i32) -> (i32, i32) {
    %c0_i32 = arith.constant 0 : i32
    %c0_i32_0 = arith.constant 0 : i32
    %c0_i32_1 = arith.constant 0 : i32
    return %c0_i32, %c0_i32_0 : i32, i32
  }
  func.func @transform_2(%arg0: i32, %arg1: i32) -> (i32, i32) {
    %c0_i32 = arith.constant 0 : i32
    %c0_i32_0 = arith.constant 0 : i32
    %c0_i32_1 = arith.constant 0 : i32
    return %c0_i32, %c0_i32_0 : i32, i32
  }
  func.func @transform_3(%arg0: i32, %arg1: i32) -> (i32, i32) {
    %c0_i32 = arith.constant 0 : i32
    %c0_i32_0 = arith.constant 0 : i32
    %c0_i32_1 = arith.constant 0 : i32
    return %c0_i32, %c0_i32_0 : i32, i32
  }
  func.func @transform_4(%arg0: i32, %arg1: i32) -> (i32, i32) {
    %c0_i32 = arith.constant 0 : i32
    %c0_i32_0 = arith.constant 0 : i32
    %c0_i32_1 = arith.constant 0 : i32
    return %c0_i32, %c0_i32_0 : i32, i32
  }
  func.func @transform_5(%arg0: i32, %arg1: i32) -> (i32, i32) {
    %c0_i32 = arith.constant 0 : i32
    %c0_i32_0 = arith.constant 0 : i32
    %c0_i32_1 = arith.constant 0 : i32
    return %c0_i32, %c0_i32_0 : i32, i32
  }
  func.func @transform_6(%arg0: i32, %arg1: i32) -> (i32, i32) {
    %c0_i32 = arith.constant 0 : i32
    %c0_i32_0 = arith.constant 0 : i32
    %c0_i32_1 = arith.constant 0 : i32
    return %c0_i32, %c0_i32_0 : i32, i32
  }
  func.func @transform_7(%arg0: i32, %arg1: i32) -> (i32, i32) {
    %c0_i32 = arith.constant 0 : i32
    %c0_i32_0 = arith.constant 0 : i32
    %c0_i32_1 = arith.constant 0 : i32
    return %c0_i32, %c0_i32_0 : i32, i32
  }
  func.func @transform_8(%arg0: i32, %arg1: i32) -> (i32, i32) {
    %c0_i32 = arith.constant 0 : i32
    %c0_i32_0 = arith.constant 0 : i32
    %c0_i32_1 = arith.constant 0 : i32
    return %c0_i32, %c0_i32_0 : i32, i32
  }
  func.func @transform_9(%arg0: i32, %arg1: i32) -> (i32, i32) {
    %c0_i32 = arith.constant 0 : i32
    %c0_i32_0 = arith.constant 0 : i32
    %c0_i32_1 = arith.constant 0 : i32
    return %c0_i32, %c0_i32_0 : i32, i32
  }
  func.func @transform_10(%arg0: i32, %arg1: i32) -> (i32, i32) {
    %c0_i32 = arith.constant 0 : i32
    %c0_i32_0 = arith.constant 0 : i32
    %c0_i32_1 = arith.constant 0 : i32
    return %c0_i32, %c0_i32_0 : i32, i32
  }
  func.func @transform_11(%arg0: i32, %arg1: i32) -> (i32, i32) {
    %c0_i32 = arith.constant 0 : i32
    %c0_i32_0 = arith.constant 0 : i32
    %c0_i32_1 = arith.constant 0 : i32
    return %c0_i32, %c0_i32_0 : i32, i32
  }
  func.func @transform_12(%arg0: i32, %arg1: i32) -> (i32, i32, i32, i32) {
    %c0_i32 = arith.constant 0 : i32
    %c0_i32_0 = arith.constant 0 : i32
    %c0_i32_1 = arith.constant 0 : i32
    return %arg0, %arg1, %c0_i32, %c0_i32_0 : i32, i32, i32, i32
  }
}

module attributes {stable_mosaic.version = 11 : i64} {
  func.func @trd_kernel(%arg0: i32, %arg1: i32, %arg2: memref<1x1x9x9x16xbf16, #tpu.memory_space<vmem>>, %arg3: memref<16x128xbf16, #tpu.memory_space<vmem>>, %arg4: memref<16x128xbf16, #tpu.memory_space<vmem>>, %arg5: memref<16x128xbf16, #tpu.memory_space<vmem>>, %arg6: memref<16x128xbf16, #tpu.memory_space<vmem>>, %arg7: memref<1x128xf32, #tpu.memory_space<vmem>>, %arg8: memref<4x128xbf16, #tpu.memory_space<vmem>>, %arg9: memref<1x128xf32, #tpu.memory_space<vmem>>, %arg10: memref<128x128xbf16, #tpu.memory_space<vmem>>, %arg11: memref<1x128xf32, #tpu.memory_space<vmem>>, %arg12: memref<128x128xbf16, #tpu.memory_space<vmem>>, %arg13: memref<1x128xf32, #tpu.memory_space<vmem>>, %arg14: memref<1x8x8x8xf32, #tpu.memory_space<vmem>>) attributes {dimension_semantics = [#tpu.dimension_semantics<parallel>, #tpu.dimension_semantics<parallel>], iteration_bounds = array<i64: 2, 1>, scalar_prefetch = 0 : i64, scratch_operands = 0 : i64, tpu.core_type = #tpu.core_type<tc>, window_params = [{transform_indices = @transform_0, window_bounds = array<i64: 1, 1, 9, 9, 16>}, {pipeline_mode = #tpu.pipeline_mode<synchronous>, transform_indices = @transform_1, window_bounds = array<i64: 16, 128>}, {pipeline_mode = #tpu.pipeline_mode<synchronous>, transform_indices = @transform_2, window_bounds = array<i64: 16, 128>}, {pipeline_mode = #tpu.pipeline_mode<synchronous>, transform_indices = @transform_3, window_bounds = array<i64: 16, 128>}, {pipeline_mode = #tpu.pipeline_mode<synchronous>, transform_indices = @transform_4, window_bounds = array<i64: 16, 128>}, {pipeline_mode = #tpu.pipeline_mode<synchronous>, transform_indices = @transform_5, window_bounds = array<i64: 1, 128>}, {pipeline_mode = #tpu.pipeline_mode<synchronous>, transform_indices = @transform_6, window_bounds = array<i64: 4, 128>}, {pipeline_mode = #tpu.pipeline_mode<synchronous>, transform_indices = @transform_7, window_bounds = array<i64: 1, 128>}, {pipeline_mode = #tpu.pipeline_mode<synchronous>, transform_indices = @transform_8, window_bounds = array<i64: 128, 128>}, {pipeline_mode = #tpu.pipeline_mode<synchronous>, transform_indices = @transform_9, window_bounds = array<i64: 1, 128>}, {pipeline_mode = #tpu.pipeline_mode<synchronous>, transform_indices = @transform_10, window_bounds = array<i64: 128, 128>}, {pipeline_mode = #tpu.pipeline_mode<synchronous>, transform_indices = @transform_11, window_bounds = array<i64: 1, 128>}, {transform_indices = @transform_12, window_bounds = array<i64: 1, 8, 8, 8>}]} {
    %c0 = arith.constant 0 : index
    %c0_0 = arith.constant 0 : index
    %c1 = arith.constant 1 : index
    %c1_1 = arith.constant 1 : index
    %c0_2 = arith.constant 0 : index
    %0 = vector.load %arg2[%c0, %c0_0, %c1, %c1_1, %c0_2] : memref<1x1x9x9x16xbf16, #tpu.memory_space<vmem>>, vector<1x1x8x8x16xbf16>
    %1 = vector.shape_cast %0 : vector<1x1x8x8x16xbf16> to vector<8x8x16xbf16>
    %2 = vector.shape_cast %1 : vector<8x8x16xbf16> to vector<64x16xbf16>
    %c0_3 = arith.constant 0 : index
    %c0_4 = arith.constant 0 : index
    %c1_5 = arith.constant 1 : index
    %c0_6 = arith.constant 0 : index
    %c0_7 = arith.constant 0 : index
    %3 = vector.load %arg2[%c0_3, %c0_4, %c1_5, %c0_6, %c0_7] : memref<1x1x9x9x16xbf16, #tpu.memory_space<vmem>>, vector<1x1x8x8x16xbf16>
    %4 = vector.shape_cast %3 : vector<1x1x8x8x16xbf16> to vector<8x8x16xbf16>
    %5 = vector.shape_cast %4 : vector<8x8x16xbf16> to vector<64x16xbf16>
    %c0_8 = arith.constant 0 : index
    %c0_9 = arith.constant 0 : index
    %c0_10 = arith.constant 0 : index
    %c1_11 = arith.constant 1 : index
    %c0_12 = arith.constant 0 : index
    %6 = vector.load %arg2[%c0_8, %c0_9, %c0_10, %c1_11, %c0_12] : memref<1x1x9x9x16xbf16, #tpu.memory_space<vmem>>, vector<1x1x8x8x16xbf16>
    %7 = vector.shape_cast %6 : vector<1x1x8x8x16xbf16> to vector<8x8x16xbf16>
    %8 = vector.shape_cast %7 : vector<8x8x16xbf16> to vector<64x16xbf16>
    %c0_13 = arith.constant 0 : index
    %c0_14 = arith.constant 0 : index
    %c0_15 = arith.constant 0 : index
    %c0_16 = arith.constant 0 : index
    %c0_17 = arith.constant 0 : index
    %9 = vector.load %arg2[%c0_13, %c0_14, %c0_15, %c0_16, %c0_17] : memref<1x1x9x9x16xbf16, #tpu.memory_space<vmem>>, vector<1x1x8x8x16xbf16>
    %10 = vector.shape_cast %9 : vector<1x1x8x8x16xbf16> to vector<8x8x16xbf16>
    %11 = vector.shape_cast %10 : vector<8x8x16xbf16> to vector<64x16xbf16>
    %c0_18 = arith.constant 0 : index
    %c0_19 = arith.constant 0 : index
    %12 = vector.load %arg3[%c0_18, %c0_19] : memref<16x128xbf16, #tpu.memory_space<vmem>>, vector<16x128xbf16>
    %cst = arith.constant dense<0.000000e+00> : vector<64x128xf32>
    %13 = tpu.matmul %2, %12, %cst {dimension_numbers = #tpu.dot_dimension_numbers<[1], [0], [0], [1], [0, 0, 1, 1], [], []>} : vector<64x16xbf16>, vector<16x128xbf16>, vector<64x128xf32> -> vector<64x128xf32>
    %c0_20 = arith.constant 0 : index
    %c0_21 = arith.constant 0 : index
    %14 = vector.load %arg4[%c0_20, %c0_21] : memref<16x128xbf16, #tpu.memory_space<vmem>>, vector<16x128xbf16>
    %cst_22 = arith.constant dense<0.000000e+00> : vector<64x128xf32>
    %15 = tpu.matmul %8, %14, %cst_22 {dimension_numbers = #tpu.dot_dimension_numbers<[1], [0], [0], [1], [0, 0, 1, 1], [], []>} : vector<64x16xbf16>, vector<16x128xbf16>, vector<64x128xf32> -> vector<64x128xf32>
    %16 = arith.addf %13, %15 : vector<64x128xf32>
    %c0_23 = arith.constant 0 : index
    %c0_24 = arith.constant 0 : index
    %17 = vector.load %arg5[%c0_23, %c0_24] : memref<16x128xbf16, #tpu.memory_space<vmem>>, vector<16x128xbf16>
    %cst_25 = arith.constant dense<0.000000e+00> : vector<64x128xf32>
    %18 = tpu.matmul %5, %17, %cst_25 {dimension_numbers = #tpu.dot_dimension_numbers<[1], [0], [0], [1], [0, 0, 1, 1], [], []>} : vector<64x16xbf16>, vector<16x128xbf16>, vector<64x128xf32> -> vector<64x128xf32>
    %19 = arith.addf %16, %18 : vector<64x128xf32>
    %c0_26 = arith.constant 0 : index
    %c0_27 = arith.constant 0 : index
    %20 = vector.load %arg6[%c0_26, %c0_27] : memref<16x128xbf16, #tpu.memory_space<vmem>>, vector<16x128xbf16>
    %cst_28 = arith.constant dense<0.000000e+00> : vector<64x128xf32>
    %21 = tpu.matmul %11, %20, %cst_28 {dimension_numbers = #tpu.dot_dimension_numbers<[1], [0], [0], [1], [0, 0, 1, 1], [], []>} : vector<64x16xbf16>, vector<16x128xbf16>, vector<64x128xf32> -> vector<64x128xf32>
    %22 = arith.addf %19, %21 : vector<64x128xf32>
    %c0_29 = arith.constant 0 : index
    %c0_30 = arith.constant 0 : index
    %23 = vector.load %arg7[%c0_29, %c0_30] : memref<1x128xf32, #tpu.memory_space<vmem>>, vector<1x128xf32>
    %24 = vector.broadcast %23 : vector<1x128xf32> to vector<64x128xf32>
    %25 = arith.addf %22, %24 : vector<64x128xf32>
    %26 = arith.negf %25 : vector<64x128xf32>
    %27 = math.exp %26 : vector<64x128xf32>
    %cst_31 = arith.constant 1.000000e+00 : f32
    %28 = vector.broadcast %cst_31 : f32 to vector<64x128xf32>
    %29 = arith.addf %28, %27 : vector<64x128xf32>
    %30 = arith.divf %28, %29 : vector<64x128xf32>
    %31 = arith.mulf %25, %30 : vector<64x128xf32>
    %c0_32 = arith.constant 0 : index
    %c0_33 = arith.constant 0 : index
    %32 = vector.load %arg8[%c0_32, %c0_33] : memref<4x128xbf16, #tpu.memory_space<vmem>>, vector<4x128xbf16>
    %c0_34 = arith.constant 0 : index
    %c0_35 = arith.constant 0 : index
    %33 = vector.load %arg9[%c0_34, %c0_35] : memref<1x128xf32, #tpu.memory_space<vmem>>, vector<1x128xf32>
    %34 = vector.extract_strided_slice %2 {offsets = [0, 0], sizes = [64, 4], strides = [1, 1]} : vector<64x16xbf16> to vector<64x4xbf16>
    %cst_36 = arith.constant dense<0.000000e+00> : vector<64x128xf32>
    %35 = tpu.matmul %34, %32, %cst_36 {dimension_numbers = #tpu.dot_dimension_numbers<[1], [0], [0], [1], [0, 0, 1, 1], [], []>} : vector<64x4xbf16>, vector<4x128xbf16>, vector<64x128xf32> -> vector<64x128xf32>
    %36 = vector.broadcast %33 : vector<1x128xf32> to vector<64x128xf32>
    %37 = arith.addf %35, %36 : vector<64x128xf32>
    %38 = arith.negf %37 : vector<64x128xf32>
    %39 = math.exp %38 : vector<64x128xf32>
    %cst_37 = arith.constant 1.000000e+00 : f32
    %40 = vector.broadcast %cst_37 : f32 to vector<64x128xf32>
    %41 = arith.addf %40, %39 : vector<64x128xf32>
    %42 = arith.divf %40, %41 : vector<64x128xf32>
    %43 = arith.mulf %37, %42 : vector<64x128xf32>
    %44 = vector.extract_strided_slice %2 {offsets = [0, 4], sizes = [64, 4], strides = [1, 1]} : vector<64x16xbf16> to vector<64x4xbf16>
    %cst_38 = arith.constant dense<0.000000e+00> : vector<64x128xf32>
    %45 = tpu.matmul %44, %32, %cst_38 {dimension_numbers = #tpu.dot_dimension_numbers<[1], [0], [0], [1], [0, 0, 1, 1], [], []>} : vector<64x4xbf16>, vector<4x128xbf16>, vector<64x128xf32> -> vector<64x128xf32>
    %46 = vector.broadcast %33 : vector<1x128xf32> to vector<64x128xf32>
    %47 = arith.addf %45, %46 : vector<64x128xf32>
    %48 = arith.negf %47 : vector<64x128xf32>
    %49 = math.exp %48 : vector<64x128xf32>
    %cst_39 = arith.constant 1.000000e+00 : f32
    %50 = vector.broadcast %cst_39 : f32 to vector<64x128xf32>
    %51 = arith.addf %50, %49 : vector<64x128xf32>
    %52 = arith.divf %50, %51 : vector<64x128xf32>
    %53 = arith.mulf %47, %52 : vector<64x128xf32>
    %54 = arith.addf %43, %53 : vector<64x128xf32>
    %55 = vector.extract_strided_slice %2 {offsets = [0, 8], sizes = [64, 4], strides = [1, 1]} : vector<64x16xbf16> to vector<64x4xbf16>
    %cst_40 = arith.constant dense<0.000000e+00> : vector<64x128xf32>
    %56 = tpu.matmul %55, %32, %cst_40 {dimension_numbers = #tpu.dot_dimension_numbers<[1], [0], [0], [1], [0, 0, 1, 1], [], []>} : vector<64x4xbf16>, vector<4x128xbf16>, vector<64x128xf32> -> vector<64x128xf32>
    %57 = vector.broadcast %33 : vector<1x128xf32> to vector<64x128xf32>
    %58 = arith.addf %56, %57 : vector<64x128xf32>
    %59 = arith.negf %58 : vector<64x128xf32>
    %60 = math.exp %59 : vector<64x128xf32>
    %cst_41 = arith.constant 1.000000e+00 : f32
    %61 = vector.broadcast %cst_41 : f32 to vector<64x128xf32>
    %62 = arith.addf %61, %60 : vector<64x128xf32>
    %63 = arith.divf %61, %62 : vector<64x128xf32>
    %64 = arith.mulf %58, %63 : vector<64x128xf32>
    %65 = arith.addf %54, %64 : vector<64x128xf32>
    %66 = vector.extract_strided_slice %2 {offsets = [0, 12], sizes = [64, 4], strides = [1, 1]} : vector<64x16xbf16> to vector<64x4xbf16>
    %cst_42 = arith.constant dense<0.000000e+00> : vector<64x128xf32>
    %67 = tpu.matmul %66, %32, %cst_42 {dimension_numbers = #tpu.dot_dimension_numbers<[1], [0], [0], [1], [0, 0, 1, 1], [], []>} : vector<64x4xbf16>, vector<4x128xbf16>, vector<64x128xf32> -> vector<64x128xf32>
    %68 = vector.broadcast %33 : vector<1x128xf32> to vector<64x128xf32>
    %69 = arith.addf %67, %68 : vector<64x128xf32>
    %70 = arith.negf %69 : vector<64x128xf32>
    %71 = math.exp %70 : vector<64x128xf32>
    %cst_43 = arith.constant 1.000000e+00 : f32
    %72 = vector.broadcast %cst_43 : f32 to vector<64x128xf32>
    %73 = arith.addf %72, %71 : vector<64x128xf32>
    %74 = arith.divf %72, %73 : vector<64x128xf32>
    %75 = arith.mulf %69, %74 : vector<64x128xf32>
    %76 = arith.addf %65, %75 : vector<64x128xf32>
    %cst_44 = arith.constant 2.500000e-01 : f32
    %77 = vector.broadcast %cst_44 : f32 to vector<64x128xf32>
    %78 = arith.mulf %77, %76 : vector<64x128xf32>
    %79 = arith.subf %31, %78 : vector<64x128xf32>
    %80 = arith.truncf %79 : vector<64x128xf32> to vector<64x128xbf16>
    %c0_45 = arith.constant 0 : index
    %c0_46 = arith.constant 0 : index
    %81 = vector.load %arg12[%c0_45, %c0_46] : memref<128x128xbf16, #tpu.memory_space<vmem>>, vector<128x128xbf16>
    %cst_47 = arith.constant dense<0.000000e+00> : vector<64x128xf32>
    %82 = tpu.matmul %80, %81, %cst_47 {dimension_numbers = #tpu.dot_dimension_numbers<[1], [0], [0], [1], [0, 0, 1, 1], [], []>} : vector<64x128xbf16>, vector<128x128xbf16>, vector<64x128xf32> -> vector<64x128xf32>
    %c0_48 = arith.constant 0 : index
    %c0_49 = arith.constant 0 : index
    %83 = vector.load %arg13[%c0_48, %c0_49] : memref<1x128xf32, #tpu.memory_space<vmem>>, vector<1x128xf32>
    %84 = vector.broadcast %83 : vector<1x128xf32> to vector<64x128xf32>
    %85 = arith.addf %82, %84 : vector<64x128xf32>
    %86 = arith.negf %85 : vector<64x128xf32>
    %87 = math.exp %86 : vector<64x128xf32>
    %cst_50 = arith.constant 1.000000e+00 : f32
    %88 = vector.broadcast %cst_50 : f32 to vector<64x128xf32>
    %89 = arith.addf %88, %87 : vector<64x128xf32>
    %90 = arith.divf %88, %89 : vector<64x128xf32>
    %91 = arith.mulf %85, %90 : vector<64x128xf32>
    %92 = arith.truncf %31 : vector<64x128xf32> to vector<64x128xbf16>
    %c0_51 = arith.constant 0 : index
    %c0_52 = arith.constant 0 : index
    %93 = vector.load %arg10[%c0_51, %c0_52] : memref<128x128xbf16, #tpu.memory_space<vmem>>, vector<128x128xbf16>
    %cst_53 = arith.constant dense<0.000000e+00> : vector<64x128xf32>
    %94 = tpu.matmul %92, %93, %cst_53 {dimension_numbers = #tpu.dot_dimension_numbers<[1], [0], [0], [1], [0, 0, 1, 1], [], []>} : vector<64x128xbf16>, vector<128x128xbf16>, vector<64x128xf32> -> vector<64x128xf32>
    %c0_54 = arith.constant 0 : index
    %c0_55 = arith.constant 0 : index
    %95 = vector.load %arg11[%c0_54, %c0_55] : memref<1x128xf32, #tpu.memory_space<vmem>>, vector<1x128xf32>
    %96 = vector.broadcast %95 : vector<1x128xf32> to vector<64x128xf32>
    %97 = arith.addf %94, %96 : vector<64x128xf32>
    %98 = arith.negf %97 : vector<64x128xf32>
    %99 = math.exp %98 : vector<64x128xf32>
    %cst_56 = arith.constant 1.000000e+00 : f32
    %100 = vector.broadcast %cst_56 : f32 to vector<64x128xf32>
    %101 = arith.addf %100, %99 : vector<64x128xf32>
    %102 = arith.divf %100, %101 : vector<64x128xf32>
    %103 = arith.mulf %97, %102 : vector<64x128xf32>
    %104 = arith.addf %91, %103 : vector<64x128xf32>
    %105 = vector.shape_cast %104 : vector<64x128xf32> to vector<8x8x128xf32>
    %106 = vector.extract_strided_slice %105 {offsets = [0, 0, 0], sizes = [8, 8, 8], strides = [1, 1, 1]} : vector<8x8x128xf32> to vector<8x8x8xf32>
    %c0_57 = arith.constant 0 : index
    %c0_58 = arith.constant 0 : index
    %c0_59 = arith.constant 0 : index
    %c0_60 = arith.constant 0 : index
    %107 = vector.load %arg14[%c0_57, %c0_58, %c0_59, %c0_60] : memref<1x8x8x8xf32, #tpu.memory_space<vmem>>, vector<1x8x8x8xf32>
    %108 = vector.shape_cast %107 : vector<1x8x8x8xf32> to vector<8x8x8xf32>
    %109 = vector.shape_cast %106 : vector<8x8x8xf32> to vector<1x8x8x8xf32>
    tpu.vector_store %arg14[%c0_57, %c0_58, %c0_59, %c0_60], %109 {strides = array<i32>} : memref<1x8x8x8xf32, #tpu.memory_space<vmem>>, vector<1x8x8x8xf32>,
    return
  }
  func.func @transform_0(%arg0: i32, %arg1: i32) -> (i32, i32, i32, i32, i32) {
    %c0_i32 = arith.constant 0 : i32
    %c0_i32_0 = arith.constant 0 : i32
    %c0_i32_1 = arith.constant 0 : i32
    %c0_i32_2 = arith.constant 0 : i32
    return %arg0, %arg1, %c0_i32, %c0_i32_0, %c0_i32_1 : i32, i32, i32, i32, i32
  }
  func.func @transform_1(%arg0: i32, %arg1: i32) -> (i32, i32) {
    %c0_i32 = arith.constant 0 : i32
    %c0_i32_0 = arith.constant 0 : i32
    %c0_i32_1 = arith.constant 0 : i32
    return %c0_i32, %c0_i32_0 : i32, i32
  }
  func.func @transform_2(%arg0: i32, %arg1: i32) -> (i32, i32) {
    %c0_i32 = arith.constant 0 : i32
    %c0_i32_0 = arith.constant 0 : i32
    %c0_i32_1 = arith.constant 0 : i32
    return %c0_i32, %c0_i32_0 : i32, i32
  }
  func.func @transform_3(%arg0: i32, %arg1: i32) -> (i32, i32) {
    %c0_i32 = arith.constant 0 : i32
    %c0_i32_0 = arith.constant 0 : i32
    %c0_i32_1 = arith.constant 0 : i32
    return %c0_i32, %c0_i32_0 : i32, i32
  }
  func.func @transform_4(%arg0: i32, %arg1: i32) -> (i32, i32) {
    %c0_i32 = arith.constant 0 : i32
    %c0_i32_0 = arith.constant 0 : i32
    %c0_i32_1 = arith.constant 0 : i32
    return %c0_i32, %c0_i32_0 : i32, i32
  }
  func.func @transform_5(%arg0: i32, %arg1: i32) -> (i32, i32) {
    %c0_i32 = arith.constant 0 : i32
    %c0_i32_0 = arith.constant 0 : i32
    %c0_i32_1 = arith.constant 0 : i32
    return %c0_i32, %c0_i32_0 : i32, i32
  }
  func.func @transform_6(%arg0: i32, %arg1: i32) -> (i32, i32) {
    %c0_i32 = arith.constant 0 : i32
    %c0_i32_0 = arith.constant 0 : i32
    %c0_i32_1 = arith.constant 0 : i32
    return %c0_i32, %c0_i32_0 : i32, i32
  }
  func.func @transform_7(%arg0: i32, %arg1: i32) -> (i32, i32) {
    %c0_i32 = arith.constant 0 : i32
    %c0_i32_0 = arith.constant 0 : i32
    %c0_i32_1 = arith.constant 0 : i32
    return %c0_i32, %c0_i32_0 : i32, i32
  }
  func.func @transform_8(%arg0: i32, %arg1: i32) -> (i32, i32) {
    %c0_i32 = arith.constant 0 : i32
    %c0_i32_0 = arith.constant 0 : i32
    %c0_i32_1 = arith.constant 0 : i32
    return %c0_i32, %c0_i32_0 : i32, i32
  }
  func.func @transform_9(%arg0: i32, %arg1: i32) -> (i32, i32) {
    %c0_i32 = arith.constant 0 : i32
    %c0_i32_0 = arith.constant 0 : i32
    %c0_i32_1 = arith.constant 0 : i32
    return %c0_i32, %c0_i32_0 : i32, i32
  }
  func.func @transform_10(%arg0: i32, %arg1: i32) -> (i32, i32) {
    %c0_i32 = arith.constant 0 : i32
    %c0_i32_0 = arith.constant 0 : i32
    %c0_i32_1 = arith.constant 0 : i32
    return %c0_i32, %c0_i32_0 : i32, i32
  }
  func.func @transform_11(%arg0: i32, %arg1: i32) -> (i32, i32) {
    %c0_i32 = arith.constant 0 : i32
    %c0_i32_0 = arith.constant 0 : i32
    %c0_i32_1 = arith.constant 0 : i32
    return %c0_i32, %c0_i32_0 : i32, i32
  }
  func.func @transform_12(%arg0: i32, %arg1: i32) -> (i32, i32, i32, i32) {
    %c0_i32 = arith.constant 0 : i32
    %c0_i32_0 = arith.constant 0 : i32
    %c0_i32_1 = arith.constant 0 : i32
    return %arg0, %arg1, %c0_i32, %c0_i32_0 : i32, i32, i32, i32
  }
}

</mosaic_0001>

<bundles_post_ra>
// kernel: tpu_custom_call.1
= control target key start
LH: loop header
LB: loop body
LE: loop exit
PB: predicated region body
PF: predicated region fallthrough
CT: control target
= control target key end

     0   :  { %s3914_s0 = inlined_call_operand.vmem [shape: bf16[2,1,9,9,16], index: 0, kind: input, shape index: {}]   ;;  %s3915_s1 = inlined_call_operand.vmem [shape: bf16[16,128], index: 1, kind: input, shape index: {}]   ;;  %s3916_s2 = inlined_call_operand.vmem [shape: bf16[16,128], index: 2, kind: input, shape index: {}]   ;;  %s3917_s3 = inlined_call_operand.vmem [shape: bf16[16,128], index: 3, kind: input, shape index: {}]   ;;  %s3918_s4 = inlined_call_operand.vmem [shape: bf16[16,128], index: 4, kind: input, shape index: {}]   ;;  %s3919_s5 = inlined_call_operand.vmem [shape: f32[1,128], index: 5, kind: input, shape index: {}]   ;;  %s3920_s6 = inlined_call_operand.vmem [shape: bf16[4,128], index: 6, kind: input, shape index: {}]   ;;  %s3921_s7 = inlined_call_operand.vmem [shape: f32[1,128], index: 7, kind: input, shape index: {}]   ;;  %s3922_s8 = inlined_call_operand.vmem [shape: bf16[128,128], index: 8, kind: input, shape index: {}]   ;;  %s3923_s9 = inlined_call_operand.vmem [shape: f32[1,128], index: 9, kind: input, shape index: {}]   ;;  %s3924_s10 = inlined_call_operand.vmem [shape: bf16[128,128], index: 10, kind: input, shape index: {}]   ;;  %s3925_s11 = inlined_call_operand.vmem [shape: f32[1,128], index: 11, kind: input, shape index: {}]   ;;  %s3926_s12 = inlined_call_operand.hbm [shape: f32[2,8,8,8], index: 12, kind: output, shape index: {}]  }
   0x1   :  { %3927 = sst [smem:[#allocation5_spill]] %s3914_s0 }
   0x2   :  { %3928 = sst [smem:[#allocation6_spill]] %s3916_s2 }
   0x3   :  { %17 = vsyncpa [#allocation3], 0 }
   0x4   :  { %19 = vsyncpa [#allocation3 + $0x1], 0  ;;  %s3147_s21 = smov 0   ;;  %s3149_s22 = smov 0  }
   0x5   :  { %s3151_s23 = smov 0   ;;  %s3153_s24 = smov 0  }
   0x6   :  { %s3155_s25 = smov 0   ;;  %s3157_s26 = smov 0  }
   0x7 LB: > { %s2306_s27 = sadd.s32 4294967295, %s3074_s26   ;;  %s2307_s28 = sadd.s32 4294967294, %s3074_s26   ;;  %s3074_s26 = sphi %s3157_s26, %s25_s26   ;;  %s3070_s25 = sphi %s3155_s25, %s3939_s25   ;;  %s3066_s24 = sphi %s3153_s24, %s3938_s24   ;;  %s3062_s23 = sphi %s3151_s23, %s3937_s23   ;;  %s3058_s22 = sphi %s3149_s22, %s3936_s22   ;;  %s3054_s21 = sphi %s3147_s21, %s3935_s21  }
   0x8   : > { %s37_s29 = sadd.s32 1, %s3070_s25  ;;  %s305_s30 = sadd.s32 1, %s3062_s23 }
   0x9   : > { %p39_p0 = scmp.ge.s32.totalorder %s37_s29, 2  ;;  %p315_p1 = scmp.ne.s32.totalorder %s3062_s23, %s3058_s22 }
   0xa   : > { %p316_p2 = scmp.eq.s32.totalorder %s2306_s27, 1  ;;  %p321_p3 = scmp.ne.s32.totalorder %s3058_s22, %s3054_s21 }
   0xb   : > { %s3941_s29 = smov (%p39_p0, %s37_s29), 0  ;;  %p322_p5 = scmp.eq.s32.totalorder %s2307_s28, 1 }
   0xc   : > { %p3187_p4 = por %p316_p2, %p315_p1  ;;  %s300_s14 = ssub.s32 %s3070_s25, %s3941_s29 }
   0xd   : > { %p2310_p6 = scmp.ge.s32.totalorder %s3074_s26, 1  ;;  %p303_p7 = scmp.eq.s32.totalorder %s300_s14, 0 }
   0xe   : > { %p3194_p8 = por %p322_p5, %p321_p3  ;;  %p385_p9 = scmp.lt.s32.totalorder %s3074_s26, 3 }
   0xf   : > { %s3200_s16 = scalar_select %p303_p7, %s3062_s23, %s305_s30  }
  0x10   : > { %p386_p10 = pnand %p2310_p6, %p385_p9 }
  0x11   : > { %s3931_s2 = sld [smem:[#allocation6_spill]] (!%p386_p10)  ;;  %p431_p11 = scmp.lt.s32.totalorder (!%p386_p10), %s3066_s24, 1  ;;  %v3210_v1 = vld [vmem:[%s3915_s1] sm:$0xff] (!%p386_p10)   ;;  %vm1211_vm0 = vcmask (!%p386_p10), 1041408   ;;  %vm459_vm1 = vsmask.f32 (!%p386_p10), 3328 }
  0x12   : > { %389 = sbr.rel (%p386_p10) target bundleno = 740 (0x2e4), region = 68  ;;  %vm460_vm2 = vsmask.f32 (!%p386_p10), 7440  ;;  %v3216_v2 = vld [vmem:[%s3920_s6] sm:$0x3] (!%p386_p10)  ;;  %s3932_s0 = sld [smem:[#allocation5_spill]] (!%p386_p10) }
  0x13   : > { %2679 = vmatprep.subr.msk.bf16.mxu1 (!%p386_p10), %vm1211_vm0, %v3216_v2  ;;  %v3227_v3 = vsel (!%p386_p10), %vm1211_vm0, %v3216_v2, 0  ;;  %vm724_vm3 = vcmask (!%p386_p10), 130048   ;;  %vm1202_vm4 = vcmask (!%p386_p10), 31744   ;;  %vm3263_vm5 = vmor (!%p386_p10), %vm459_vm1, %vm460_vm2  ;;  %s428_s27 = sand.u32 (!%p386_p10), 1, %s3058_s22   ;;  %vm2199_vm6 = vcmask (!%p386_p10), 64512   ;;  %s2462_s30 = sshll.u32 (!%p386_p10), %s3066_s24, 10 }
  0x14   : > { %2568 = vmatpush3.bf16.msra.mxu1 (!%p386_p10), %v3227_v3  ;;  %s3856_s18 = scalar_lea.hbm (!%p386_p10), %s3926_s12, %s2462_s30 }
  0x15   : > { %2680 = vmatprep.subr.msk.bf16.mxu1 (!%p386_p10), %vm1211_vm0, %v3216_v2 }
  0x17   : > { %v2744_v0 = vld [vmem:[%s3931_s2] sm:$0xff] (!%p386_p10)  }
  0x18   : > { %2527 = vmatprep.subr.bf16.mxu0 (!%p386_p10), %v2744_v0 }
  0x19   : > { %s432_s19 = scalar_select %p431_p11, %s3066_s24, 1  ;;  %2528 = vmatpush3.bf16.msra.mxu0 %v2744_v0 }
  0x1a   : > { %2537 = vmatprep.subr.bf16.mxu0 %v3210_v1 }
  0x1b   : > { %s2683_s28 = smul.u32 72, %s432_s19  ;;  %s3076_s19 = smov 124  }
  0x1d   : > { %s3221_s2 = scalar_lea.vmem %s3932_s0, %s2683_s28  ;;  %s3077_s28 = smov 120  }
  0x1e   : > { %v3230_v4 = vld [vmem:[%s3221_s2] sm:$0xf]  ;;  %v575_v5 = vld [vmem:[%s3221_s2 + $0x4] sm:$0x1]  ;;  %v3234_v6 = vld [vmem:[%s3221_s2 + $0x8] sm:$0xf] }
  0x1f   : > { %v577_v7 = vld [vmem:[%s3221_s2 + $0xc] sm:$0x1]  ;;  %v591_v8 = vshrl.u32 %v3230_v4, 16  ;;  %v594_v9 = vshll.u32 %v3230_v4, 16  ;;  %v600_v10 = vshll.u32 %v575_v5, 16  ;;  %v605_v11 = vshrl.u32 %v3234_v6, 16 }
  0x20   : > { %v608_v12 = vshll.u32 %v3234_v6, 16  ;;  %v614_v13 = vshll.u32 %v577_v7, 16  ;;  %v3245_v14 = vld [vmem:[%s3221_s2 + $0x8] sm:$0xf]  ;;  %v2314_v15 = vld [vmem:[%s3221_s2 + $0xc] sm:$0x1]  ;;  %v2356_v16 = vcombine.low %v3230_v4, %v3234_v6 }
  0x21   : > { %v593_v17 = vrot.slane %v591_v8, 4  ;;  %v596_v18 = vrot.slane %v594_v9, 5  ;;  %v602_v19 = vrot.slane %v600_v10, 5  ;;  %v607_v20 = vrot.slane %v605_v11, 4  ;;  %v3251_v21 = vld [vmem:[%s3221_s2 + $0x10] sm:$0xf] }
  0x22   : > { %v610_v22 = vrot.slane %v608_v12, 5  ;;  %v616_v23 = vrot.slane %v614_v13, 5  ;;  %v2316_v24 = vld [vmem:[%s3221_s2 + $0x14] sm:$0x1]  ;;  %v463_v25 = vshrl.u32 %v3245_v14, 16  ;;  %v466_v26 = vshll.u32 %v3245_v14, 16 }
  0x23   : > { %v597_v27 = vor.u32 %v596_v18, %v593_v17  ;;  %v472_v28 = vshll.u32 %v2314_v15, 16  ;;  %v477_v29 = vshrl.u32 %v3251_v21, 16  ;;  %v480_v30 = vshll.u32 %v3251_v21, 16  ;;  %v3259_v31 = vld [vmem:[%s3221_s2 + $0x10] sm:$0xf] }
  0x24   : > { %v611_v33 = vor.u32 %v610_v22, %v607_v20  ;;  %v465_v34 = vrot.slane %v463_v25, 4  ;;  %v468_v35 = vrot.slane %v466_v26, 5  ;;  %v486_v36 = vshll.u32 %v2316_v24, 16  ;;  %v579_v37 = vld [vmem:[%s3221_s2 + $0x14] sm:$0x1] }
  0x25   : > { %v598_v38 = vrot.slane %v597_v27, 4  ;;  %v474_v39 = vrot.slane %v472_v28, 5  ;;  %v479_v40 = vrot.slane %v477_v29, 4  ;;  %v482_v41 = vrot.slane %v480_v30, 5  ;;  %v3269_v42 = vld [vmem:[%s3221_s2 + $0x18] sm:$0xf] }
  0x26   : > { %v612_v43 = vrot.slane %v611_v33, 4  ;;  %v469_v44 = vor.u32 %v468_v35, %v465_v34  ;;  %v488_v45 = vrot.slane %v486_v36, 5  ;;  %v619_v46 = vshrl.u32 %v3259_v31, 16  ;;  %v581_v49 = vld [vmem:[%s3221_s2 + $0x1c] sm:$0x1] }
  0x27   : > { %v603_v47 = vsel %vm3263_vm5, %v598_v38, %v602_v19  ;;  %v483_v48 = vor.u32 %v482_v41, %v479_v40  ;;  %v622_v50 = vshll.u32 %v3259_v31, 16  ;;  %v628_v51 = vshll.u32 %v579_v37, 16  ;;  %v3280_v56 = vld [vmem:[%s3221_s2 + $0x18] sm:$0xf]  ;;  %v2318_v61 = vld [vmem:[%s3221_s2 + $0x1c] sm:$0x1] }
  0x28   : > { %v617_v52 = vsel %vm3263_vm5, %v612_v43, %v616_v23  ;;  %v470_v53 = vrot.slane %v469_v44, 4  ;;  %v621_v54 = vrot.slane %v619_v46, 4  ;;  %v633_v55 = vshrl.u32 %v3269_v42, 16  ;;  %v3287_v7 = vld [vmem:[%s3221_s2 + $0x20] sm:$0xf] }
  0x29   : > { %v2329_v57 = vcombine.low %v603_v47, %v617_v52  ;;  %v484_v58 = vrot.slane %v483_v48, 4  ;;  %v624_v59 = vrot.slane %v622_v50, 5  ;;  %v630_v60 = vrot.slane %v628_v51, 5  ;;  %v2320_v10 = vld [vmem:[%s3221_s2 + $0x24] sm:$0x1] }
  0x2a   : > { %v475_v62 = vsel %vm3263_vm5, %v470_v53, %v474_v39  ;;  %v635_v63 = vrot.slane %v633_v55, 4  ;;  %v636_v0 = vshll.u32 %v3269_v42, 16  ;;  %v642_v5 = vshll.u32 %v581_v49, 16  ;;  %v3298_v19 = vld [vmem:[%s3221_s2 + $0x20] sm:$0xf] }
  0x2b   : > { %2529 = vmatprep.mubr.msk.bf16.mxu0 %vm724_vm3, %v2329_v57  ;;  %v489_v8 = vsel %vm3263_vm5, %v484_v58, %v488_v45  ;;  %v625_v9 = vor.u32 %v624_v59, %v621_v54  ;;  %v491_v11 = vshrl.u32 %v3280_v56, 16  ;;  %v494_v12 = vshll.u32 %v3280_v56, 16  ;;  %v583_v25 = vld [vmem:[%s3221_s2 + $0x24] sm:$0x1]  ;;  %v3306_v30 = vld [vmem:[%s3221_s2 + $0x28] sm:$0xf] }
  0x2c   : > { %v3295_v13 = vcombine.low %v475_v62, %v489_v8  ;;  %v638_v15 = vrot.slane %v636_v0, 5  ;;  %v644_v17 = vrot.slane %v642_v5, 5  ;;  %v500_v18 = vshll.u32 %v2318_v61, 16  ;;  %v585_v40 = vld [vmem:[%s3221_s2 + $0x2c] sm:$0x1]  ;;  %v3331_v59 = vld [vmem:[%s3917_s3] sm:$0xff]  }
  0x2d   : > { %v626_v20 = vrot.slane %v625_v9, 4  ;;  %v493_v22 = vrot.slane %v491_v11, 4  ;;  %v496_v23 = vrot.slane %v494_v12, 5  ;;  %v505_v24 = vshrl.u32 %v3287_v7, 16  ;;  %v3317_v47 = vld [vmem:[%s3221_s2 + $0x28] sm:$0xf] }
  0x2e   : > { %1336 = vrot.lane.b32.xlu0 %v3295_v13, %s3076_s19  ;;  %v639_v26 = vor.u32 %v638_v15, %v635_v63  ;;  %v502_v27 = vrot.slane %v500_v18, 5  ;;  %v508_v28 = vshll.u32 %v3287_v7, 16  ;;  %v514_v29 = vshll.u32 %v2320_v10, 16  ;;  %2569 = vmatprep.mubr.msk.bf16.mxu1 %vm1202_vm4, %v3295_v13  ;;  %v2322_v52 = vld [vmem:[%s3221_s2 + $0x2c] sm:$0x1] }
  0x2f   : > { %v631_v33 = vsel %vm3263_vm5, %v626_v20, %v630_v60  ;;  %v497_v34 = vor.u32 %v496_v23, %v493_v22  ;;  %v507_v35 = vrot.slane %v505_v24, 4  ;;  %v647_v36 = vshrl.u32 %v3298_v19, 16  ;;  %v3324_v53 = vld [vmem:[%s3221_s2 + $0x30] sm:$0xf]  ;;  %v2324_v0 = vld [vmem:[%s3221_s2 + $0x34] sm:$0x1] }
  0x30   : > { %v640_v37 = vrot.slane %v639_v26, 4  ;;  %v510_v38 = vrot.slane %v508_v28, 5  ;;  %v516_v39 = vrot.slane %v514_v29, 5  ;;  %v650_v41 = vshll.u32 %v3298_v19, 16  ;;  %v3335_v5 = vld [vmem:[%s3221_s2 + $0x30] sm:$0xf] }
  0x31   : > { %v498_v43 = vrot.slane %v497_v34, 4  ;;  %v649_v44 = vrot.slane %v647_v36, 4  ;;  %v656_v45 = vshll.u32 %v583_v25, 16  ;;  %v661_v46 = vshrl.u32 %v3306_v30, 16  ;;  %v3342_v12 = vld [vmem:[%s3221_s2 + $0x38] sm:$0xf] }
  0x32   : > { %v645_v48 = vsel %vm3263_vm5, %v640_v37, %v644_v17  ;;  %v511_v49 = vor.u32 %v510_v38, %v507_v35  ;;  %v652_v50 = vrot.slane %v650_v41, 5  ;;  %v664_v51 = vshll.u32 %v3306_v30, 16  ;;  %v587_v22 = vld [vmem:[%s3221_s2 + $0x34] sm:$0x1]  ;;  %v589_v34 = vld [vmem:[%s3221_s2 + $0x3c] sm:$0x1] }
  0x33   : > { %v2330_v54 = vcombine.low %v631_v33, %v645_v48  ;;  %v503_v55 = vsel %vm3263_vm5, %v498_v43, %v502_v27  ;;  %v658_v57 = vrot.slane %v656_v45, 5  ;;  %v663_v58 = vrot.slane %v661_v46, 4  ;;  %v3356_v35 = vld [vmem:[%s3221_s2 + $0x38] sm:$0xf] }
  0x34   : > { %v512_v60 = vrot.slane %v511_v49, 4  ;;  %v653_v61 = vor.u32 %v652_v50, %v649_v44  ;;  %v666_v62 = vrot.slane %v664_v51, 5  ;;  %v670_v63 = vshll.u32 %v585_v40, 16  ;;  %v3369_v44 = vld [vmem:[%s3221_s2 + $0x40] sm:$0xf] }
  0x35   : > { %2530 = vmatmul.mubr.msk.bf16.vlgmr.msra.gmra.mrb[0].mxu0 %vm724_vm3, %v2330_v54  ;;  %v519_v8 = vshrl.u32 %v3317_v47, 16  ;;  %v522_v9 = vshll.u32 %v3317_v47, 16  ;;  %v528_v10 = vshll.u32 %v2322_v52, 16  ;;  %v533_v11 = vshrl.u32 %v3324_v53, 16 }
  0x36   : > { %v517_v15 = vsel %vm3263_vm5, %v512_v60, %v516_v39  ;;  %v654_v17 = vrot.slane %v653_v61, 4  ;;  %v667_v18 = vor.u32 %v666_v62, %v663_v58  ;;  %v672_v20 = vrot.slane %v670_v63, 5  ;;  %2538 = vmatpush3.bf16.msra.mxu0 %v3210_v1  ;;  %v2326_v39 = vld [vmem:[%s3221_s2 + $0x3c] sm:$0x1]  ;;  %v2328_v60 = vld [vmem:[%s3221_s2 + $0x44] sm:$0x1] }
  0x37   : > { %v3348_v23 = vcombine.low %v503_v55, %v517_v15  ;;  %v521_v24 = vrot.slane %v519_v8, 4  ;;  %v524_v25 = vrot.slane %v522_v9, 5  ;;  %v530_v26 = vrot.slane %v528_v10, 5  ;;  %2547 = vmatprep.subr.bf16.mxu0 %v3331_v59  ;;  %s3078_s2 = smov 116  }
  0x38   : > { %v659_v27 = vsel %vm3263_vm5, %v654_v17, %v658_v57  ;;  %v668_v28 = vrot.slane %v667_v18, 4  ;;  %v535_v29 = vrot.slane %v533_v11, 4  ;;  %v536_v33 = vshll.u32 %v3324_v53, 16 }
  0x39   : > { %1338 = vrot.lane.b32.xlu0 %v3348_v23, %s3076_s19  ;;  %v525_v1 = vor.u32 %v524_v25, %v521_v24  ;;  %v542_v36 = vshll.u32 %v2324_v0, 16  ;;  %v675_v37 = vshrl.u32 %v3335_v5, 16  ;;  %v678_v38 = vshll.u32 %v3335_v5, 16  ;;  %2570 = vmatmul.mubr.msk.bf16.vlgmr.msra.gmra.mrb[0].mxu1 %vm1202_vm4, %v3348_v23 }
  0x3a   : > { %v673_v40 = vsel %vm3263_vm5, %v668_v28, %v672_v20  ;;  %v538_v41 = vrot.slane %v536_v33, 5  ;;  %v689_v43 = vshrl.u32 %v3342_v12, 16  ;;  %2578 = vmatpush3.bf16.msra.mxu1 %v3227_v3  ;;  %v684_v49 = vshll.u32 %v587_v22, 16 }
  0x3b   : > { %v2331_v45 = vcombine.low %v659_v27, %v673_v40  ;;  %v526_v46 = vrot.slane %v525_v1, 4  ;;  %v677_v48 = vrot.slane %v675_v37, 4  ;;  %2681 = vmatprep.subr.msk.bf16.mxu1 %vm1211_vm0, %v3216_v2  ;;  %v544_v51 = vrot.slane %v542_v36, 5 }
  0x3c   : > { %v539_v50 = vor.u32 %v538_v41, %v535_v29  ;;  %v680_v52 = vrot.slane %v678_v38, 5  ;;  %v691_v54 = vrot.slane %v689_v43, 4  ;;  %v692_v57 = vshll.u32 %v3342_v12, 16 }
  0x3d   : > { %2533 = vmatprep.mubr.msk.bf16.mxu0 %vm724_vm3, %v2331_v45  ;;  %v531_v55 = vsel %vm3263_vm5, %v526_v46, %v530_v26  ;;  %v698_v58 = vshll.u32 %v589_v34, 16  ;;  %v547_v61 = vshrl.u32 %v3356_v35, 16  ;;  %1485 = vrot.lane.b32.xlu0 %v3295_v13, %s3077_s28  ;;  %v550_v0 = vshll.u32 %v3356_v35, 16 }
  0x3e   : > { %v540_v62 = vrot.slane %v539_v50, 4  ;;  %v681_v63 = vor.u32 %v680_v52, %v677_v48  ;;  %v556_v8 = vshll.u32 %v2326_v39, 16  ;;  %v686_v9 = vrot.slane %v684_v49, 5  ;;  %v2760_v50 = vld [vmem:[%s3922_s8 + $0x20] sm:$0xff]   ;;  %v2762_v52 = vld [vmem:[%s3922_s8 + $0x30] sm:$0xff]  }
  0x3f   : > { %v694_v10 = vrot.slane %v692_v57, 5  ;;  %v549_v11 = vrot.slane %v547_v61, 4  ;;  %v561_v15 = vshrl.u32 %v3369_v44, 16  ;;  %v700_v20 = vrot.slane %v698_v58, 5 }
  0x40   : > { %v545_v17 = vsel %vm3263_vm5, %v540_v62, %v544_v51  ;;  %v682_v18 = vrot.slane %v681_v63, 4  ;;  %v552_v22 = vrot.slane %v550_v0, 5  ;;  %v564_v27 = vshll.u32 %v3369_v44, 16  ;;  %v2761_v51 = vld [vmem:[%s3922_s8 + $0x28] sm:$0xff]  }
  0x41   : > { %v2340_v24 = vcombine.low %v531_v55, %v545_v17  ;;  %v695_v25 = vor.u32 %v694_v10, %v691_v54  ;;  %v563_v26 = vrot.slane %v561_v15, 4  ;;  %v558_v29 = vrot.slane %v556_v8, 5  ;;  %v2763_v54 = vld [vmem:[%s3922_s8 + $0x38] sm:$0xff]   ;;  %v2764_v8 = vld [vmem:[%s3924_s10] sm:$0xff]   ;;  %v2766_v10 = vld [vmem:[%s3924_s10 + $0x10] sm:$0xff]  }
  0x42   : > { %v553_v28 = vor.u32 %v552_v22, %v549_v11  ;;  %v570_v33 = vshll.u32 %v2328_v60, 16  ;;  %v687_v34 = vsel %vm3263_vm5, %v682_v18, %v686_v9  ;;  %v566_v36 = vrot.slane %v564_v27, 5  ;;  %v2765_v9 = vld [vmem:[%s3924_s10 + $0x8] sm:$0xff]   ;;  %v2365_v11 = vld [vmem:[%s3919_s5] ss:$0 sm:$0xff]  ;;  %v2767_v15 = vld [vmem:[%s3924_s10 + $0x18] sm:$0xff]  }
  0x43   : > { %1340 = vrot.lane.b32.xlu1 %v2340_v24, %s3076_s19  ;;  %v696_v1 = vrot.slane %v695_v25, 4  ;;  %1489 = vrot.lane.b32.xlu0 %v2340_v24, %s3077_s28  ;;  %v2357_v39 = vcombine.low %v3259_v31, %v3269_v42  ;;  %v2751_v42 = vld [vmem:[%s3918_s4] sm:$0xff]   ;;  %v2347_v32 = vcombine.low %v3245_v14, %v3251_v21  ;;  %v2349_v49 = vcombine.low %v3317_v47, %v3324_v53 }
  0x44   : > { %v554_v37 = vrot.slane %v553_v28, 4  ;;  %v572_v38 = vrot.slane %v570_v33, 5  ;;  %2573 = vmatprep.mubr.msk.bf16.mxu1 %vm1202_vm4, %v2340_v24  ;;  %v567_v41 = vor.u32 %v566_v36, %v563_v26  ;;  %v2350_v14 = vcombine.low %v3356_v35, %v3369_v44  ;;  %v2756_v53 = vld [vmem:[%s3922_s8] sm:$0xff]   ;;  %v2759_v44 = vld [vmem:[%s3922_s8 + $0x18] sm:$0xff]   ;;  %v2769_v36 = vld [vmem:[%s3924_s10 + $0x28] sm:$0xff]  }
  0x45   : > { %v701_v40 = vsel %vm3263_vm5, %v696_v1, %v700_v20  ;;  %v2358_v21 = vcombine.low %v3298_v19, %v3306_v30  ;;  %v2768_v25 = vld [vmem:[%s3924_s10 + $0x20] sm:$0xff]  }
  0x46   : > { %v2332_v43 = vcombine.low %v687_v34, %v701_v40  ;;  %v559_v45 = vsel %vm3263_vm5, %v554_v37, %v558_v29  ;;  %v568_v46 = vrot.slane %v567_v41, 4 }
  0x47   : > { %1634 = vrot.lane.b32.xlu0 %v3295_v13, %s3078_s2 }
  0x48   : > { %2534 = vmatmul.mubr.msk.bf16.gmra.mrb[4].mxu0 %vm724_vm3, %v2332_v43  ;;  %v573_v48 = vsel %vm3263_vm5, %v568_v46, %v572_v38  ;;  %v2770_v43 = vld [vmem:[%s3924_s10 + $0x30] sm:$0xff]  }
  0x49   : > { %2539 = vmatprep.mubr.msk.bf16.mxu0 %vm724_vm3, %v3295_v13  ;;  %v2341_v31 = vcombine.low %v559_v45, %v573_v48  ;;  %v2348_v13 = vcombine.low %v3280_v56, %v3287_v7  ;;  %v2359_v56 = vcombine.low %v3335_v5, %v3342_v12 }
  0x4b   : > { %1638 = vrot.lane.b32.xlu0 %v2340_v24, %s3078_s2  ;;  %1342 = vrot.lane.b32.xlu1 %v2341_v31, %s3076_s19  ;;  %s3868_s19 = scalar_lea.sflag [#allocation3], %s428_s27 }
  0x4c   : > { %2574 = vmatmul.mubr.msk.bf16.gmra.mrb[4].mxu1 %vm1202_vm4, %v2341_v31 }
  0x4f   : > { %1487 = vrot.lane.b32.xlu1 %v3348_v23, %s3077_s28 }
  0x50   : > { %2540 = vmatmul.mubr.msk.bf16.vlgmr.msra.gmra.mrb[0].mxu0 %vm724_vm3, %v3348_v23 }
  0x51   : > { %2543 = vmatprep.mubr.msk.bf16.mxu0 %vm724_vm3, %v2340_v24  ;;  %2548 = vmatpush3.bf16.msra.mxu0 %v3331_v59 }
  0x52   : > { %2557 = vmatprep.subr.bf16.mxu0 %v2751_v42 }
  0x53   : > { %1491 = vrot.lane.b32.xlu1 %v2341_v31, %s3077_s28  ;;  %s2311_s28 = sshll.u32 %s428_s27, 6 }
  0x57   : > { %1636 = vrot.lane.b32.xlu1 %v3348_v23, %s3078_s2  ;;  %v2757_v23 = vld [vmem:[%s3922_s8 + $0x8] sm:$0xff]  }
  0x58   : > { %2544 = vmatmul.mubr.msk.bf16.gmra.mrb[4].mxu0 %vm724_vm3, %v2341_v31 }
  0x59   : > { %2549 = vmatprep.mubr.msk.bf16.mxu0 %vm724_vm3, %v2347_v32 }
  0x5b   : > { %1640 = vrot.lane.b32.xlu1 %v2341_v31, %s3078_s2  ;;  %s3831_s2 = scalar_lea.vmem [#allocation2], %s2311_s28  ;;  %s3079_s28 = smov [#allocation2]  }
  0x5c   : > { %s2224_s14 = sshll.u32 %s3831_s2, 4  ;;  %s3000_s30 = sshll.u32 %s3079_s28, 4  ;;  %s3858_s14 = int_to_ptr.vmem [resolvable:$true] %s2224_s14  ;;  %s3001_s30 = int_to_ptr.vmem [resolvable:$false] %s3000_s30 }
  0x5d   : > { %s2996_s20 = scalar_lea.vmem %s3858_s14, 1024  ;;  %s3002_s17 = scalar_lea.vmem %s3001_s30, 2048 }
  0x5e   : > { %p2997_p12 = scmp.ne.s32.totalorder %s3858_s14, %s2996_s20  ;;  %p3003_p1 = scmp.lt.s32.totalorder %s3858_s14, %s3001_s30 }
  0x5f   : > { %p3004_p2 = scmp.lt.s32.totalorder %s3002_s17, %s2996_s20 }
  0x60   : > { %2550 = vmatmul.mubr.msk.bf16.vlgmr.msra.gmra.mrb[0].mxu0 %vm724_vm3, %v2348_v13  ;;  %p2998_p13 = pnand %p2997_p12, %p3187_p4 }
  0x61   : > { %2553 = vmatprep.mubr.msk.bf16.mxu0 %vm724_vm3, %v2349_v49  ;;  %2558 = vmatpush3.bf16.msra.mxu0 %v2751_v42  ;;  %v2771_v49 = vld [vmem:[%s3924_s10 + $0x38] sm:$0xff]   ;;  %p3005_p3 = por %p3004_p2, %p3003_p1 }
  0x62   : > { %2607 = vmatprep.subr.bf16.mxu0 %v2764_v8  ;;  %p2999_p0 = pneg %p2998_p13 }
  0x64   : > { %p3006_p5 = pnand %p3005_p3, %p2999_p0 }
  0x68   : > { %2554 = vmatmul.mubr.msk.bf16.gmra.mrb[4].mxu0 %vm724_vm3, %v2350_v14 }
  0x69   : > { %2559 = vmatprep.mubr.msk.bf16.mxu0 %vm724_vm3, %v2356_v16 }
  0x70   : > { %2560 = vmatmul.mubr.msk.bf16.vlgmr.msra.gmra.mrb[0].mxu0 %vm724_vm3, %v2357_v39 }
  0x71   : > { %2563 = vmatprep.mubr.msk.bf16.mxu0 %vm724_vm3, %v2358_v21  ;;  %2608 = vmatpush3.bf16.msra.mxu0 %v2764_v8 }
  0x72   : > { %2609 = vmatprep.subr.bf16.mxu0 %v2765_v9 }
  0x75   : > { %2610 = vmatpush3.bf16.msra.mxu0 %v2765_v9 }
  0x76   : > { %2611 = vmatprep.subr.bf16.mxu0 %v2766_v10 }
  0x78   : > { %2564 = vmatmul.mubr.msk.bf16.gmra.mrb[4].mxu0 %vm724_vm3, %v2359_v56 }
  0x79   : > { %2612 = vmatpush3.bf16.msra.mxu0 %v2766_v10 }
  0x7a   : > { %2613 = vmatprep.subr.bf16.mxu0 %v2767_v15 }
  0x7d   : > { %2614 = vmatpush3.bf16.msra.mxu0 %v2767_v15 }
  0x7e   : > { %2615 = vmatprep.subr.bf16.mxu0 %v2768_v25 }
  0x81   : > { %2616 = vmatpush3.bf16.msra.mxu0 %v2768_v25 }
  0x82   : > { %2617 = vmatprep.subr.bf16.mxu0 %v2769_v36 }
  0x85   : > { %2618 = vmatpush3.bf16.msra.mxu0 %v2769_v36 }
  0x86   : > { %2619 = vmatprep.subr.bf16.mxu0 %v2770_v43 }
  0x89   : > { %2620 = vmatpush3.bf16.msra.mxu0 %v2770_v43 }
  0x8a   : > { %2621 = vmatprep.subr.bf16.mxu0 %v2771_v49 }
  0x8d   : > { %2622 = vmatpush3.bf16.msra.mxu0 %v2771_v49 }
  0xa0   : > { %v1337_v7 = vpop.permute.xlu0 %1336 }
  0xa1   : > { %2579 = vmatprep.mubr.msk.bf16.mxu1 %vm1202_vm4, %v1337_v7 }
  0xab   : > { %v1339_v47 = vpop.permute.xlu0 %1338 }
  0xac   : > { %2580 = vmatmul.mubr.msk.bf16.vlgmr.msra.gmra.mrb[8].mxu1 %vm1202_vm4, %v1339_v47 }
  0xad   : > { %2588 = vmatpush3.bf16.msra.mxu1 %v3227_v3 }
  0xae   : > { %2682 = vmatprep.subr.msk.bf16.mxu1 %vm1211_vm0, %v3216_v2 }
  0xaf   : > { %v1486_v6 = vpop.permute.xlu0 %1485 }
  0xb5   : > { %v1341_v4 = vpop.permute.xlu1 %1340  ;;  %v1490_v30 = vpop.permute.xlu0 %1489 }
  0xb6   : > { %2583 = vmatprep.mubr.msk.bf16.mxu1 %vm1202_vm4, %v1341_v4 }
  0xb9   : > { %v1635_v59 = vpop.permute.xlu0 %1634 }
  0xbd   : > { %v1343_v16 = vpop.permute.xlu1 %1342  ;;  %v1639_v12 = vpop.permute.xlu0 %1638 }
  0xbe   : > { %2584 = vmatmul.mubr.msk.bf16.gmra.mrb[12].mxu1 %vm1202_vm4, %v1343_v16 }
  0xbf   : > { %2589 = vmatprep.mubr.msk.bf16.mxu1 %vm1202_vm4, %v1486_v6 }
  0xc1   : > { %v1488_v19 = vpop.permute.xlu1 %1487 }
  0xc5   : > { %v1492_v2 = vpop.permute.xlu1 %1491 }
  0xc6   : > { %2590 = vmatmul.mubr.msk.bf16.vlgmr.msra.gmra.mrb[16].mxu1 %vm1202_vm4, %v1488_v19 }
  0xc7   : > { %2598 = vmatpush3.bf16.msra.mxu1 %v3227_v3  ;;  %2593 = vmatprep.mubr.msk.bf16.mxu1 %vm1202_vm4, %v1490_v30  ;;  %v2758_v3 = vld [vmem:[%s3922_s8 + $0x10] sm:$0xff]  }
  0xc8   : > { %2631 = vmatprep.subr.bf16.mxu1 %v2756_v53 }
  0xc9   : > { %v1637_v5 = vpop.permute.xlu1 %1636 }
  0xcd   : > { %v1641_v35 = vpop.permute.xlu1 %1640 }
  0xce   : > { %2594 = vmatmul.mubr.msk.bf16.gmra.mrb[20].mxu1 %vm1202_vm4, %v1492_v2 }
  0xcf   : > { %2599 = vmatprep.mubr.msk.bf16.mxu1 %vm1202_vm4, %v1635_v59 }
  0xd6   : > { %2600 = vmatmul.mubr.msk.bf16.vlgmr.msra.gmra.mrb[24].mxu1 %vm1202_vm4, %v1637_v5 }
  0xd7   : > { %2603 = vmatprep.mubr.msk.bf16.mxu1 %vm1202_vm4, %v1639_v12  ;;  %2632 = vmatpush3.bf16.msra.mxu1 %v2756_v53 }
  0xd8   : > { %2633 = vmatprep.subr.bf16.mxu1 %v2757_v23 }
  0xdb   : > { %2634 = vmatpush3.bf16.msra.mxu1 %v2757_v23 }
  0xdc   : > { %2635 = vmatprep.subr.bf16.mxu1 %v2758_v3 }
  0xde   : > { %2604 = vmatmul.mubr.msk.bf16.gmra.mrb[28].mxu1 %vm1202_vm4, %v1641_v35 }
  0xdf   : > { %2636 = vmatpush3.bf16.msra.mxu1 %v2758_v3 }
  0xe0   : > { %2637 = vmatprep.subr.bf16.mxu1 %v2759_v44 }
  0xe3   : > { %2638 = vmatpush3.bf16.msra.mxu1 %v2759_v44 }
  0xe4   : > { %2639 = vmatprep.subr.bf16.mxu1 %v2760_v50 }
  0xe7   : > { %2640 = vmatpush3.bf16.msra.mxu1 %v2760_v50 }
  0xe8   : > { %2641 = vmatprep.subr.bf16.mxu1 %v2761_v51 }
  0xeb   : > { %2642 = vmatpush3.bf16.msra.mxu1 %v2761_v51 }
  0xec   : > { %2643 = vmatprep.subr.bf16.mxu1 %v2762_v52 }
  0xef   : > { %2644 = vmatpush3.bf16.msra.mxu1 %v2762_v52 }
  0xf0   : > { %2645 = vmatprep.subr.bf16.mxu1 %v2763_v54 }
  0xf3   : > { %2646 = vmatpush3.bf16.msra.mxu1 %v2763_v54 }
 0x10c   : > { %v3481_v55 = vpop.f32.mrb[0].mxu1 }
 0x10d   : > { %v3483_v57 = vpop.f32.mrb[1].mxu1 }
 0x10e   : > { %v3485_v58 = vpop.f32.mrb[2].mxu1 }
 0x10f   : > { %v3487_v60 = vpop.f32.mrb[3].mxu1 }
 0x11f   : > { %v3489_v61 = vpop.f32.mrb[4].mxu1 }
 0x120   : > { %v3491_v62 = vpop.f32.mrb[5].mxu1 }
 0x121   : > { %v3493_v63 = vpop.f32.mrb[6].mxu1 }
 0x122   : > { %v3495_v0 = vpop.f32.mrb[7].mxu1 }
 0x143   : > { %v2561_v17 = vpop.f32.mrb[0].mxu0 }
 0x144   : > { %v3512_v18 = vadd.f32 %v2561_v17, %v2365_v11  ;;  %v1084_v20 = vpop.f32.mrb[1].mxu0 }
 0x145   : > { %v3514_v22 = vadd.f32 %v2365_v11, %v1084_v20  ;;  %v2562_v24 = vpop.f32.mrb[2].mxu0 }
 0x146   : > { %v2368_v26 = vmul.f32 -1.442695, %v3512_v18  ;;  %v3520_v27 = vadd.f32 %v2562_v24, %v2365_v11  ;;  %v1087_v28 = vpop.f32.mrb[3].mxu0 }
 0x147   : > { %v2366_v29 = vmul.f32 -1.442695, %v3514_v22  ;;  %v3523_v33 = vadd.f32 %v2365_v11, %v1087_v28 }
 0x148   : > { %2772 = vpow2.f32 %v2368_v26  ;;  %v2369_v34 = vmul.f32 -1.442695, %v3520_v27  ;;  %v3563_v26 = vld [vmem:[%s3921_s7] ss:$0 sm:$0xff] }
 0x149   : > { %2774 = vpow2.f32 %v2366_v29  ;;  %v2367_v1 = vmul.f32 -1.442695, %v3523_v33  ;;  %v3571_v29 = vadd.f32 %v3481_v55, %v3563_v26  ;;  %v3581_v36 = vadd.f32 %v3485_v58, %v3563_v26 }
 0x14a   : > { %2776 = vpow2.f32 %v2369_v34 }
 0x14b   : > { %2778 = vpow2.f32 %v2367_v1  ;;  %v2565_v37 = vpop.f32.mrb[4].mxu0  ;;  %v2381_v34 = vmul.f32 -1.442695, %v3571_v29  ;;  %v2382_v55 = vmul.f32 -1.442695, %v3581_v36 }
 0x14c   : > { %v1136_v38 = vadd.f32 %v2565_v37, %v2365_v11  ;;  %v1100_v39 = vpop.f32.mrb[5].mxu0  ;;  %v3585_v37 = vadd.f32 %v3563_v26, %v3487_v60 }
 0x14d   : > { %v1134_v40 = vadd.f32 %v2365_v11, %v1100_v39  ;;  %v2566_v41 = vpop.f32.mrb[6].mxu0 }
 0x14e   : > { %v2372_v45 = vmul.f32 -1.442695, %v1136_v38  ;;  %v1137_v46 = vadd.f32 %v2566_v41, %v2365_v11  ;;  %v1103_v48 = vpop.f32.mrb[7].mxu0 }
 0x14f   : > { %v2370_v31 = vmul.f32 -1.442695, %v1134_v40  ;;  %v1135_v42 = vadd.f32 %v2365_v11, %v1103_v48 }
 0x150   : > { %2780 = vpow2.f32 %v2372_v45  ;;  %v2373_v32 = vmul.f32 -1.442695, %v1137_v46  ;;  %v3597_v45 = vadd.f32 %v3489_v61, %v3563_v26  ;;  %v3613_v61 = vadd.f32 %v3493_v63, %v3563_v26 }
 0x151   : > { %2782 = vpow2.f32 %v2370_v31  ;;  %v2371_v13 = vmul.f32 -1.442695, %v1135_v42 }
 0x152   : > { %v2773_v14 = vpop.eup %2772  ;;  %2784 = vpow2.f32 %v2373_v32  ;;  %v2386_v63 = vmul.f32 -1.442695, %v3613_v61 }
 0x153   : > { %v2775_v21 = vpop.eup %2774  ;;  %v1164_v56 = vadd.f32 1.0, %v2773_v14  ;;  %2786 = vpow2.f32 %v2371_v13 }
 0x154   : > { %v2777_v7 = vpop.eup %2776  ;;  %v1162_v47 = vadd.f32 1.0, %v2775_v21 }
 0x155   : > { %v2779_v4 = vpop.eup %2778  ;;  %2788 = vrcp.f32 %v1164_v56  ;;  %v1165_v6 = vadd.f32 1.0, %v2777_v7 }
 0x156   : > { %2790 = vrcp.f32 %v1162_v47  ;;  %v1163_v16 = vadd.f32 1.0, %v2779_v4 }
 0x157   : > { %2792 = vrcp.f32 %v1165_v6  ;;  %v3621_v6 = vadd.f32 %v3563_v26, %v3495_v0 }
 0x158   : > { %2794 = vrcp.f32 %v1163_v16 }
 0x15a   : > { %v2781_v19 = vpop.eup %2780 }
 0x15b   : > { %v2783_v30 = vpop.eup %2782  ;;  %v1168_v53 = vadd.f32 1.0, %v2781_v19 }
 0x15c   : > { %v2785_v2 = vpop.eup %2784  ;;  %v1166_v59 = vadd.f32 1.0, %v2783_v30  ;;  %v2384_v30 = vmul.f32 -1.442695, %v3621_v6 }
 0x15d   : > { %v2787_v5 = vpop.eup %2786  ;;  %2796 = vrcp.f32 %v1168_v53  ;;  %v1169_v12 = vadd.f32 1.0, %v2785_v2 }
 0x15e   : > { %2798 = vrcp.f32 %v1166_v59  ;;  %v1167_v23 = vadd.f32 1.0, %v2787_v5 }
 0x15f   : > { %v2789_v3 = vpop.eup %2788  ;;  %2800 = vrcp.f32 %v1169_v12 }
 0x160   : > { %v2791_v35 = vpop.eup %2790  ;;  %v3537_v44 = vmul.f32 %v2789_v3, %v3512_v18  ;;  %2802 = vrcp.f32 %v1167_v23 }
 0x161   : > { %v2793_v50 = vpop.eup %2792  ;;  %v3540_v51 = vmul.f32 %v2791_v35, %v3514_v22  ;;  %2804 = vpow2.f32 %v2381_v34 }
 0x162   : > { %v2795_v52 = vpop.eup %2794  ;;  %v3543_v54 = vmul.f32 %v2793_v50, %v3520_v27 }
 0x163   : > { %v3546_v8 = vmul.f32 %v2795_v52, %v3523_v33  ;;  %v3575_v33 = vadd.f32 %v3563_v26, %v3483_v57  ;;  %v2380_v57 = vmul.f32 -1.442695, %v3585_v37 }
 0x164   : > { %v1996_v9 = vpack.c.bf16 %v3543_v54, %v3537_v44 }
 0x165   : > { %v1995_v10 = vpack.c.bf16 %v3546_v8, %v3540_v51  ;;  %v2379_v1 = vmul.f32 -1.442695, %v3575_v33 }
 0x167   : > { %v2797_v11 = vpop.eup %2796  ;;  %2647 = vmatprep.mubr.bf16.mxu1 %v1995_v10  ;;  %2806 = vpow2.f32 %v2379_v1 }
 0x168   : > { %v2799_v15 = vpop.eup %2798  ;;  %v3552_v17 = vmul.f32 %v2797_v11, %v1136_v38  ;;  %2648 = vmatmul.mubr.bf16.vlgmr.msra.gmra.mrb[32].mxu1 %v1996_v9  ;;  %2808 = vpow2.f32 %v2382_v55 }
 0x169   : > { %v2801_v18 = vpop.eup %2800  ;;  %v3554_v20 = vmul.f32 %v2799_v15, %v1134_v40  ;;  %2810 = vpow2.f32 %v2380_v57 }
 0x16a   : > { %v2803_v22 = vpop.eup %2802  ;;  %v3556_v24 = vmul.f32 %v2801_v18, %v1137_v46 }
 0x16b   : > { %v3558_v25 = vmul.f32 %v2803_v22, %v1135_v42  ;;  %v2805_v41 = vpop.eup %2804  ;;  %v3605_v42 = vadd.f32 %v3563_v26, %v3491_v62  ;;  %v2385_v62 = vmul.f32 -1.442695, %v3597_v45 }
 0x16c   : > { %v1998_v27 = vpack.c.bf16 %v3556_v24, %v3552_v17  ;;  %v1306_v49 = vadd.f32 1.0, %v2805_v41 }
 0x16d   : > { %v1997_v28 = vpack.c.bf16 %v3558_v25, %v3554_v20  ;;  %v2383_v4 = vmul.f32 -1.442695, %v3605_v42 }
 0x16f   : > { %2651 = vmatprep.mubr.bf16.mxu1 %v1997_v28 }
 0x170   : > { %2652 = vmatmul.mubr.bf16.gmra.mrb[36].mxu1 %v1998_v27 }
 0x171   : > { %v2807_v60 = vpop.eup %2806 }
 0x172   : > { %v1304_v21 = vadd.f32 1.0, %v2807_v60  ;;  %v2809_v7 = vpop.eup %2808 }
 0x173   : > { %v2811_v47 = vpop.eup %2810  ;;  %v1307_v16 = vadd.f32 1.0, %v2809_v7 }
 0x174   : > { %v1305_v19 = vadd.f32 1.0, %v2811_v47 }
 0x17f   : > { %v2581_v38 = vpop.f32.mrb[8].mxu1 }
 0x180   : > { %v3590_v39 = vadd.f32 %v2581_v38, %v3563_v26  ;;  %v1390_v40 = vpop.f32.mrb[9].mxu1 }
 0x181   : > { %v3593_v58 = vadd.f32 %v3563_v26, %v1390_v40  ;;  %v2582_v43 = vpop.f32.mrb[10].mxu1 }
 0x182   : > { %v2393_v46 = vmul.f32 -1.442695, %v3590_v39  ;;  %v3601_v48 = vadd.f32 %v2582_v43, %v3563_v26  ;;  %v1393_v31 = vpop.f32.mrb[11].mxu1 }
 0x183   : > { %v2391_v32 = vmul.f32 -1.442695, %v3593_v58  ;;  %v3609_v13 = vadd.f32 %v3563_v26, %v1393_v31 }
 0x184   : > { %2812 = vpow2.f32 %v2393_v46  ;;  %v2394_v14 = vmul.f32 -1.442695, %v3601_v48 }
 0x185   : > { %2814 = vpow2.f32 %v2391_v32  ;;  %v2392_v56 = vmul.f32 -1.442695, %v3609_v13 }
 0x186   : > { %2816 = vpow2.f32 %v2394_v14 }
 0x187   : > { %2818 = vpow2.f32 %v2392_v56 }
 0x188   : > { %2820 = vrcp.f32 %v1306_v49 }
 0x189   : > { %2822 = vrcp.f32 %v1304_v21 }
 0x18a   : > { %2824 = vpow2.f32 %v2385_v62 }
 0x18b   : > { %2826 = vpow2.f32 %v2383_v4 }
 0x18c   : > { %2828 = vpow2.f32 %v2386_v63 }
 0x18d   : > { %2830 = vrcp.f32 %v1307_v16 }
 0x18e   : > { %v2813_v53 = vpop.eup %2812  ;;  %2832 = vrcp.f32 %v1305_v19 }
 0x18f   : > { %v2815_v2 = vpop.eup %2814  ;;  %2834 = vpow2.f32 %v2384_v30  ;;  %v1447_v59 = vadd.f32 1.0, %v2813_v53 }
 0x190   : > { %v2817_v0 = vpop.eup %2816  ;;  %v1445_v5 = vadd.f32 1.0, %v2815_v2 }
 0x191   : > { %v2819_v12 = vpop.eup %2818  ;;  %2836 = vrcp.f32 %v1447_v59  ;;  %v1448_v23 = vadd.f32 1.0, %v2817_v0  ;;  %v2585_v50 = vpop.f32.mrb[12].mxu1 }
 0x192   : > { %v2821_v3 = vpop.eup %2820  ;;  %2838 = vrcp.f32 %v1445_v5  ;;  %v1446_v35 = vadd.f32 1.0, %v2819_v12  ;;  %v3626_v9 = vadd.f32 %v2585_v50, %v3563_v26  ;;  %v1406_v10 = vpop.f32.mrb[13].mxu1 }
 0x193   : > { %v2823_v52 = vpop.eup %2822  ;;  %2840 = vrcp.f32 %v1448_v23  ;;  %v3629_v15 = vadd.f32 %v3563_v26, %v1406_v10  ;;  %v2586_v18 = vpop.f32.mrb[14].mxu1  ;;  %v1330_v49 = vmul.f32 %v2821_v3, %v3571_v29 }
 0x194   : > { %v2825_v11 = vpop.eup %2824  ;;  %2842 = vrcp.f32 %v1446_v35  ;;  %v2397_v27 = vmul.f32 -1.442695, %v3626_v9  ;;  %v3633_v28 = vadd.f32 %v2586_v18, %v3563_v26  ;;  %v1409_v34 = vpop.f32.mrb[15].mxu1  ;;  %v1328_v14 = vmul.f32 %v2823_v52, %v3575_v33 }
 0x195   : > { %v2827_v22 = vpop.eup %2826  ;;  %v2395_v55 = vmul.f32 -1.442695, %v3629_v15  ;;  %v3637_v57 = vadd.f32 %v3563_v26, %v1409_v34  ;;  %v1310_v40 = vadd.f32 1.0, %v2825_v11 }
 0x196   : > { %v2829_v1 = vpop.eup %2828  ;;  %2844 = vpow2.f32 %v2397_v27  ;;  %v2398_v41 = vmul.f32 -1.442695, %v3633_v28  ;;  %v1308_v60 = vadd.f32 1.0, %v2827_v22 }
 0x197   : > { %v2831_v38 = vpop.eup %2830  ;;  %2846 = vpow2.f32 %v2395_v55  ;;  %v2396_v46 = vmul.f32 -1.442695, %v3637_v57  ;;  %v1311_v32 = vadd.f32 1.0, %v2829_v1 }
 0x198   : > { %v2833_v43 = vpop.eup %2832  ;;  %2848 = vpow2.f32 %v2398_v41  ;;  %v1331_v7 = vmul.f32 %v2831_v38, %v3581_v36 }
 0x199   : > { %v2835_v31 = vpop.eup %2834  ;;  %2850 = vpow2.f32 %v2396_v46  ;;  %v2591_v21 = vpop.f32.mrb[16].mxu1  ;;  %v1329_v62 = vmul.f32 %v2833_v43, %v3585_v37 }
 0x19a   : > { %2852 = vrcp.f32 %v1310_v40  ;;  %v3646_v47 = vadd.f32 %v2591_v21, %v3563_v26  ;;  %v1539_v4 = vpop.f32.mrb[17].mxu1  ;;  %v1309_v16 = vadd.f32 1.0, %v2835_v31 }
 0x19b   : > { %v2837_v56 = vpop.eup %2836  ;;  %2854 = vrcp.f32 %v1308_v60  ;;  %v3650_v29 = vadd.f32 %v3563_v26, %v1539_v4  ;;  %v2592_v33 = vpop.f32.mrb[18].mxu1 }
 0x19c   : > { %v2839_v63 = vpop.eup %2838  ;;  %v1471_v19 = vmul.f32 %v2837_v56, %v3590_v39  ;;  %2856 = vrcp.f32 %v1311_v32  ;;  %v2405_v37 = vmul.f32 -1.442695, %v3646_v47  ;;  %v3655_v53 = vadd.f32 %v2592_v33, %v3563_v26  ;;  %v1542_v2 = vpop.f32.mrb[19].mxu1 }
 0x19d   : > { %v2841_v30 = vpop.eup %2840  ;;  %v1469_v36 = vmul.f32 %v2839_v63, %v3593_v58  ;;  %v2403_v39 = vmul.f32 -1.442695, %v3650_v29  ;;  %v3662_v12 = vadd.f32 %v3563_v26, %v1542_v2 }
 0x19e   : > { %v2843_v59 = vpop.eup %2842  ;;  %v3657_v0 = vadd.f32 %v1471_v19, %v1330_v49  ;;  %v1472_v5 = vmul.f32 %v2841_v30, %v3601_v48  ;;  %2858 = vpow2.f32 %v2405_v37  ;;  %v2406_v3 = vmul.f32 -1.442695, %v3655_v53 }
 0x19f   : > { %v3664_v23 = vadd.f32 %v1469_v36, %v1328_v14  ;;  %v1470_v58 = vmul.f32 %v2843_v59, %v3609_v13  ;;  %2860 = vpow2.f32 %v2403_v39  ;;  %v2404_v50 = vmul.f32 -1.442695, %v3662_v12 }
 0x1a0   : > { %v3668_v35 = vadd.f32 %v1472_v5, %v1331_v7  ;;  %v2845_v52 = vpop.eup %2844  ;;  %2862 = vpow2.f32 %v2406_v3 }
 0x1a1   : > { %v3671_v10 = vadd.f32 %v1470_v58, %v1329_v62  ;;  %v2847_v48 = vpop.eup %2846  ;;  %v1451_v11 = vadd.f32 1.0, %v2845_v52  ;;  %2864 = vpow2.f32 %v2404_v50  ;;  %v2595_v18 = vpop.f32.mrb[20].mxu1 }
 0x1a2   : > { %v2849_v22 = vpop.eup %2848  ;;  %2866 = vrcp.f32 %v1309_v16  ;;  %v1449_v27 = vadd.f32 1.0, %v2847_v48  ;;  %v3674_v13 = vadd.f32 %v2595_v18, %v3563_v26  ;;  %v1555_v34 = vpop.f32.mrb[21].mxu1 }
 0x1a3   : > { %v2851_v1 = vpop.eup %2850  ;;  %2868 = vrcp.f32 %v1451_v11  ;;  %v1452_v55 = vadd.f32 1.0, %v2849_v22  ;;  %v3677_v38 = vadd.f32 %v3563_v26, %v1555_v34  ;;  %v2596_v40 = vpop.f32.mrb[22].mxu1 }
 0x1a4   : > { %v2853_v41 = vpop.eup %2852  ;;  %2870 = vrcp.f32 %v1449_v27  ;;  %v1450_v43 = vadd.f32 1.0, %v2851_v1  ;;  %v2409_v60 = vmul.f32 -1.442695, %v3674_v13  ;;  %v3681_v46 = vadd.f32 %v2596_v40, %v3563_v26  ;;  %v1558_v31 = vpop.f32.mrb[23].mxu1 }
 0x1a5   : > { %v2855_v32 = vpop.eup %2854  ;;  %2872 = vrcp.f32 %v1452_v55  ;;  %v2407_v49 = vmul.f32 -1.442695, %v3677_v38  ;;  %v3685_v14 = vadd.f32 %v3563_v26, %v1558_v31  ;;  %v1334_v27 = vmul.f32 %v2853_v41, %v3597_v45 }
 0x1a6   : > { %v2857_v21 = vpop.eup %2856  ;;  %2874 = vrcp.f32 %v1450_v43  ;;  %v2410_v56 = vmul.f32 -1.442695, %v3681_v46  ;;  %v1332_v40 = vmul.f32 %v2855_v32, %v3605_v42 }
 0x1a7   : > { %2876 = vpow2.f32 %v2409_v60  ;;  %v2408_v7 = vmul.f32 -1.442695, %v3685_v14 }
 0x1a8   : > { %v2859_v62 = vpop.eup %2858  ;;  %2878 = vpow2.f32 %v2407_v49  ;;  %v1335_v49 = vmul.f32 %v2857_v21, %v3613_v61 }
 0x1a9   : > { %v2861_v4 = vpop.eup %2860  ;;  %v1596_v63 = vadd.f32 1.0, %v2859_v62  ;;  %2880 = vpow2.f32 %v2410_v56  ;;  %v2601_v16 = vpop.f32.mrb[24].mxu1 }
 0x1aa   : > { %v2863_v19 = vpop.eup %2862  ;;  %v1594_v33 = vadd.f32 1.0, %v2861_v4  ;;  %2882 = vpow2.f32 %v2408_v7  ;;  %v3690_v30 = vadd.f32 %v2601_v16, %v3563_v26  ;;  %v1688_v36 = vpop.f32.mrb[25].mxu1 }
 0x1ab   : > { %v2865_v37 = vpop.eup %2864  ;;  %2884 = vrcp.f32 %v1596_v63  ;;  %v1597_v2 = vadd.f32 1.0, %v2863_v19  ;;  %v3693_v59 = vadd.f32 %v3563_v26, %v1688_v36  ;;  %v2602_v5 = vpop.f32.mrb[26].mxu1 }
 0x1ac   : > { %v2867_v39 = vpop.eup %2866  ;;  %2886 = vrcp.f32 %v1594_v33  ;;  %v1595_v58 = vadd.f32 1.0, %v2865_v37  ;;  %v2417_v3 = vmul.f32 -1.442695, %v3690_v30  ;;  %v3697_v50 = vadd.f32 %v2602_v5, %v3563_v26  ;;  %v1691_v52 = vpop.f32.mrb[27].mxu1 }
 0x1ad   : > { %v2869_v48 = vpop.eup %2868  ;;  %2888 = vrcp.f32 %v1597_v2  ;;  %v2415_v11 = vmul.f32 -1.442695, %v3693_v59  ;;  %v3701_v18 = vadd.f32 %v3563_v26, %v1691_v52  ;;  %v1333_v41 = vmul.f32 %v2867_v39, %v3621_v6 }
 0x1ae   : > { %v2871_v22 = vpop.eup %2870  ;;  %v1475_v34 = vmul.f32 %v2869_v48, %v3626_v9  ;;  %2890 = vrcp.f32 %v1595_v58  ;;  %v2418_v1 = vmul.f32 -1.442695, %v3697_v50 }
 0x1af   : > { %v2873_v55 = vpop.eup %2872  ;;  %v1473_v43 = vmul.f32 %v2871_v22, %v3629_v15  ;;  %2892 = vpow2.f32 %v2417_v3  ;;  %v2416_v60 = vmul.f32 -1.442695, %v3701_v18 }
 0x1b0   : > { %v2875_v31 = vpop.eup %2874  ;;  %v3710_v56 = vadd.f32 %v1475_v34, %v1334_v27  ;;  %v1476_v45 = vmul.f32 %v2873_v55, %v3633_v28  ;;  %2894 = vpow2.f32 %v2415_v11 }
 0x1b1   : > { %v2877_v9 = vpop.eup %2876  ;;  %v3714_v7 = vadd.f32 %v1473_v43, %v1332_v40  ;;  %v1474_v42 = vmul.f32 %v2875_v31, %v3637_v57  ;;  %2896 = vpow2.f32 %v2418_v1  ;;  %v2605_v15 = vpop.f32.mrb[28].mxu1 }
 0x1b2   : > { %v2879_v32 = vpop.eup %2878  ;;  %v3717_v62 = vadd.f32 %v1476_v45, %v1335_v49  ;;  %v1600_v4 = vadd.f32 1.0, %v2877_v9  ;;  %2898 = vpow2.f32 %v2416_v60  ;;  %v3720_v61 = vadd.f32 %v2605_v15, %v3563_v26  ;;  %v1704_v21 = vpop.f32.mrb[29].mxu1 }
 0x1b3   : > { %v2881_v28 = vpop.eup %2880  ;;  %v1482_v63 = vadd.f32 %v1474_v42, %v1333_v41  ;;  %v1598_v16 = vadd.f32 1.0, %v2879_v32  ;;  %v3723_v6 = vadd.f32 %v3563_v26, %v1704_v21  ;;  %v2606_v19 = vpop.f32.mrb[30].mxu1 }
 0x1b4   : > { %v2883_v33 = vpop.eup %2882  ;;  %2900 = vrcp.f32 %v1600_v4  ;;  %v1601_v57 = vadd.f32 1.0, %v2881_v28  ;;  %v2421_v36 = vmul.f32 -1.442695, %v3720_v61  ;;  %v3727_v37 = vadd.f32 %v2606_v19, %v3563_v26  ;;  %v1707_v2 = vpop.f32.mrb[31].mxu1 }
 0x1b5   : > { %v2885_v5 = vpop.eup %2884  ;;  %2902 = vrcp.f32 %v1598_v16  ;;  %v1599_v39 = vadd.f32 1.0, %v2883_v33  ;;  %v2419_v58 = vmul.f32 -1.442695, %v3723_v6  ;;  %v3731_v3 = vadd.f32 %v3563_v26, %v1707_v2 }
 0x1b6   : > { %v2887_v52 = vpop.eup %2886  ;;  %v1620_v48 = vmul.f32 %v2885_v5, %v3646_v47  ;;  %2904 = vrcp.f32 %v1601_v57  ;;  %v2422_v11 = vmul.f32 -1.442695, %v3727_v37 }
 0x1b7   : > { %v2889_v22 = vpop.eup %2888  ;;  %v1618_v27 = vmul.f32 %v2887_v52, %v3650_v29  ;;  %2906 = vrcp.f32 %v1599_v39  ;;  %v2420_v34 = vmul.f32 -1.442695, %v3731_v3 }
 0x1b8   : > { %v2891_v1 = vpop.eup %2890  ;;  %v1628_v55 = vadd.f32 %v1620_v48, %v3657_v0  ;;  %v1621_v40 = vmul.f32 %v2889_v22, %v3655_v53  ;;  %2908 = vpow2.f32 %v2421_v36 }
 0x1b9   : > { %v2893_v26 = vpop.eup %2892  ;;  %v1626_v43 = vadd.f32 %v1618_v27, %v3664_v23  ;;  %v1619_v47 = vmul.f32 %v2891_v1, %v3662_v12  ;;  %2910 = vpow2.f32 %v2419_v58 }
 0x1ba   : > { %v2895_v60 = vpop.eup %2894  ;;  %v1629_v31 = vadd.f32 %v1621_v40, %v3668_v35  ;;  %v1745_v49 = vadd.f32 1.0, %v2893_v26  ;;  %2912 = vpow2.f32 %v2422_v11 }
 0x1bb   : > { %v2897_v29 = vpop.eup %2896  ;;  %v1627_v45 = vadd.f32 %v1619_v47, %v3671_v10  ;;  %v1743_v9 = vadd.f32 1.0, %v2895_v60  ;;  %2914 = vpow2.f32 %v2420_v34 }
 0x1bc   : > { %v2899_v0 = vpop.eup %2898  ;;  %2916 = vrcp.f32 %v1745_v49  ;;  %v1746_v53 = vadd.f32 1.0, %v2897_v29 }
 0x1bd   : > { %2918 = vrcp.f32 %v1743_v9  ;;  %v1744_v41 = vadd.f32 1.0, %v2899_v0 }
 0x1be   : > { %v2901_v42 = vpop.eup %2900  ;;  %2920 = vrcp.f32 %v1746_v53 }
 0x1bf   : > { %v2903_v23 = vpop.eup %2902  ;;  %v1624_v12 = vmul.f32 %v2901_v42, %v3674_v13  ;;  %2922 = vrcp.f32 %v1744_v41 }
 0x1c0   : > { %v2905_v15 = vpop.eup %2904  ;;  %v1622_v35 = vmul.f32 %v2903_v23, %v3677_v38 }
 0x1c1   : > { %v2907_v32 = vpop.eup %2906  ;;  %v1632_v4 = vadd.f32 %v1624_v12, %v3710_v56  ;;  %v1625_v10 = vmul.f32 %v2905_v15, %v3681_v46 }
 0x1c2   : > { %v2909_v21 = vpop.eup %2908  ;;  %v1630_v28 = vadd.f32 %v1622_v35, %v3714_v7  ;;  %v1623_v16 = vmul.f32 %v2907_v32, %v3685_v14 }
 0x1c3   : > { %v2911_v19 = vpop.eup %2910  ;;  %v1633_v33 = vadd.f32 %v1625_v10, %v3717_v62  ;;  %v1749_v57 = vadd.f32 1.0, %v2909_v21 }
 0x1c4   : > { %v2913_v36 = vpop.eup %2912  ;;  %v1631_v13 = vadd.f32 %v1623_v16, %v1482_v63  ;;  %v1747_v2 = vadd.f32 1.0, %v2911_v19 }
 0x1c5   : > { %v2915_v5 = vpop.eup %2914  ;;  %2924 = vrcp.f32 %v1749_v57  ;;  %v1750_v38 = vadd.f32 1.0, %v2913_v36 }
 0x1c6   : > { %v2917_v39 = vpop.eup %2916  ;;  %2926 = vrcp.f32 %v1747_v2  ;;  %v1748_v56 = vadd.f32 1.0, %v2915_v5 }
 0x1c7   : > { %v2919_v58 = vpop.eup %2918  ;;  %v1769_v46 = vmul.f32 %v2917_v39, %v3690_v30  ;;  %2928 = vrcp.f32 %v1750_v38 }
 0x1c8   : > { %v2921_v7 = vpop.eup %2920  ;;  %v1767_v14 = vmul.f32 %v2919_v58, %v3693_v59  ;;  %2930 = vrcp.f32 %v1748_v56  ;;  %v2423_v58 = vld [vmem:[%s3925_s11] ss:$0 sm:$0xff] }
 0x1c9   : > { %v2923_v52 = vpop.eup %2922  ;;  %v1777_v62 = vadd.f32 %v1769_v46, %v1628_v55  ;;  %v1770_v48 = vmul.f32 %v2921_v7, %v3697_v50 }
 0x1ca   : > { %v1775_v63 = vadd.f32 %v1767_v14, %v1626_v43  ;;  %v1768_v11 = vmul.f32 %v2923_v52, %v3701_v18 }
 0x1cb   : > { %v1785_v22 = vmul.f32 0.25, %v1777_v62  ;;  %v1778_v27 = vadd.f32 %v1770_v48, %v1629_v31 }
 0x1cc   : > { %v1783_v34 = vmul.f32 0.25, %v1775_v63  ;;  %v1776_v1 = vadd.f32 %v1768_v11, %v1627_v45 }
 0x1cd   : > { %v1786_v40 = vmul.f32 0.25, %v1778_v27  ;;  %v1793_v30 = vsub.f32 %v3537_v44, %v1785_v22 }
 0x1ce   : > { %v1784_v26 = vmul.f32 0.25, %v1776_v1  ;;  %v1791_v55 = vsub.f32 %v3540_v51, %v1783_v34 }
 0x1cf   : > { %v2925_v47 = vpop.eup %2924  ;;  %v1794_v60 = vsub.f32 %v3543_v54, %v1786_v40 }
 0x1d0   : > { %v2927_v59 = vpop.eup %2926  ;;  %v1773_v49 = vmul.f32 %v2925_v47, %v3720_v61  ;;  %v1792_v50 = vsub.f32 %v3546_v8, %v1784_v26 }
 0x1d1   : > { %v2929_v43 = vpop.eup %2928  ;;  %v1800_v18 = vpack.c.bf16 %v1794_v60, %v1793_v30  ;;  %v1771_v31 = vmul.f32 %v2927_v59, %v3723_v6 }
 0x1d2   : > { %v2931_v29 = vpop.eup %2930  ;;  %v1781_v45 = vadd.f32 %v1773_v49, %v1632_v4  ;;  %v1774_v9 = vmul.f32 %v2929_v43, %v3727_v37  ;;  %v1799_v0 = vpack.c.bf16 %v1792_v50, %v1791_v55 }
 0x1d3   : > { %v1779_v53 = vadd.f32 %v1771_v31, %v1630_v28  ;;  %v1772_v44 = vmul.f32 %v2931_v29, %v3731_v3 }
 0x1d4   : > { %v1789_v54 = vmul.f32 0.25, %v1781_v45  ;;  %v1782_v41 = vadd.f32 %v1774_v9, %v1633_v33  ;;  %2623 = vmatprep.mubr.bf16.mxu0 %v1799_v0 }
 0x1d5   : > { %v1787_v61 = vmul.f32 0.25, %v1779_v53  ;;  %v1780_v42 = vadd.f32 %v1772_v44, %v1631_v13  ;;  %2624 = vmatmul.mubr.bf16.vlgmr.msra.gmra.mrb[8].mxu0 %v1800_v18 }
 0x1d6   : > { %v1790_v51 = vmul.f32 0.25, %v1782_v41  ;;  %v1797_v23 = vsub.f32 %v3552_v17, %v1789_v54  ;;  %v2440_v17 = vld [vmem:[%s3923_s9] ss:$0 sm:$0xff] }
 0x1d7   : > { %v1788_v8 = vmul.f32 0.25, %v1780_v42  ;;  %v1795_v12 = vsub.f32 %v3554_v20, %v1787_v61 }
 0x1d8   : > { %v1798_v6 = vsub.f32 %v3556_v24, %v1790_v51 }
 0x1d9   : > { %v1796_v37 = vsub.f32 %v3558_v25, %v1788_v8 }
 0x1da   : > { %v1802_v15 = vpack.c.bf16 %v1798_v6, %v1797_v23 }
 0x1db   : > { %v1801_v35 = vpack.c.bf16 %v1796_v37, %v1795_v12 }
 0x1dd   : > { %2627 = vmatprep.mubr.bf16.mxu0 %v1801_v35 }
 0x1de   : > { %2628 = vmatmul.mubr.bf16.gmra.mrb[12].mxu0 %v1802_v15 }
 0x23b   : > { %v2649_v3 = vpop.f32.mrb[32].mxu1 }
 0x23c   : > { %v2104_v32 = vpop.f32.mrb[33].mxu1  ;;  %v3769_v24 = vadd.f32 %v2649_v3, %v2440_v17 }
 0x23d   : > { %v2650_v4 = vpop.f32.mrb[34].mxu1  ;;  %v3771_v20 = vadd.f32 %v2440_v17, %v2104_v32 }
 0x23e   : > { %v2107_v10 = vpop.f32.mrb[35].mxu1  ;;  %v3773_v25 = vadd.f32 %v2650_v4, %v2440_v17  ;;  %v2451_v57 = vmul.f32 -1.442695, %v3769_v24 }
 0x23f   : > { %v3775_v33 = vadd.f32 %v2440_v17, %v2107_v10  ;;  %v2449_v36 = vmul.f32 -1.442695, %v3771_v20 }
 0x240   : > { %v2452_v13 = vmul.f32 -1.442695, %v3773_v25  ;;  %2932 = vpow2.f32 %v2451_v57 }
 0x241   : > { %v2450_v2 = vmul.f32 -1.442695, %v3775_v33  ;;  %2934 = vpow2.f32 %v2449_v36 }
 0x242   : > { %2936 = vpow2.f32 %v2452_v13 }
 0x243   : > { %v2653_v21 = vpop.f32.mrb[36].mxu1  ;;  %2938 = vpow2.f32 %v2450_v2 }
 0x244   : > { %v2120_v28 = vpop.f32.mrb[37].mxu1  ;;  %v3781_v5 = vadd.f32 %v2653_v21, %v2440_v17 }
 0x245   : > { %v2654_v16 = vpop.f32.mrb[38].mxu1  ;;  %v3783_v38 = vadd.f32 %v2440_v17, %v2120_v28 }
 0x246   : > { %v2123_v19 = vpop.f32.mrb[39].mxu1  ;;  %v3785_v39 = vadd.f32 %v2654_v16, %v2440_v17  ;;  %v2455_v56 = vmul.f32 -1.442695, %v3781_v5 }
 0x247   : > { %v2453_v46 = vmul.f32 -1.442695, %v3783_v38  ;;  %v3793_v52 = vadd.f32 %v2440_v17, %v2123_v19 }
 0x248   : > { %v2456_v7 = vmul.f32 -1.442695, %v3785_v39  ;;  %2940 = vpow2.f32 %v2455_v56 }
 0x249   : > { %2942 = vpow2.f32 %v2453_v46  ;;  %v2454_v60 = vmul.f32 -1.442695, %v3793_v52 }
 0x24a   : > { %v2933_v22 = vpop.eup %2932  ;;  %2944 = vpow2.f32 %v2456_v7 }
 0x24b   : > { %v2935_v40 = vpop.eup %2934  ;;  %v2161_v55 = vadd.f32 1.0, %v2933_v22 }
 0x24c   : > { %v2937_v30 = vpop.eup %2936  ;;  %v2159_v43 = vadd.f32 1.0, %v2935_v40 }
 0x24d   : > { %v2939_v49 = vpop.eup %2938  ;;  %v2162_v18 = vadd.f32 1.0, %v2937_v30 }
 0x24e   : > { %v2160_v31 = vadd.f32 1.0, %v2939_v49 }
 0x252   : > { %v2941_v44 = vpop.eup %2940 }
 0x253   : > { %v2943_v42 = vpop.eup %2942  ;;  %v2165_v28 = vadd.f32 1.0, %v2941_v44 }
 0x254   : > { %v2945_v23 = vpop.eup %2944  ;;  %v2163_v17 = vadd.f32 1.0, %v2943_v42 }
 0x255   : > { %v2166_v36 = vadd.f32 1.0, %v2945_v23 }
 0x2a8   : > { %v2625_v14 = vpop.f32.mrb[8].mxu0 }
 0x2a9   : > { %v3795_v62 = vadd.f32 %v2625_v14, %v2423_v58  ;;  %v1908_v48 = vpop.f32.mrb[9].mxu0 }
 0x2aa   : > { %v3797_v63 = vadd.f32 %v2423_v58, %v1908_v48  ;;  %v2626_v11 = vpop.f32.mrb[10].mxu0 }
 0x2ab   : > { %v2434_v27 = vmul.f32 -1.442695, %v3795_v62  ;;  %v3800_v34 = vadd.f32 %v2626_v11, %v2423_v58  ;;  %v1911_v1 = vpop.f32.mrb[11].mxu0 }
 0x2ac   : > { %v2432_v26 = vmul.f32 -1.442695, %v3797_v63  ;;  %v3803_v47 = vadd.f32 %v2423_v58, %v1911_v1 }
 0x2ad   : > { %2946 = vpow2.f32 %v2434_v27  ;;  %v2435_v59 = vmul.f32 -1.442695, %v3800_v34 }
 0x2ae   : > { %2948 = vpow2.f32 %v2432_v26  ;;  %v2433_v50 = vmul.f32 -1.442695, %v3803_v47 }
 0x2af   : > { %2950 = vpow2.f32 %v2435_v59 }
 0x2b0   : > { %2952 = vpow2.f32 %v2433_v50 }
 0x2b1   : > { %2954 = vpow2.f32 %v2454_v60  ;;  %v2629_v29 = vpop.f32.mrb[12].mxu0 }
 0x2b2   : > { %2956 = vrcp.f32 %v2161_v55  ;;  %v3808_v45 = vadd.f32 %v2629_v29, %v2423_v58  ;;  %v1924_v9 = vpop.f32.mrb[13].mxu0 }
 0x2b3   : > { %2958 = vrcp.f32 %v2159_v43  ;;  %v3810_v0 = vadd.f32 %v2423_v58, %v1924_v9  ;;  %v2630_v53 = vpop.f32.mrb[14].mxu0 }
 0x2b4   : > { %2960 = vrcp.f32 %v2162_v18  ;;  %v2438_v54 = vmul.f32 -1.442695, %v3808_v45  ;;  %v3813_v41 = vadd.f32 %v2630_v53, %v2423_v58  ;;  %v1927_v61 = vpop.f32.mrb[15].mxu0 }
 0x2b5   : > { %2962 = vrcp.f32 %v2160_v31  ;;  %v2436_v51 = vmul.f32 -1.442695, %v3810_v0  ;;  %v3816_v8 = vadd.f32 %v2423_v58, %v1927_v61 }
 0x2b6   : > { %2964 = vpow2.f32 %v2438_v54  ;;  %v2439_v6 = vmul.f32 -1.442695, %v3813_v41 }
 0x2b7   : > { %v2947_v12 = vpop.eup %2946  ;;  %2966 = vpow2.f32 %v2436_v51  ;;  %v2437_v37 = vmul.f32 -1.442695, %v3816_v8 }
 0x2b8   : > { %v2949_v15 = vpop.eup %2948  ;;  %v1965_v35 = vadd.f32 1.0, %v2947_v12  ;;  %2968 = vpow2.f32 %v2439_v6 }
 0x2b9   : > { %v2951_v3 = vpop.eup %2950  ;;  %v1963_v32 = vadd.f32 1.0, %v2949_v15  ;;  %2970 = vpow2.f32 %v2437_v37 }
 0x2ba   : > { %v2953_v4 = vpop.eup %2952  ;;  %2972 = vrcp.f32 %v1965_v35  ;;  %v1966_v10 = vadd.f32 1.0, %v2951_v3 }
 0x2bb   : > { %v2955_v21 = vpop.eup %2954  ;;  %2974 = vrcp.f32 %v1963_v32  ;;  %v1964_v16 = vadd.f32 1.0, %v2953_v4 }
 0x2bc   : > { %v2957_v19 = vpop.eup %2956  ;;  %2976 = vrcp.f32 %v1966_v10  ;;  %v2164_v2 = vadd.f32 1.0, %v2955_v21 }
 0x2bd   : > { %v2959_v57 = vpop.eup %2958  ;;  %2978 = vrcp.f32 %v1964_v16  ;;  %v2185_v26 = vmul.f32 %v2957_v19, %v3769_v24 }
 0x2be   : > { %v2961_v13 = vpop.eup %2960  ;;  %2980 = vrcp.f32 %v2165_v28  ;;  %v2183_v59 = vmul.f32 %v2959_v57, %v3771_v20 }
 0x2bf   : > { %v2963_v56 = vpop.eup %2962  ;;  %2982 = vrcp.f32 %v2163_v17  ;;  %v2186_v50 = vmul.f32 %v2961_v13, %v3773_v25 }
 0x2c0   : > { %v2965_v58 = vpop.eup %2964  ;;  %2984 = vrcp.f32 %v2166_v36  ;;  %v2184_v31 = vmul.f32 %v2963_v56, %v3775_v33 }
 0x2c1   : > { %v2967_v46 = vpop.eup %2966  ;;  %v1969_v7 = vadd.f32 1.0, %v2965_v58  ;;  %2986 = vrcp.f32 %v2164_v2 }
 0x2c2   : > { %v2969_v14 = vpop.eup %2968  ;;  %v1967_v48 = vadd.f32 1.0, %v2967_v46 }
 0x2c3   : > { %v2971_v11 = vpop.eup %2970  ;;  %2988 = vrcp.f32 %v1969_v7  ;;  %v1970_v22 = vadd.f32 1.0, %v2969_v14 }
 0x2c4   : > { %v2973_v27 = vpop.eup %2972  ;;  %2990 = vrcp.f32 %v1967_v48  ;;  %v1968_v1 = vadd.f32 1.0, %v2971_v11 }
 0x2c5   : > { %v2975_v40 = vpop.eup %2974  ;;  %v1989_v30 = vmul.f32 %v2973_v27, %v3795_v62  ;;  %2992 = vrcp.f32 %v1970_v22 }
 0x2c6   : > { %v2977_v60 = vpop.eup %2976  ;;  %v1987_v49 = vmul.f32 %v2975_v40, %v3797_v63  ;;  %2994 = vrcp.f32 %v1968_v1 }
 0x2c7   : > { %v2979_v55 = vpop.eup %2978  ;;  %v2193_v43 = vadd.f32 %v2185_v26, %v1989_v30  ;;  %v1990_v18 = vmul.f32 %v2977_v60, %v3800_v34 }
 0x2c8   : > { %v2191_v29 = vadd.f32 %v2183_v59, %v1987_v49  ;;  %v1988_v24 = vmul.f32 %v2979_v55, %v3803_v47  ;;  %v2981_v62 = vpop.eup %2980 }
 0x2c9   : > { %2202 = vst.msk [vmem:[%s3831_s2 + $0x10] sm:$0xff] %vm2199_vm6, %v2193_v43  ;;  %v2194_v20 = vadd.f32 %v2186_v50, %v1990_v18  ;;  %v2983_v25 = vpop.eup %2982  ;;  %v2189_v53 = vmul.f32 %v2981_v62, %v3781_v5 }
 0x2ca   : > { %2200 = vst.msk [vmem:[%s3831_s2] sm:$0xff] %vm2199_vm6, %v2191_v29  ;;  %v2192_v63 = vadd.f32 %v2184_v31, %v1988_v24  ;;  %v2985_v33 = vpop.eup %2984  ;;  %v2187_v61 = vmul.f32 %v2983_v25, %v3783_v38 }
 0x2cb   : > { %2203 = vst.msk [vmem:[%s3831_s2 + $0x18] sm:$0xff] %vm2199_vm6, %v2194_v20  ;;  %v2987_v34 = vpop.eup %2986  ;;  %v2190_v23 = vmul.f32 %v2985_v33, %v3785_v39 }
 0x2cc   : > { %2201 = vst.msk [vmem:[%s3831_s2 + $0x8] sm:$0xff] %vm2199_vm6, %v2192_v63 }
 0x2cd   : > { %v2989_v47 = vpop.eup %2988 }
 0x2ce   : > { %v2991_v9 = vpop.eup %2990  ;;  %v1993_v44 = vmul.f32 %v2989_v47, %v3808_v45  ;;  %v2188_v45 = vmul.f32 %v2987_v34, %v3793_v52 }
 0x2cf   : > { %v2993_v54 = vpop.eup %2992  ;;  %v1991_v42 = vmul.f32 %v2991_v9, %v3810_v0 }
 0x2d0   : > { %v2995_v51 = vpop.eup %2994  ;;  %v2197_v6 = vadd.f32 %v2189_v53, %v1993_v44  ;;  %v1994_v5 = vmul.f32 %v2993_v54, %v3813_v41 }
 0x2d1   : > { %v2195_v12 = vadd.f32 %v2187_v61, %v1991_v42  ;;  %v1992_v37 = vmul.f32 %v2995_v51, %v3816_v8 }
 0x2d2   : > { %2206 = vst.msk [vmem:[%s3831_s2 + $0x30] sm:$0xff] %vm2199_vm6, %v2197_v6  ;;  %v2198_v38 = vadd.f32 %v2190_v23, %v1994_v5 }
 0x2d3   : > { %2204 = vst.msk [vmem:[%s3831_s2 + $0x20] sm:$0xff] %vm2199_vm6, %v2195_v12  ;;  %v2196_v39 = vadd.f32 %v2188_v45, %v1992_v37 }
 0x2d4   : > { %2207 = vst.msk [vmem:[%s3831_s2 + $0x38] sm:$0xff] %vm2199_vm6, %v2198_v38 }
 0x2d5   : > { %2205 = vst.msk [vmem:[%s3831_s2 + $0x28] sm:$0xff] %vm2199_vm6, %v2196_v39 }
 0x2d6   : > { %3009 = shalt.err (!%p3006_p5)
}
 0x2d7   : > { %s3010_s27 = scalar_lea.hbm %s3856_s18, 1024  ;;  %s3014_s28 = scalar_lea.hbm %s3926_s12, 2048 }
 0x2d8   : > { %p3011_p6 = scmp.ne.s32.totalorder %s3856_s18, %s3010_s27  ;;  %p3015_p10 = scmp.lt.u32.totalorder %s3856_s18, %s3926_s12 }
 0x2d9   : > { %p3016_p11 = scmp.lt.u32.totalorder %s3014_s28, %s3010_s27  ;;  %p3018_p13 = scmp.lt.u32.totalorder %s3010_s27, %s3856_s18 }
 0x2da   : > { %p3012_p7 = pnand %p3011_p6, %p3187_p4 }
 0x2db   : > { %p3017_p12 = por %p3016_p11, %p3015_p10 }
 0x2dc   : > { %p3013_p9 = pneg %p3012_p7 }
 0x2dd   : > { %p3019_p0 = por %p3018_p13, %p3017_p12 }
 0x2df   : > { %p3020_p1 = pnand %p3019_p0, %p3013_p9 }
 0x2e1   : > { %3023 = shalt.err (!%p3020_p1)
}
 0x2e2   : > { %s3080_s20 = smov 128   ;;  %s3081_s17 = smov 8  }
 0x2e3   : > { %2684 = dma.vmem_to_hbm [thread:$0]  (%p3187_p4), %s3858_s14, 1024, %s3856_s18, %s3868_s19, %s3080_s20, %s3080_s20, %s3081_s17  }
 0x2e4 PF: > { %p2690_p2 = scmp.ge.s32.totalorder %s3074_s26, 2  ;;  %s2239_s0 = sand.u32 1, %s3054_s21  }
 0x2e5   : > { %s2240_s27 = scalar_lea.sflag [#allocation3], %s2239_s0 }
 0x2e6   : > { %p2687_p3 = pnand %p2690_p2, %p3194_p8 }
 0x2e8   : > { %3049 = dma.done.wait (!%p2687_p3), %s2240_s27, 1024  }
 0x2e9   : > { %3051 = vsyncadd (!%p2687_p3), %s2240_s27, 4294966272  ;;  %s25_s26 = sadd.s32 1, %s3074_s26   ;;  %s3935_s21 = smov %s3058_s22 }
 0x2ea   : > { %p22_p5 = scmp.ge.s32.totalorder %s25_s26, 4   ;;  %s3936_s22 = smov %s3062_s23 }
 0x2eb   : > { %s3937_s23 = smov %s3200_s16  ;;  %s3938_s24 = smov %s3070_s25 }
 0x2ec   : > { %s3939_s25 = smov %s3941_s29  ;;  %24 = sbr.rel (!%p22_p5) target bundleno = 7 (0x7), region = 104 }
 0x2f3   :  { %2245 = vsyncpa [#allocation3], 1 }
 0x2f4   :  { %2247 = vsyncpa [#allocation3 + $0x1], 1 }

// kernel: tpu_custom_call.1
= control target key start
LH: loop header
LB: loop body
LE: loop exit
PB: predicated region body
PF: predicated region fallthrough
CT: control target
= control target key end

     0   :  { %s3914_s0 = inlined_call_operand.vmem [shape: bf16[2,1,9,9,16], index: 0, kind: input, shape index: {}]   ;;  %s3915_s1 = inlined_call_operand.vmem [shape: bf16[16,128], index: 1, kind: input, shape index: {}]   ;;  %s3916_s2 = inlined_call_operand.vmem [shape: bf16[16,128], index: 2, kind: input, shape index: {}]   ;;  %s3917_s3 = inlined_call_operand.vmem [shape: bf16[16,128], index: 3, kind: input, shape index: {}]   ;;  %s3918_s4 = inlined_call_operand.vmem [shape: bf16[16,128], index: 4, kind: input, shape index: {}]   ;;  %s3919_s5 = inlined_call_operand.vmem [shape: f32[1,128], index: 5, kind: input, shape index: {}]   ;;  %s3920_s6 = inlined_call_operand.vmem [shape: bf16[4,128], index: 6, kind: input, shape index: {}]   ;;  %s3921_s7 = inlined_call_operand.vmem [shape: f32[1,128], index: 7, kind: input, shape index: {}]   ;;  %s3922_s8 = inlined_call_operand.vmem [shape: bf16[128,128], index: 8, kind: input, shape index: {}]   ;;  %s3923_s9 = inlined_call_operand.vmem [shape: f32[1,128], index: 9, kind: input, shape index: {}]   ;;  %s3924_s10 = inlined_call_operand.vmem [shape: bf16[128,128], index: 10, kind: input, shape index: {}]   ;;  %s3925_s11 = inlined_call_operand.vmem [shape: f32[1,128], index: 11, kind: input, shape index: {}]   ;;  %s3926_s12 = inlined_call_operand.hbm [shape: f32[2,8,8,8], index: 12, kind: output, shape index: {}]  }
   0x1   :  { %3927 = sst [smem:[#allocation5_spill]] %s3914_s0 }
   0x2   :  { %3928 = sst [smem:[#allocation6_spill]] %s3916_s2 }
   0x3   :  { %17 = vsyncpa [#allocation3], 0 }
   0x4   :  { %19 = vsyncpa [#allocation3 + $0x1], 0  ;;  %s3147_s21 = smov 0   ;;  %s3149_s22 = smov 0  }
   0x5   :  { %s3151_s23 = smov 0   ;;  %s3153_s24 = smov 0  }
   0x6   :  { %s3155_s25 = smov 0   ;;  %s3157_s26 = smov 0  }
   0x7 LB: > { %s2306_s27 = sadd.s32 4294967295, %s3074_s26   ;;  %s2307_s28 = sadd.s32 4294967294, %s3074_s26   ;;  %s3074_s26 = sphi %s3157_s26, %s25_s26   ;;  %s3070_s25 = sphi %s3155_s25, %s3939_s25   ;;  %s3066_s24 = sphi %s3153_s24, %s3938_s24   ;;  %s3062_s23 = sphi %s3151_s23, %s3937_s23   ;;  %s3058_s22 = sphi %s3149_s22, %s3936_s22   ;;  %s3054_s21 = sphi %s3147_s21, %s3935_s21  }
   0x8   : > { %s37_s29 = sadd.s32 1, %s3070_s25  ;;  %s305_s30 = sadd.s32 1, %s3062_s23 }
   0x9   : > { %p39_p0 = scmp.ge.s32.totalorder %s37_s29, 2  ;;  %p315_p1 = scmp.ne.s32.totalorder %s3062_s23, %s3058_s22 }
   0xa   : > { %p316_p2 = scmp.eq.s32.totalorder %s2306_s27, 1  ;;  %p321_p3 = scmp.ne.s32.totalorder %s3058_s22, %s3054_s21 }
   0xb   : > { %s3941_s29 = smov (%p39_p0, %s37_s29), 0  ;;  %p322_p5 = scmp.eq.s32.totalorder %s2307_s28, 1 }
   0xc   : > { %p3187_p4 = por %p316_p2, %p315_p1  ;;  %s300_s14 = ssub.s32 %s3070_s25, %s3941_s29 }
   0xd   : > { %p2310_p6 = scmp.ge.s32.totalorder %s3074_s26, 1  ;;  %p303_p7 = scmp.eq.s32.totalorder %s300_s14, 0 }
   0xe   : > { %p3194_p8 = por %p322_p5, %p321_p3  ;;  %p385_p9 = scmp.lt.s32.totalorder %s3074_s26, 3 }
   0xf   : > { %s3200_s16 = scalar_select %p303_p7, %s3062_s23, %s305_s30  }
  0x10   : > { %p386_p10 = pnand %p2310_p6, %p385_p9 }
  0x11   : > { %s3931_s2 = sld [smem:[#allocation6_spill]] (!%p386_p10)  ;;  %p431_p11 = scmp.lt.s32.totalorder (!%p386_p10), %s3066_s24, 1  ;;  %v3210_v1 = vld [vmem:[%s3915_s1] sm:$0xff] (!%p386_p10)   ;;  %vm1211_vm0 = vcmask (!%p386_p10), 1041408   ;;  %vm459_vm1 = vsmask.f32 (!%p386_p10), 3328 }
  0x12   : > { %389 = sbr.rel (%p386_p10) target bundleno = 740 (0x2e4), region = 68  ;;  %vm460_vm2 = vsmask.f32 (!%p386_p10), 7440  ;;  %v3216_v2 = vld [vmem:[%s3920_s6] sm:$0x3] (!%p386_p10)  ;;  %s3932_s0 = sld [smem:[#allocation5_spill]] (!%p386_p10) }
  0x13   : > { %2679 = vmatprep.subr.msk.bf16.mxu1 (!%p386_p10), %vm1211_vm0, %v3216_v2  ;;  %v3227_v3 = vsel (!%p386_p10), %vm1211_vm0, %v3216_v2, 0  ;;  %vm724_vm3 = vcmask (!%p386_p10), 130048   ;;  %vm1202_vm4 = vcmask (!%p386_p10), 31744   ;;  %vm3263_vm5 = vmor (!%p386_p10), %vm459_vm1, %vm460_vm2  ;;  %s428_s27 = sand.u32 (!%p386_p10), 1, %s3058_s22   ;;  %vm2199_vm6 = vcmask (!%p386_p10), 64512   ;;  %s2462_s30 = sshll.u32 (!%p386_p10), %s3066_s24, 10 }
  0x14   : > { %2568 = vmatpush3.bf16.msra.mxu1 (!%p386_p10), %v3227_v3  ;;  %s3856_s18 = scalar_lea.hbm (!%p386_p10), %s3926_s12, %s2462_s30 }
  0x15   : > { %2680 = vmatprep.subr.msk.bf16.mxu1 (!%p386_p10), %vm1211_vm0, %v3216_v2 }
  0x17   : > { %v2744_v0 = vld [vmem:[%s3931_s2] sm:$0xff] (!%p386_p10)  }
  0x18   : > { %2527 = vmatprep.subr.bf16.mxu0 (!%p386_p10), %v2744_v0 }
  0x19   : > { %s432_s19 = scalar_select %p431_p11, %s3066_s24, 1  ;;  %2528 = vmatpush3.bf16.msra.mxu0 %v2744_v0 }
  0x1a   : > { %2537 = vmatprep.subr.bf16.mxu0 %v3210_v1 }
  0x1b   : > { %s2683_s28 = smul.u32 72, %s432_s19  ;;  %s3076_s19 = smov 124  }
  0x1d   : > { %s3221_s2 = scalar_lea.vmem %s3932_s0, %s2683_s28  ;;  %s3077_s28 = smov 120  }
  0x1e   : > { %v3230_v4 = vld [vmem:[%s3221_s2] sm:$0xf]  ;;  %v575_v5 = vld [vmem:[%s3221_s2 + $0x4] sm:$0x1]  ;;  %v3234_v6 = vld [vmem:[%s3221_s2 + $0x8] sm:$0xf] }
  0x1f   : > { %v577_v7 = vld [vmem:[%s3221_s2 + $0xc] sm:$0x1]  ;;  %v591_v8 = vshrl.u32 %v3230_v4, 16  ;;  %v594_v9 = vshll.u32 %v3230_v4, 16  ;;  %v600_v10 = vshll.u32 %v575_v5, 16  ;;  %v605_v11 = vshrl.u32 %v3234_v6, 16 }
  0x20   : > { %v608_v12 = vshll.u32 %v3234_v6, 16  ;;  %v614_v13 = vshll.u32 %v577_v7, 16  ;;  %v3245_v14 = vld [vmem:[%s3221_s2 + $0x8] sm:$0xf]  ;;  %v2314_v15 = vld [vmem:[%s3221_s2 + $0xc] sm:$0x1]  ;;  %v2356_v16 = vcombine.low %v3230_v4, %v3234_v6 }
  0x21   : > { %v593_v17 = vrot.slane %v591_v8, 4  ;;  %v596_v18 = vrot.slane %v594_v9, 5  ;;  %v602_v19 = vrot.slane %v600_v10, 5  ;;  %v607_v20 = vrot.slane %v605_v11, 4  ;;  %v3251_v21 = vld [vmem:[%s3221_s2 + $0x10] sm:$0xf] }
  0x22   : > { %v610_v22 = vrot.slane %v608_v12, 5  ;;  %v616_v23 = vrot.slane %v614_v13, 5  ;;  %v2316_v24 = vld [vmem:[%s3221_s2 + $0x14] sm:$0x1]  ;;  %v463_v25 = vshrl.u32 %v3245_v14, 16  ;;  %v466_v26 = vshll.u32 %v3245_v14, 16 }
  0x23   : > { %v597_v27 = vor.u32 %v596_v18, %v593_v17  ;;  %v472_v28 = vshll.u32 %v2314_v15, 16  ;;  %v477_v29 = vshrl.u32 %v3251_v21, 16  ;;  %v480_v30 = vshll.u32 %v3251_v21, 16  ;;  %v3259_v31 = vld [vmem:[%s3221_s2 + $0x10] sm:$0xf] }
  0x24   : > { %v611_v33 = vor.u32 %v610_v22, %v607_v20  ;;  %v465_v34 = vrot.slane %v463_v25, 4  ;;  %v468_v35 = vrot.slane %v466_v26, 5  ;;  %v486_v36 = vshll.u32 %v2316_v24, 16  ;;  %v579_v37 = vld [vmem:[%s3221_s2 + $0x14] sm:$0x1] }
  0x25   : > { %v598_v38 = vrot.slane %v597_v27, 4  ;;  %v474_v39 = vrot.slane %v472_v28, 5  ;;  %v479_v40 = vrot.slane %v477_v29, 4  ;;  %v482_v41 = vrot.slane %v480_v30, 5  ;;  %v3269_v42 = vld [vmem:[%s3221_s2 + $0x18] sm:$0xf] }
  0x26   : > { %v612_v43 = vrot.slane %v611_v33, 4  ;;  %v469_v44 = vor.u32 %v468_v35, %v465_v34  ;;  %v488_v45 = vrot.slane %v486_v36, 5  ;;  %v619_v46 = vshrl.u32 %v3259_v31, 16  ;;  %v581_v49 = vld [vmem:[%s3221_s2 + $0x1c] sm:$0x1] }
  0x27   : > { %v603_v47 = vsel %vm3263_vm5, %v598_v38, %v602_v19  ;;  %v483_v48 = vor.u32 %v482_v41, %v479_v40  ;;  %v622_v50 = vshll.u32 %v3259_v31, 16  ;;  %v628_v51 = vshll.u32 %v579_v37, 16  ;;  %v3280_v56 = vld [vmem:[%s3221_s2 + $0x18] sm:$0xf]  ;;  %v2318_v61 = vld [vmem:[%s3221_s2 + $0x1c] sm:$0x1] }
  0x28   : > { %v617_v52 = vsel %vm3263_vm5, %v612_v43, %v616_v23  ;;  %v470_v53 = vrot.slane %v469_v44, 4  ;;  %v621_v54 = vrot.slane %v619_v46, 4  ;;  %v633_v55 = vshrl.u32 %v3269_v42, 16  ;;  %v3287_v7 = vld [vmem:[%s3221_s2 + $0x20] sm:$0xf] }
  0x29   : > { %v2329_v57 = vcombine.low %v603_v47, %v617_v52  ;;  %v484_v58 = vrot.slane %v483_v48, 4  ;;  %v624_v59 = vrot.slane %v622_v50, 5  ;;  %v630_v60 = vrot.slane %v628_v51, 5  ;;  %v2320_v10 = vld [vmem:[%s3221_s2 + $0x24] sm:$0x1] }
  0x2a   : > { %v475_v62 = vsel %vm3263_vm5, %v470_v53, %v474_v39  ;;  %v635_v63 = vrot.slane %v633_v55, 4  ;;  %v636_v0 = vshll.u32 %v3269_v42, 16  ;;  %v642_v5 = vshll.u32 %v581_v49, 16  ;;  %v3298_v19 = vld [vmem:[%s3221_s2 + $0x20] sm:$0xf] }
  0x2b   : > { %2529 = vmatprep.mubr.msk.bf16.mxu0 %vm724_vm3, %v2329_v57  ;;  %v489_v8 = vsel %vm3263_vm5, %v484_v58, %v488_v45  ;;  %v625_v9 = vor.u32 %v624_v59, %v621_v54  ;;  %v491_v11 = vshrl.u32 %v3280_v56, 16  ;;  %v494_v12 = vshll.u32 %v3280_v56, 16  ;;  %v583_v25 = vld [vmem:[%s3221_s2 + $0x24] sm:$0x1]  ;;  %v3306_v30 = vld [vmem:[%s3221_s2 + $0x28] sm:$0xf] }
  0x2c   : > { %v3295_v13 = vcombine.low %v475_v62, %v489_v8  ;;  %v638_v15 = vrot.slane %v636_v0, 5  ;;  %v644_v17 = vrot.slane %v642_v5, 5  ;;  %v500_v18 = vshll.u32 %v2318_v61, 16  ;;  %v585_v40 = vld [vmem:[%s3221_s2 + $0x2c] sm:$0x1]  ;;  %v3331_v59 = vld [vmem:[%s3917_s3] sm:$0xff]  }
  0x2d   : > { %v626_v20 = vrot.slane %v625_v9, 4  ;;  %v493_v22 = vrot.slane %v491_v11, 4  ;;  %v496_v23 = vrot.slane %v494_v12, 5  ;;  %v505_v24 = vshrl.u32 %v3287_v7, 16  ;;  %v3317_v47 = vld [vmem:[%s3221_s2 + $0x28] sm:$0xf] }
  0x2e   : > { %1336 = vrot.lane.b32.xlu0 %v3295_v13, %s3076_s19  ;;  %v639_v26 = vor.u32 %v638_v15, %v635_v63  ;;  %v502_v27 = vrot.slane %v500_v18, 5  ;;  %v508_v28 = vshll.u32 %v3287_v7, 16  ;;  %v514_v29 = vshll.u32 %v2320_v10, 16  ;;  %2569 = vmatprep.mubr.msk.bf16.mxu1 %vm1202_vm4, %v3295_v13  ;;  %v2322_v52 = vld [vmem:[%s3221_s2 + $0x2c] sm:$0x1] }
  0x2f   : > { %v631_v33 = vsel %vm3263_vm5, %v626_v20, %v630_v60  ;;  %v497_v34 = vor.u32 %v496_v23, %v493_v22  ;;  %v507_v35 = vrot.slane %v505_v24, 4  ;;  %v647_v36 = vshrl.u32 %v3298_v19, 16  ;;  %v3324_v53 = vld [vmem:[%s3221_s2 + $0x30] sm:$0xf]  ;;  %v2324_v0 = vld [vmem:[%s3221_s2 + $0x34] sm:$0x1] }
  0x30   : > { %v640_v37 = vrot.slane %v639_v26, 4  ;;  %v510_v38 = vrot.slane %v508_v28, 5  ;;  %v516_v39 = vrot.slane %v514_v29, 5  ;;  %v650_v41 = vshll.u32 %v3298_v19, 16  ;;  %v3335_v5 = vld [vmem:[%s3221_s2 + $0x30] sm:$0xf] }
  0x31   : > { %v498_v43 = vrot.slane %v497_v34, 4  ;;  %v649_v44 = vrot.slane %v647_v36, 4  ;;  %v656_v45 = vshll.u32 %v583_v25, 16  ;;  %v661_v46 = vshrl.u32 %v3306_v30, 16  ;;  %v3342_v12 = vld [vmem:[%s3221_s2 + $0x38] sm:$0xf] }
  0x32   : > { %v645_v48 = vsel %vm3263_vm5, %v640_v37, %v644_v17  ;;  %v511_v49 = vor.u32 %v510_v38, %v507_v35  ;;  %v652_v50 = vrot.slane %v650_v41, 5  ;;  %v664_v51 = vshll.u32 %v3306_v30, 16  ;;  %v587_v22 = vld [vmem:[%s3221_s2 + $0x34] sm:$0x1]  ;;  %v589_v34 = vld [vmem:[%s3221_s2 + $0x3c] sm:$0x1] }
  0x33   : > { %v2330_v54 = vcombine.low %v631_v33, %v645_v48  ;;  %v503_v55 = vsel %vm3263_vm5, %v498_v43, %v502_v27  ;;  %v658_v57 = vrot.slane %v656_v45, 5  ;;  %v663_v58 = vrot.slane %v661_v46, 4  ;;  %v3356_v35 = vld [vmem:[%s3221_s2 + $0x38] sm:$0xf] }
  0x34   : > { %v512_v60 = vrot.slane %v511_v49, 4  ;;  %v653_v61 = vor.u32 %v652_v50, %v649_v44  ;;  %v666_v62 = vrot.slane %v664_v51, 5  ;;  %v670_v63 = vshll.u32 %v585_v40, 16  ;;  %v3369_v44 = vld [vmem:[%s3221_s2 + $0x40] sm:$0xf] }
  0x35   : > { %2530 = vmatmul.mubr.msk.bf16.vlgmr.msra.gmra.mrb[0].mxu0 %vm724_vm3, %v2330_v54  ;;  %v519_v8 = vshrl.u32 %v3317_v47, 16  ;;  %v522_v9 = vshll.u32 %v3317_v47, 16  ;;  %v528_v10 = vshll.u32 %v2322_v52, 16  ;;  %v533_v11 = vshrl.u32 %v3324_v53, 16 }
  0x36   : > { %v517_v15 = vsel %vm3263_vm5, %v512_v60, %v516_v39  ;;  %v654_v17 = vrot.slane %v653_v61, 4  ;;  %v667_v18 = vor.u32 %v666_v62, %v663_v58  ;;  %v672_v20 = vrot.slane %v670_v63, 5  ;;  %2538 = vmatpush3.bf16.msra.mxu0 %v3210_v1  ;;  %v2326_v39 = vld [vmem:[%s3221_s2 + $0x3c] sm:$0x1]  ;;  %v2328_v60 = vld [vmem:[%s3221_s2 + $0x44] sm:$0x1] }
  0x37   : > { %v3348_v23 = vcombine.low %v503_v55, %v517_v15  ;;  %v521_v24 = vrot.slane %v519_v8, 4  ;;  %v524_v25 = vrot.slane %v522_v9, 5  ;;  %v530_v26 = vrot.slane %v528_v10, 5  ;;  %2547 = vmatprep.subr.bf16.mxu0 %v3331_v59  ;;  %s3078_s2 = smov 116  }
  0x38   : > { %v659_v27 = vsel %vm3263_vm5, %v654_v17, %v658_v57  ;;  %v668_v28 = vrot.slane %v667_v18, 4  ;;  %v535_v29 = vrot.slane %v533_v11, 4  ;;  %v536_v33 = vshll.u32 %v3324_v53, 16 }
  0x39   : > { %1338 = vrot.lane.b32.xlu0 %v3348_v23, %s3076_s19  ;;  %v525_v1 = vor.u32 %v524_v25, %v521_v24  ;;  %v542_v36 = vshll.u32 %v2324_v0, 16  ;;  %v675_v37 = vshrl.u32 %v3335_v5, 16  ;;  %v678_v38 = vshll.u32 %v3335_v5, 16  ;;  %2570 = vmatmul.mubr.msk.bf16.vlgmr.msra.gmra.mrb[0].mxu1 %vm1202_vm4, %v3348_v23 }
  0x3a   : > { %v673_v40 = vsel %vm3263_vm5, %v668_v28, %v672_v20  ;;  %v538_v41 = vrot.slane %v536_v33, 5  ;;  %v689_v43 = vshrl.u32 %v3342_v12, 16  ;;  %2578 = vmatpush3.bf16.msra.mxu1 %v3227_v3  ;;  %v684_v49 = vshll.u32 %v587_v22, 16 }
  0x3b   : > { %v2331_v45 = vcombine.low %v659_v27, %v673_v40  ;;  %v526_v46 = vrot.slane %v525_v1, 4  ;;  %v677_v48 = vrot.slane %v675_v37, 4  ;;  %2681 = vmatprep.subr.msk.bf16.mxu1 %vm1211_vm0, %v3216_v2  ;;  %v544_v51 = vrot.slane %v542_v36, 5 }
  0x3c   : > { %v539_v50 = vor.u32 %v538_v41, %v535_v29  ;;  %v680_v52 = vrot.slane %v678_v38, 5  ;;  %v691_v54 = vrot.slane %v689_v43, 4  ;;  %v692_v57 = vshll.u32 %v3342_v12, 16 }
  0x3d   : > { %2533 = vmatprep.mubr.msk.bf16.mxu0 %vm724_vm3, %v2331_v45  ;;  %v531_v55 = vsel %vm3263_vm5, %v526_v46, %v530_v26  ;;  %v698_v58 = vshll.u32 %v589_v34, 16  ;;  %v547_v61 = vshrl.u32 %v3356_v35, 16  ;;  %1485 = vrot.lane.b32.xlu0 %v3295_v13, %s3077_s28  ;;  %v550_v0 = vshll.u32 %v3356_v35, 16 }
  0x3e   : > { %v540_v62 = vrot.slane %v539_v50, 4  ;;  %v681_v63 = vor.u32 %v680_v52, %v677_v48  ;;  %v556_v8 = vshll.u32 %v2326_v39, 16  ;;  %v686_v9 = vrot.slane %v684_v49, 5  ;;  %v2760_v50 = vld [vmem:[%s3922_s8 + $0x20] sm:$0xff]   ;;  %v2762_v52 = vld [vmem:[%s3922_s8 + $0x30] sm:$0xff]  }
  0x3f   : > { %v694_v10 = vrot.slane %v692_v57, 5  ;;  %v549_v11 = vrot.slane %v547_v61, 4  ;;  %v561_v15 = vshrl.u32 %v3369_v44, 16  ;;  %v700_v20 = vrot.slane %v698_v58, 5 }
  0x40   : > { %v545_v17 = vsel %vm3263_vm5, %v540_v62, %v544_v51  ;;  %v682_v18 = vrot.slane %v681_v63, 4  ;;  %v552_v22 = vrot.slane %v550_v0, 5  ;;  %v564_v27 = vshll.u32 %v3369_v44, 16  ;;  %v2761_v51 = vld [vmem:[%s3922_s8 + $0x28] sm:$0xff]  }
  0x41   : > { %v2340_v24 = vcombine.low %v531_v55, %v545_v17  ;;  %v695_v25 = vor.u32 %v694_v10, %v691_v54  ;;  %v563_v26 = vrot.slane %v561_v15, 4  ;;  %v558_v29 = vrot.slane %v556_v8, 5  ;;  %v2763_v54 = vld [vmem:[%s3922_s8 + $0x38] sm:$0xff]   ;;  %v2764_v8 = vld [vmem:[%s3924_s10] sm:$0xff]   ;;  %v2766_v10 = vld [vmem:[%s3924_s10 + $0x10] sm:$0xff]  }
  0x42   : > { %v553_v28 = vor.u32 %v552_v22, %v549_v11  ;;  %v570_v33 = vshll.u32 %v2328_v60, 16  ;;  %v687_v34 = vsel %vm3263_vm5, %v682_v18, %v686_v9  ;;  %v566_v36 = vrot.slane %v564_v27, 5  ;;  %v2765_v9 = vld [vmem:[%s3924_s10 + $0x8] sm:$0xff]   ;;  %v2365_v11 = vld [vmem:[%s3919_s5] ss:$0 sm:$0xff]  ;;  %v2767_v15 = vld [vmem:[%s3924_s10 + $0x18] sm:$0xff]  }
  0x43   : > { %1340 = vrot.lane.b32.xlu1 %v2340_v24, %s3076_s19  ;;  %v696_v1 = vrot.slane %v695_v25, 4  ;;  %1489 = vrot.lane.b32.xlu0 %v2340_v24, %s3077_s28  ;;  %v2357_v39 = vcombine.low %v3259_v31, %v3269_v42  ;;  %v2751_v42 = vld [vmem:[%s3918_s4] sm:$0xff]   ;;  %v2347_v32 = vcombine.low %v3245_v14, %v3251_v21  ;;  %v2349_v49 = vcombine.low %v3317_v47, %v3324_v53 }
  0x44   : > { %v554_v37 = vrot.slane %v553_v28, 4  ;;  %v572_v38 = vrot.slane %v570_v33, 5  ;;  %2573 = vmatprep.mubr.msk.bf16.mxu1 %vm1202_vm4, %v2340_v24  ;;  %v567_v41 = vor.u32 %v566_v36, %v563_v26  ;;  %v2350_v14 = vcombine.low %v3356_v35, %v3369_v44  ;;  %v2756_v53 = vld [vmem:[%s3922_s8] sm:$0xff]   ;;  %v2759_v44 = vld [vmem:[%s3922_s8 + $0x18] sm:$0xff]   ;;  %v2769_v36 = vld [vmem:[%s3924_s10 + $0x28] sm:$0xff]  }
  0x45   : > { %v701_v40 = vsel %vm3263_vm5, %v696_v1, %v700_v20  ;;  %v2358_v21 = vcombine.low %v3298_v19, %v3306_v30  ;;  %v2768_v25 = vld [vmem:[%s3924_s10 + $0x20] sm:$0xff]  }
  0x46   : > { %v2332_v43 = vcombine.low %v687_v34, %v701_v40  ;;  %v559_v45 = vsel %vm3263_vm5, %v554_v37, %v558_v29  ;;  %v568_v46 = vrot.slane %v567_v41, 4 }
  0x47   : > { %1634 = vrot.lane.b32.xlu0 %v3295_v13, %s3078_s2 }
  0x48   : > { %2534 = vmatmul.mubr.msk.bf16.gmra.mrb[4].mxu0 %vm724_vm3, %v2332_v43  ;;  %v573_v48 = vsel %vm3263_vm5, %v568_v46, %v572_v38  ;;  %v2770_v43 = vld [vmem:[%s3924_s10 + $0x30] sm:$0xff]  }
  0x49   : > { %2539 = vmatprep.mubr.msk.bf16.mxu0 %vm724_vm3, %v3295_v13  ;;  %v2341_v31 = vcombine.low %v559_v45, %v573_v48  ;;  %v2348_v13 = vcombine.low %v3280_v56, %v3287_v7  ;;  %v2359_v56 = vcombine.low %v3335_v5, %v3342_v12 }
  0x4b   : > { %1638 = vrot.lane.b32.xlu0 %v2340_v24, %s3078_s2  ;;  %1342 = vrot.lane.b32.xlu1 %v2341_v31, %s3076_s19  ;;  %s3868_s19 = scalar_lea.sflag [#allocation3], %s428_s27 }
  0x4c   : > { %2574 = vmatmul.mubr.msk.bf16.gmra.mrb[4].mxu1 %vm1202_vm4, %v2341_v31 }
  0x4f   : > { %1487 = vrot.lane.b32.xlu1 %v3348_v23, %s3077_s28 }
  0x50   : > { %2540 = vmatmul.mubr.msk.bf16.vlgmr.msra.gmra.mrb[0].mxu0 %vm724_vm3, %v3348_v23 }
  0x51   : > { %2543 = vmatprep.mubr.msk.bf16.mxu0 %vm724_vm3, %v2340_v24  ;;  %2548 = vmatpush3.bf16.msra.mxu0 %v3331_v59 }
  0x52   : > { %2557 = vmatprep.subr.bf16.mxu0 %v2751_v42 }
  0x53   : > { %1491 = vrot.lane.b32.xlu1 %v2341_v31, %s3077_s28  ;;  %s2311_s28 = sshll.u32 %s428_s27, 6 }
  0x57   : > { %1636 = vrot.lane.b32.xlu1 %v3348_v23, %s3078_s2  ;;  %v2757_v23 = vld [vmem:[%s3922_s8 + $0x8] sm:$0xff]  }
  0x58   : > { %2544 = vmatmul.mubr.msk.bf16.gmra.mrb[4].mxu0 %vm724_vm3, %v2341_v31 }
  0x59   : > { %2549 = vmatprep.mubr.msk.bf16.mxu0 %vm724_vm3, %v2347_v32 }
  0x5b   : > { %1640 = vrot.lane.b32.xlu1 %v2341_v31, %s3078_s2  ;;  %s3831_s2 = scalar_lea.vmem [#allocation2], %s2311_s28  ;;  %s3079_s28 = smov [#allocation2]  }
  0x5c   : > { %s2224_s14 = sshll.u32 %s3831_s2, 4  ;;  %s3000_s30 = sshll.u32 %s3079_s28, 4  ;;  %s3858_s14 = int_to_ptr.vmem [resolvable:$true] %s2224_s14  ;;  %s3001_s30 = int_to_ptr.vmem [resolvable:$false] %s3000_s30 }
  0x5d   : > { %s2996_s20 = scalar_lea.vmem %s3858_s14, 1024  ;;  %s3002_s17 = scalar_lea.vmem %s3001_s30, 2048 }
  0x5e   : > { %p2997_p12 = scmp.ne.s32.totalorder %s3858_s14, %s2996_s20  ;;  %p3003_p1 = scmp.lt.s32.totalorder %s3858_s14, %s3001_s30 }
  0x5f   : > { %p3004_p2 = scmp.lt.s32.totalorder %s3002_s17, %s2996_s20 }
  0x60   : > { %2550 = vmatmul.mubr.msk.bf16.vlgmr.msra.gmra.mrb[0].mxu0 %vm724_vm3, %v2348_v13  ;;  %p2998_p13 = pnand %p2997_p12, %p3187_p4 }
  0x61   : > { %2553 = vmatprep.mubr.msk.bf16.mxu0 %vm724_vm3, %v2349_v49  ;;  %2558 = vmatpush3.bf16.msra.mxu0 %v2751_v42  ;;  %v2771_v49 = vld [vmem:[%s3924_s10 + $0x38] sm:$0xff]   ;;  %p3005_p3 = por %p3004_p2, %p3003_p1 }
  0x62   : > { %2607 = vmatprep.subr.bf16.mxu0 %v2764_v8  ;;  %p2999_p0 = pneg %p2998_p13 }
  0x64   : > { %p3006_p5 = pnand %p3005_p3, %p2999_p0 }
  0x68   : > { %2554 = vmatmul.mubr.msk.bf16.gmra.mrb[4].mxu0 %vm724_vm3, %v2350_v14 }
  0x69   : > { %2559 = vmatprep.mubr.msk.bf16.mxu0 %vm724_vm3, %v2356_v16 }
  0x70   : > { %2560 = vmatmul.mubr.msk.bf16.vlgmr.msra.gmra.mrb[0].mxu0 %vm724_vm3, %v2357_v39 }
  0x71   : > { %2563 = vmatprep.mubr.msk.bf16.mxu0 %vm724_vm3, %v2358_v21  ;;  %2608 = vmatpush3.bf16.msra.mxu0 %v2764_v8 }
  0x72   : > { %2609 = vmatprep.subr.bf16.mxu0 %v2765_v9 }
  0x75   : > { %2610 = vmatpush3.bf16.msra.mxu0 %v2765_v9 }
  0x76   : > { %2611 = vmatprep.subr.bf16.mxu0 %v2766_v10 }
  0x78   : > { %2564 = vmatmul.mubr.msk.bf16.gmra.mrb[4].mxu0 %vm724_vm3, %v2359_v56 }
  0x79   : > { %2612 = vmatpush3.bf16.msra.mxu0 %v2766_v10 }
  0x7a   : > { %2613 = vmatprep.subr.bf16.mxu0 %v2767_v15 }
  0x7d   : > { %2614 = vmatpush3.bf16.msra.mxu0 %v2767_v15 }
  0x7e   : > { %2615 = vmatprep.subr.bf16.mxu0 %v2768_v25 }
  0x81   : > { %2616 = vmatpush3.bf16.msra.mxu0 %v2768_v25 }
  0x82   : > { %2617 = vmatprep.subr.bf16.mxu0 %v2769_v36 }
  0x85   : > { %2618 = vmatpush3.bf16.msra.mxu0 %v2769_v36 }
  0x86   : > { %2619 = vmatprep.subr.bf16.mxu0 %v2770_v43 }
  0x89   : > { %2620 = vmatpush3.bf16.msra.mxu0 %v2770_v43 }
  0x8a   : > { %2621 = vmatprep.subr.bf16.mxu0 %v2771_v49 }
  0x8d   : > { %2622 = vmatpush3.bf16.msra.mxu0 %v2771_v49 }
  0xa0   : > { %v1337_v7 = vpop.permute.xlu0 %1336 }
  0xa1   : > { %2579 = vmatprep.mubr.msk.bf16.mxu1 %vm1202_vm4, %v1337_v7 }
  0xab   : > { %v1339_v47 = vpop.permute.xlu0 %1338 }
  0xac   : > { %2580 = vmatmul.mubr.msk.bf16.vlgmr.msra.gmra.mrb[8].mxu1 %vm1202_vm4, %v1339_v47 }
  0xad   : > { %2588 = vmatpush3.bf16.msra.mxu1 %v3227_v3 }
  0xae   : > { %2682 = vmatprep.subr.msk.bf16.mxu1 %vm1211_vm0, %v3216_v2 }
  0xaf   : > { %v1486_v6 = vpop.permute.xlu0 %1485 }
  0xb5   : > { %v1341_v4 = vpop.permute.xlu1 %1340  ;;  %v1490_v30 = vpop.permute.xlu0 %1489 }
  0xb6   : > { %2583 = vmatprep.mubr.msk.bf16.mxu1 %vm1202_vm4, %v1341_v4 }
  0xb9   : > { %v1635_v59 = vpop.permute.xlu0 %1634 }
  0xbd   : > { %v1343_v16 = vpop.permute.xlu1 %1342  ;;  %v1639_v12 = vpop.permute.xlu0 %1638 }
  0xbe   : > { %2584 = vmatmul.mubr.msk.bf16.gmra.mrb[12].mxu1 %vm1202_vm4, %v1343_v16 }
  0xbf   : > { %2589 = vmatprep.mubr.msk.bf16.mxu1 %vm1202_vm4, %v1486_v6 }
  0xc1   : > { %v1488_v19 = vpop.permute.xlu1 %1487 }
  0xc5   : > { %v1492_v2 = vpop.permute.xlu1 %1491 }
  0xc6   : > { %2590 = vmatmul.mubr.msk.bf16.vlgmr.msra.gmra.mrb[16].mxu1 %vm1202_vm4, %v1488_v19 }
  0xc7   : > { %2598 = vmatpush3.bf16.msra.mxu1 %v3227_v3  ;;  %2593 = vmatprep.mubr.msk.bf16.mxu1 %vm1202_vm4, %v1490_v30  ;;  %v2758_v3 = vld [vmem:[%s3922_s8 + $0x10] sm:$0xff]  }
  0xc8   : > { %2631 = vmatprep.subr.bf16.mxu1 %v2756_v53 }
  0xc9   : > { %v1637_v5 = vpop.permute.xlu1 %1636 }
  0xcd   : > { %v1641_v35 = vpop.permute.xlu1 %1640 }
  0xce   : > { %2594 = vmatmul.mubr.msk.bf16.gmra.mrb[20].mxu1 %vm1202_vm4, %v1492_v2 }
  0xcf   : > { %2599 = vmatprep.mubr.msk.bf16.mxu1 %vm1202_vm4, %v1635_v59 }
  0xd6   : > { %2600 = vmatmul.mubr.msk.bf16.vlgmr.msra.gmra.mrb[24].mxu1 %vm1202_vm4, %v1637_v5 }
  0xd7   : > { %2603 = vmatprep.mubr.msk.bf16.mxu1 %vm1202_vm4, %v1639_v12  ;;  %2632 = vmatpush3.bf16.msra.mxu1 %v2756_v53 }
  0xd8   : > { %2633 = vmatprep.subr.bf16.mxu1 %v2757_v23 }
  0xdb   : > { %2634 = vmatpush3.bf16.msra.mxu1 %v2757_v23 }
  0xdc   : > { %2635 = vmatprep.subr.bf16.mxu1 %v2758_v3 }
  0xde   : > { %2604 = vmatmul.mubr.msk.bf16.gmra.mrb[28].mxu1 %vm1202_vm4, %v1641_v35 }
  0xdf   : > { %2636 = vmatpush3.bf16.msra.mxu1 %v2758_v3 }
  0xe0   : > { %2637 = vmatprep.subr.bf16.mxu1 %v2759_v44 }
  0xe3   : > { %2638 = vmatpush3.bf16.msra.mxu1 %v2759_v44 }
  0xe4   : > { %2639 = vmatprep.subr.bf16.mxu1 %v2760_v50 }
  0xe7   : > { %2640 = vmatpush3.bf16.msra.mxu1 %v2760_v50 }
  0xe8   : > { %2641 = vmatprep.subr.bf16.mxu1 %v2761_v51 }
  0xeb   : > { %2642 = vmatpush3.bf16.msra.mxu1 %v2761_v51 }
  0xec   : > { %2643 = vmatprep.subr.bf16.mxu1 %v2762_v52 }
  0xef   : > { %2644 = vmatpush3.bf16.msra.mxu1 %v2762_v52 }
  0xf0   : > { %2645 = vmatprep.subr.bf16.mxu1 %v2763_v54 }
  0xf3   : > { %2646 = vmatpush3.bf16.msra.mxu1 %v2763_v54 }
 0x10c   : > { %v3481_v55 = vpop.f32.mrb[0].mxu1 }
 0x10d   : > { %v3483_v57 = vpop.f32.mrb[1].mxu1 }
 0x10e   : > { %v3485_v58 = vpop.f32.mrb[2].mxu1 }
 0x10f   : > { %v3487_v60 = vpop.f32.mrb[3].mxu1 }
 0x11f   : > { %v3489_v61 = vpop.f32.mrb[4].mxu1 }
 0x120   : > { %v3491_v62 = vpop.f32.mrb[5].mxu1 }
 0x121   : > { %v3493_v63 = vpop.f32.mrb[6].mxu1 }
 0x122   : > { %v3495_v0 = vpop.f32.mrb[7].mxu1 }
 0x143   : > { %v2561_v17 = vpop.f32.mrb[0].mxu0 }
 0x144   : > { %v3512_v18 = vadd.f32 %v2561_v17, %v2365_v11  ;;  %v1084_v20 = vpop.f32.mrb[1].mxu0 }
 0x145   : > { %v3514_v22 = vadd.f32 %v2365_v11, %v1084_v20  ;;  %v2562_v24 = vpop.f32.mrb[2].mxu0 }
 0x146   : > { %v2368_v26 = vmul.f32 -1.442695, %v3512_v18  ;;  %v3520_v27 = vadd.f32 %v2562_v24, %v2365_v11  ;;  %v1087_v28 = vpop.f32.mrb[3].mxu0 }
 0x147   : > { %v2366_v29 = vmul.f32 -1.442695, %v3514_v22  ;;  %v3523_v33 = vadd.f32 %v2365_v11, %v1087_v28 }
 0x148   : > { %2772 = vpow2.f32 %v2368_v26  ;;  %v2369_v34 = vmul.f32 -1.442695, %v3520_v27  ;;  %v3563_v26 = vld [vmem:[%s3921_s7] ss:$0 sm:$0xff] }
 0x149   : > { %2774 = vpow2.f32 %v2366_v29  ;;  %v2367_v1 = vmul.f32 -1.442695, %v3523_v33  ;;  %v3571_v29 = vadd.f32 %v3481_v55, %v3563_v26  ;;  %v3581_v36 = vadd.f32 %v3485_v58, %v3563_v26 }
 0x14a   : > { %2776 = vpow2.f32 %v2369_v34 }
 0x14b   : > { %2778 = vpow2.f32 %v2367_v1  ;;  %v2565_v37 = vpop.f32.mrb[4].mxu0  ;;  %v2381_v34 = vmul.f32 -1.442695, %v3571_v29  ;;  %v2382_v55 = vmul.f32 -1.442695, %v3581_v36 }
 0x14c   : > { %v1136_v38 = vadd.f32 %v2565_v37, %v2365_v11  ;;  %v1100_v39 = vpop.f32.mrb[5].mxu0  ;;  %v3585_v37 = vadd.f32 %v3563_v26, %v3487_v60 }
 0x14d   : > { %v1134_v40 = vadd.f32 %v2365_v11, %v1100_v39  ;;  %v2566_v41 = vpop.f32.mrb[6].mxu0 }
 0x14e   : > { %v2372_v45 = vmul.f32 -1.442695, %v1136_v38  ;;  %v1137_v46 = vadd.f32 %v2566_v41, %v2365_v11  ;;  %v1103_v48 = vpop.f32.mrb[7].mxu0 }
 0x14f   : > { %v2370_v31 = vmul.f32 -1.442695, %v1134_v40  ;;  %v1135_v42 = vadd.f32 %v2365_v11, %v1103_v48 }
 0x150   : > { %2780 = vpow2.f32 %v2372_v45  ;;  %v2373_v32 = vmul.f32 -1.442695, %v1137_v46  ;;  %v3597_v45 = vadd.f32 %v3489_v61, %v3563_v26  ;;  %v3613_v61 = vadd.f32 %v3493_v63, %v3563_v26 }
 0x151   : > { %2782 = vpow2.f32 %v2370_v31  ;;  %v2371_v13 = vmul.f32 -1.442695, %v1135_v42 }
 0x152   : > { %v2773_v14 = vpop.eup %2772  ;;  %2784 = vpow2.f32 %v2373_v32  ;;  %v2386_v63 = vmul.f32 -1.442695, %v3613_v61 }
 0x153   : > { %v2775_v21 = vpop.eup %2774  ;;  %v1164_v56 = vadd.f32 1.0, %v2773_v14  ;;  %2786 = vpow2.f32 %v2371_v13 }
 0x154   : > { %v2777_v7 = vpop.eup %2776  ;;  %v1162_v47 = vadd.f32 1.0, %v2775_v21 }
 0x155   : > { %v2779_v4 = vpop.eup %2778  ;;  %2788 = vrcp.f32 %v1164_v56  ;;  %v1165_v6 = vadd.f32 1.0, %v2777_v7 }
 0x156   : > { %2790 = vrcp.f32 %v1162_v47  ;;  %v1163_v16 = vadd.f32 1.0, %v2779_v4 }
 0x157   : > { %2792 = vrcp.f32 %v1165_v6  ;;  %v3621_v6 = vadd.f32 %v3563_v26, %v3495_v0 }
 0x158   : > { %2794 = vrcp.f32 %v1163_v16 }
 0x15a   : > { %v2781_v19 = vpop.eup %2780 }
 0x15b   : > { %v2783_v30 = vpop.eup %2782  ;;  %v1168_v53 = vadd.f32 1.0, %v2781_v19 }
 0x15c   : > { %v2785_v2 = vpop.eup %2784  ;;  %v1166_v59 = vadd.f32 1.0, %v2783_v30  ;;  %v2384_v30 = vmul.f32 -1.442695, %v3621_v6 }
 0x15d   : > { %v2787_v5 = vpop.eup %2786  ;;  %2796 = vrcp.f32 %v1168_v53  ;;  %v1169_v12 = vadd.f32 1.0, %v2785_v2 }
 0x15e   : > { %2798 = vrcp.f32 %v1166_v59  ;;  %v1167_v23 = vadd.f32 1.0, %v2787_v5 }
 0x15f   : > { %v2789_v3 = vpop.eup %2788  ;;  %2800 = vrcp.f32 %v1169_v12 }
 0x160   : > { %v2791_v35 = vpop.eup %2790  ;;  %v3537_v44 = vmul.f32 %v2789_v3, %v3512_v18  ;;  %2802 = vrcp.f32 %v1167_v23 }
 0x161   : > { %v2793_v50 = vpop.eup %2792  ;;  %v3540_v51 = vmul.f32 %v2791_v35, %v3514_v22  ;;  %2804 = vpow2.f32 %v2381_v34 }
 0x162   : > { %v2795_v52 = vpop.eup %2794  ;;  %v3543_v54 = vmul.f32 %v2793_v50, %v3520_v27 }
 0x163   : > { %v3546_v8 = vmul.f32 %v2795_v52, %v3523_v33  ;;  %v3575_v33 = vadd.f32 %v3563_v26, %v3483_v57  ;;  %v2380_v57 = vmul.f32 -1.442695, %v3585_v37 }
 0x164   : > { %v1996_v9 = vpack.c.bf16 %v3543_v54, %v3537_v44 }
 0x165   : > { %v1995_v10 = vpack.c.bf16 %v3546_v8, %v3540_v51  ;;  %v2379_v1 = vmul.f32 -1.442695, %v3575_v33 }
 0x167   : > { %v2797_v11 = vpop.eup %2796  ;;  %2647 = vmatprep.mubr.bf16.mxu1 %v1995_v10  ;;  %2806 = vpow2.f32 %v2379_v1 }
 0x168   : > { %v2799_v15 = vpop.eup %2798  ;;  %v3552_v17 = vmul.f32 %v2797_v11, %v1136_v38  ;;  %2648 = vmatmul.mubr.bf16.vlgmr.msra.gmra.mrb[32].mxu1 %v1996_v9  ;;  %2808 = vpow2.f32 %v2382_v55 }
 0x169   : > { %v2801_v18 = vpop.eup %2800  ;;  %v3554_v20 = vmul.f32 %v2799_v15, %v1134_v40  ;;  %2810 = vpow2.f32 %v2380_v57 }
 0x16a   : > { %v2803_v22 = vpop.eup %2802  ;;  %v3556_v24 = vmul.f32 %v2801_v18, %v1137_v46 }
 0x16b   : > { %v3558_v25 = vmul.f32 %v2803_v22, %v1135_v42  ;;  %v2805_v41 = vpop.eup %2804  ;;  %v3605_v42 = vadd.f32 %v3563_v26, %v3491_v62  ;;  %v2385_v62 = vmul.f32 -1.442695, %v3597_v45 }
 0x16c   : > { %v1998_v27 = vpack.c.bf16 %v3556_v24, %v3552_v17  ;;  %v1306_v49 = vadd.f32 1.0, %v2805_v41 }
 0x16d   : > { %v1997_v28 = vpack.c.bf16 %v3558_v25, %v3554_v20  ;;  %v2383_v4 = vmul.f32 -1.442695, %v3605_v42 }
 0x16f   : > { %2651 = vmatprep.mubr.bf16.mxu1 %v1997_v28 }
 0x170   : > { %2652 = vmatmul.mubr.bf16.gmra.mrb[36].mxu1 %v1998_v27 }
 0x171   : > { %v2807_v60 = vpop.eup %2806 }
 0x172   : > { %v1304_v21 = vadd.f32 1.0, %v2807_v60  ;;  %v2809_v7 = vpop.eup %2808 }
 0x173   : > { %v2811_v47 = vpop.eup %2810  ;;  %v1307_v16 = vadd.f32 1.0, %v2809_v7 }
 0x174   : > { %v1305_v19 = vadd.f32 1.0, %v2811_v47 }
 0x17f   : > { %v2581_v38 = vpop.f32.mrb[8].mxu1 }
 0x180   : > { %v3590_v39 = vadd.f32 %v2581_v38, %v3563_v26  ;;  %v1390_v40 = vpop.f32.mrb[9].mxu1 }
 0x181   : > { %v3593_v58 = vadd.f32 %v3563_v26, %v1390_v40  ;;  %v2582_v43 = vpop.f32.mrb[10].mxu1 }
 0x182   : > { %v2393_v46 = vmul.f32 -1.442695, %v3590_v39  ;;  %v3601_v48 = vadd.f32 %v2582_v43, %v3563_v26  ;;  %v1393_v31 = vpop.f32.mrb[11].mxu1 }
 0x183   : > { %v2391_v32 = vmul.f32 -1.442695, %v3593_v58  ;;  %v3609_v13 = vadd.f32 %v3563_v26, %v1393_v31 }
 0x184   : > { %2812 = vpow2.f32 %v2393_v46  ;;  %v2394_v14 = vmul.f32 -1.442695, %v3601_v48 }
 0x185   : > { %2814 = vpow2.f32 %v2391_v32  ;;  %v2392_v56 = vmul.f32 -1.442695, %v3609_v13 }
 0x186   : > { %2816 = vpow2.f32 %v2394_v14 }
 0x187   : > { %2818 = vpow2.f32 %v2392_v56 }
 0x188   : > { %2820 = vrcp.f32 %v1306_v49 }
 0x189   : > { %2822 = vrcp.f32 %v1304_v21 }
 0x18a   : > { %2824 = vpow2.f32 %v2385_v62 }
 0x18b   : > { %2826 = vpow2.f32 %v2383_v4 }
 0x18c   : > { %2828 = vpow2.f32 %v2386_v63 }
 0x18d   : > { %2830 = vrcp.f32 %v1307_v16 }
 0x18e   : > { %v2813_v53 = vpop.eup %2812  ;;  %2832 = vrcp.f32 %v1305_v19 }
 0x18f   : > { %v2815_v2 = vpop.eup %2814  ;;  %2834 = vpow2.f32 %v2384_v30  ;;  %v1447_v59 = vadd.f32 1.0, %v2813_v53 }
 0x190   : > { %v2817_v0 = vpop.eup %2816  ;;  %v1445_v5 = vadd.f32 1.0, %v2815_v2 }
 0x191   : > { %v2819_v12 = vpop.eup %2818  ;;  %2836 = vrcp.f32 %v1447_v59  ;;  %v1448_v23 = vadd.f32 1.0, %v2817_v0  ;;  %v2585_v50 = vpop.f32.mrb[12].mxu1 }
 0x192   : > { %v2821_v3 = vpop.eup %2820  ;;  %2838 = vrcp.f32 %v1445_v5  ;;  %v1446_v35 = vadd.f32 1.0, %v2819_v12  ;;  %v3626_v9 = vadd.f32 %v2585_v50, %v3563_v26  ;;  %v1406_v10 = vpop.f32.mrb[13].mxu1 }
 0x193   : > { %v2823_v52 = vpop.eup %2822  ;;  %2840 = vrcp.f32 %v1448_v23  ;;  %v3629_v15 = vadd.f32 %v3563_v26, %v1406_v10  ;;  %v2586_v18 = vpop.f32.mrb[14].mxu1  ;;  %v1330_v49 = vmul.f32 %v2821_v3, %v3571_v29 }
 0x194   : > { %v2825_v11 = vpop.eup %2824  ;;  %2842 = vrcp.f32 %v1446_v35  ;;  %v2397_v27 = vmul.f32 -1.442695, %v3626_v9  ;;  %v3633_v28 = vadd.f32 %v2586_v18, %v3563_v26  ;;  %v1409_v34 = vpop.f32.mrb[15].mxu1  ;;  %v1328_v14 = vmul.f32 %v2823_v52, %v3575_v33 }
 0x195   : > { %v2827_v22 = vpop.eup %2826  ;;  %v2395_v55 = vmul.f32 -1.442695, %v3629_v15  ;;  %v3637_v57 = vadd.f32 %v3563_v26, %v1409_v34  ;;  %v1310_v40 = vadd.f32 1.0, %v2825_v11 }
 0x196   : > { %v2829_v1 = vpop.eup %2828  ;;  %2844 = vpow2.f32 %v2397_v27  ;;  %v2398_v41 = vmul.f32 -1.442695, %v3633_v28  ;;  %v1308_v60 = vadd.f32 1.0, %v2827_v22 }
 0x197   : > { %v2831_v38 = vpop.eup %2830  ;;  %2846 = vpow2.f32 %v2395_v55  ;;  %v2396_v46 = vmul.f32 -1.442695, %v3637_v57  ;;  %v1311_v32 = vadd.f32 1.0, %v2829_v1 }
 0x198   : > { %v2833_v43 = vpop.eup %2832  ;;  %2848 = vpow2.f32 %v2398_v41  ;;  %v1331_v7 = vmul.f32 %v2831_v38, %v3581_v36 }
 0x199   : > { %v2835_v31 = vpop.eup %2834  ;;  %2850 = vpow2.f32 %v2396_v46  ;;  %v2591_v21 = vpop.f32.mrb[16].mxu1  ;;  %v1329_v62 = vmul.f32 %v2833_v43, %v3585_v37 }
 0x19a   : > { %2852 = vrcp.f32 %v1310_v40  ;;  %v3646_v47 = vadd.f32 %v2591_v21, %v3563_v26  ;;  %v1539_v4 = vpop.f32.mrb[17].mxu1  ;;  %v1309_v16 = vadd.f32 1.0, %v2835_v31 }
 0x19b   : > { %v2837_v56 = vpop.eup %2836  ;;  %2854 = vrcp.f32 %v1308_v60  ;;  %v3650_v29 = vadd.f32 %v3563_v26, %v1539_v4  ;;  %v2592_v33 = vpop.f32.mrb[18].mxu1 }
 0x19c   : > { %v2839_v63 = vpop.eup %2838  ;;  %v1471_v19 = vmul.f32 %v2837_v56, %v3590_v39  ;;  %2856 = vrcp.f32 %v1311_v32  ;;  %v2405_v37 = vmul.f32 -1.442695, %v3646_v47  ;;  %v3655_v53 = vadd.f32 %v2592_v33, %v3563_v26  ;;  %v1542_v2 = vpop.f32.mrb[19].mxu1 }
 0x19d   : > { %v2841_v30 = vpop.eup %2840  ;;  %v1469_v36 = vmul.f32 %v2839_v63, %v3593_v58  ;;  %v2403_v39 = vmul.f32 -1.442695, %v3650_v29  ;;  %v3662_v12 = vadd.f32 %v3563_v26, %v1542_v2 }
 0x19e   : > { %v2843_v59 = vpop.eup %2842  ;;  %v3657_v0 = vadd.f32 %v1471_v19, %v1330_v49  ;;  %v1472_v5 = vmul.f32 %v2841_v30, %v3601_v48  ;;  %2858 = vpow2.f32 %v2405_v37  ;;  %v2406_v3 = vmul.f32 -1.442695, %v3655_v53 }
 0x19f   : > { %v3664_v23 = vadd.f32 %v1469_v36, %v1328_v14  ;;  %v1470_v58 = vmul.f32 %v2843_v59, %v3609_v13  ;;  %2860 = vpow2.f32 %v2403_v39  ;;  %v2404_v50 = vmul.f32 -1.442695, %v3662_v12 }
 0x1a0   : > { %v3668_v35 = vadd.f32 %v1472_v5, %v1331_v7  ;;  %v2845_v52 = vpop.eup %2844  ;;  %2862 = vpow2.f32 %v2406_v3 }
 0x1a1   : > { %v3671_v10 = vadd.f32 %v1470_v58, %v1329_v62  ;;  %v2847_v48 = vpop.eup %2846  ;;  %v1451_v11 = vadd.f32 1.0, %v2845_v52  ;;  %2864 = vpow2.f32 %v2404_v50  ;;  %v2595_v18 = vpop.f32.mrb[20].mxu1 }
 0x1a2   : > { %v2849_v22 = vpop.eup %2848  ;;  %2866 = vrcp.f32 %v1309_v16  ;;  %v1449_v27 = vadd.f32 1.0, %v2847_v48  ;;  %v3674_v13 = vadd.f32 %v2595_v18, %v3563_v26  ;;  %v1555_v34 = vpop.f32.mrb[21].mxu1 }
 0x1a3   : > { %v2851_v1 = vpop.eup %2850  ;;  %2868 = vrcp.f32 %v1451_v11  ;;  %v1452_v55 = vadd.f32 1.0, %v2849_v22  ;;  %v3677_v38 = vadd.f32 %v3563_v26, %v1555_v34  ;;  %v2596_v40 = vpop.f32.mrb[22].mxu1 }
 0x1a4   : > { %v2853_v41 = vpop.eup %2852  ;;  %2870 = vrcp.f32 %v1449_v27  ;;  %v1450_v43 = vadd.f32 1.0, %v2851_v1  ;;  %v2409_v60 = vmul.f32 -1.442695, %v3674_v13  ;;  %v3681_v46 = vadd.f32 %v2596_v40, %v3563_v26  ;;  %v1558_v31 = vpop.f32.mrb[23].mxu1 }
 0x1a5   : > { %v2855_v32 = vpop.eup %2854  ;;  %2872 = vrcp.f32 %v1452_v55  ;;  %v2407_v49 = vmul.f32 -1.442695, %v3677_v38  ;;  %v3685_v14 = vadd.f32 %v3563_v26, %v1558_v31  ;;  %v1334_v27 = vmul.f32 %v2853_v41, %v3597_v45 }
 0x1a6   : > { %v2857_v21 = vpop.eup %2856  ;;  %2874 = vrcp.f32 %v1450_v43  ;;  %v2410_v56 = vmul.f32 -1.442695, %v3681_v46  ;;  %v1332_v40 = vmul.f32 %v2855_v32, %v3605_v42 }
 0x1a7   : > { %2876 = vpow2.f32 %v2409_v60  ;;  %v2408_v7 = vmul.f32 -1.442695, %v3685_v14 }
 0x1a8   : > { %v2859_v62 = vpop.eup %2858  ;;  %2878 = vpow2.f32 %v2407_v49  ;;  %v1335_v49 = vmul.f32 %v2857_v21, %v3613_v61 }
 0x1a9   : > { %v2861_v4 = vpop.eup %2860  ;;  %v1596_v63 = vadd.f32 1.0, %v2859_v62  ;;  %2880 = vpow2.f32 %v2410_v56  ;;  %v2601_v16 = vpop.f32.mrb[24].mxu1 }
 0x1aa   : > { %v2863_v19 = vpop.eup %2862  ;;  %v1594_v33 = vadd.f32 1.0, %v2861_v4  ;;  %2882 = vpow2.f32 %v2408_v7  ;;  %v3690_v30 = vadd.f32 %v2601_v16, %v3563_v26  ;;  %v1688_v36 = vpop.f32.mrb[25].mxu1 }
 0x1ab   : > { %v2865_v37 = vpop.eup %2864  ;;  %2884 = vrcp.f32 %v1596_v63  ;;  %v1597_v2 = vadd.f32 1.0, %v2863_v19  ;;  %v3693_v59 = vadd.f32 %v3563_v26, %v1688_v36  ;;  %v2602_v5 = vpop.f32.mrb[26].mxu1 }
 0x1ac   : > { %v2867_v39 = vpop.eup %2866  ;;  %2886 = vrcp.f32 %v1594_v33  ;;  %v1595_v58 = vadd.f32 1.0, %v2865_v37  ;;  %v2417_v3 = vmul.f32 -1.442695, %v3690_v30  ;;  %v3697_v50 = vadd.f32 %v2602_v5, %v3563_v26  ;;  %v1691_v52 = vpop.f32.mrb[27].mxu1 }
 0x1ad   : > { %v2869_v48 = vpop.eup %2868  ;;  %2888 = vrcp.f32 %v1597_v2  ;;  %v2415_v11 = vmul.f32 -1.442695, %v3693_v59  ;;  %v3701_v18 = vadd.f32 %v3563_v26, %v1691_v52  ;;  %v1333_v41 = vmul.f32 %v2867_v39, %v3621_v6 }
 0x1ae   : > { %v2871_v22 = vpop.eup %2870  ;;  %v1475_v34 = vmul.f32 %v2869_v48, %v3626_v9  ;;  %2890 = vrcp.f32 %v1595_v58  ;;  %v2418_v1 = vmul.f32 -1.442695, %v3697_v50 }
 0x1af   : > { %v2873_v55 = vpop.eup %2872  ;;  %v1473_v43 = vmul.f32 %v2871_v22, %v3629_v15  ;;  %2892 = vpow2.f32 %v2417_v3  ;;  %v2416_v60 = vmul.f32 -1.442695, %v3701_v18 }
 0x1b0   : > { %v2875_v31 = vpop.eup %2874  ;;  %v3710_v56 = vadd.f32 %v1475_v34, %v1334_v27  ;;  %v1476_v45 = vmul.f32 %v2873_v55, %v3633_v28  ;;  %2894 = vpow2.f32 %v2415_v11 }
 0x1b1   : > { %v2877_v9 = vpop.eup %2876  ;;  %v3714_v7 = vadd.f32 %v1473_v43, %v1332_v40  ;;  %v1474_v42 = vmul.f32 %v2875_v31, %v3637_v57  ;;  %2896 = vpow2.f32 %v2418_v1  ;;  %v2605_v15 = vpop.f32.mrb[28].mxu1 }
 0x1b2   : > { %v2879_v32 = vpop.eup %2878  ;;  %v3717_v62 = vadd.f32 %v1476_v45, %v1335_v49  ;;  %v1600_v4 = vadd.f32 1.0, %v2877_v9  ;;  %2898 = vpow2.f32 %v2416_v60  ;;  %v3720_v61 = vadd.f32 %v2605_v15, %v3563_v26  ;;  %v1704_v21 = vpop.f32.mrb[29].mxu1 }
 0x1b3   : > { %v2881_v28 = vpop.eup %2880  ;;  %v1482_v63 = vadd.f32 %v1474_v42, %v1333_v41  ;;  %v1598_v16 = vadd.f32 1.0, %v2879_v32  ;;  %v3723_v6 = vadd.f32 %v3563_v26, %v1704_v21  ;;  %v2606_v19 = vpop.f32.mrb[30].mxu1 }
 0x1b4   : > { %v2883_v33 = vpop.eup %2882  ;;  %2900 = vrcp.f32 %v1600_v4  ;;  %v1601_v57 = vadd.f32 1.0, %v2881_v28  ;;  %v2421_v36 = vmul.f32 -1.442695, %v3720_v61  ;;  %v3727_v37 = vadd.f32 %v2606_v19, %v3563_v26  ;;  %v1707_v2 = vpop.f32.mrb[31].mxu1 }
 0x1b5   : > { %v2885_v5 = vpop.eup %2884  ;;  %2902 = vrcp.f32 %v1598_v16  ;;  %v1599_v39 = vadd.f32 1.0, %v2883_v33  ;;  %v2419_v58 = vmul.f32 -1.442695, %v3723_v6  ;;  %v3731_v3 = vadd.f32 %v3563_v26, %v1707_v2 }
 0x1b6   : > { %v2887_v52 = vpop.eup %2886  ;;  %v1620_v48 = vmul.f32 %v2885_v5, %v3646_v47  ;;  %2904 = vrcp.f32 %v1601_v57  ;;  %v2422_v11 = vmul.f32 -1.442695, %v3727_v37 }
 0x1b7   : > { %v2889_v22 = vpop.eup %2888  ;;  %v1618_v27 = vmul.f32 %v2887_v52, %v3650_v29  ;;  %2906 = vrcp.f32 %v1599_v39  ;;  %v2420_v34 = vmul.f32 -1.442695, %v3731_v3 }
 0x1b8   : > { %v2891_v1 = vpop.eup %2890  ;;  %v1628_v55 = vadd.f32 %v1620_v48, %v3657_v0  ;;  %v1621_v40 = vmul.f32 %v2889_v22, %v3655_v53  ;;  %2908 = vpow2.f32 %v2421_v36 }
 0x1b9   : > { %v2893_v26 = vpop.eup %2892  ;;  %v1626_v43 = vadd.f32 %v1618_v27, %v3664_v23  ;;  %v1619_v47 = vmul.f32 %v2891_v1, %v3662_v12  ;;  %2910 = vpow2.f32 %v2419_v58 }
 0x1ba   : > { %v2895_v60 = vpop.eup %2894  ;;  %v1629_v31 = vadd.f32 %v1621_v40, %v3668_v35  ;;  %v1745_v49 = vadd.f32 1.0, %v2893_v26  ;;  %2912 = vpow2.f32 %v2422_v11 }
 0x1bb   : > { %v2897_v29 = vpop.eup %2896  ;;  %v1627_v45 = vadd.f32 %v1619_v47, %v3671_v10  ;;  %v1743_v9 = vadd.f32 1.0, %v2895_v60  ;;  %2914 = vpow2.f32 %v2420_v34 }
 0x1bc   : > { %v2899_v0 = vpop.eup %2898  ;;  %2916 = vrcp.f32 %v1745_v49  ;;  %v1746_v53 = vadd.f32 1.0, %v2897_v29 }
 0x1bd   : > { %2918 = vrcp.f32 %v1743_v9  ;;  %v1744_v41 = vadd.f32 1.0, %v2899_v0 }
 0x1be   : > { %v2901_v42 = vpop.eup %2900  ;;  %2920 = vrcp.f32 %v1746_v53 }
 0x1bf   : > { %v2903_v23 = vpop.eup %2902  ;;  %v1624_v12 = vmul.f32 %v2901_v42, %v3674_v13  ;;  %2922 = vrcp.f32 %v1744_v41 }
 0x1c0   : > { %v2905_v15 = vpop.eup %2904  ;;  %v1622_v35 = vmul.f32 %v2903_v23, %v3677_v38 }
 0x1c1   : > { %v2907_v32 = vpop.eup %2906  ;;  %v1632_v4 = vadd.f32 %v1624_v12, %v3710_v56  ;;  %v1625_v10 = vmul.f32 %v2905_v15, %v3681_v46 }
 0x1c2   : > { %v2909_v21 = vpop.eup %2908  ;;  %v1630_v28 = vadd.f32 %v1622_v35, %v3714_v7  ;;  %v1623_v16 = vmul.f32 %v2907_v32, %v3685_v14 }
 0x1c3   : > { %v2911_v19 = vpop.eup %2910  ;;  %v1633_v33 = vadd.f32 %v1625_v10, %v3717_v62  ;;  %v1749_v57 = vadd.f32 1.0, %v2909_v21 }
 0x1c4   : > { %v2913_v36 = vpop.eup %2912  ;;  %v1631_v13 = vadd.f32 %v1623_v16, %v1482_v63  ;;  %v1747_v2 = vadd.f32 1.0, %v2911_v19 }
 0x1c5   : > { %v2915_v5 = vpop.eup %2914  ;;  %2924 = vrcp.f32 %v1749_v57  ;;  %v1750_v38 = vadd.f32 1.0, %v2913_v36 }
 0x1c6   : > { %v2917_v39 = vpop.eup %2916  ;;  %2926 = vrcp.f32 %v1747_v2  ;;  %v1748_v56 = vadd.f32 1.0, %v2915_v5 }
 0x1c7   : > { %v2919_v58 = vpop.eup %2918  ;;  %v1769_v46 = vmul.f32 %v2917_v39, %v3690_v30  ;;  %2928 = vrcp.f32 %v1750_v38 }
 0x1c8   : > { %v2921_v7 = vpop.eup %2920  ;;  %v1767_v14 = vmul.f32 %v2919_v58, %v3693_v59  ;;  %2930 = vrcp.f32 %v1748_v56  ;;  %v2423_v58 = vld [vmem:[%s3925_s11] ss:$0 sm:$0xff] }
 0x1c9   : > { %v2923_v52 = vpop.eup %2922  ;;  %v1777_v62 = vadd.f32 %v1769_v46, %v1628_v55  ;;  %v1770_v48 = vmul.f32 %v2921_v7, %v3697_v50 }
 0x1ca   : > { %v1775_v63 = vadd.f32 %v1767_v14, %v1626_v43  ;;  %v1768_v11 = vmul.f32 %v2923_v52, %v3701_v18 }
 0x1cb   : > { %v1785_v22 = vmul.f32 0.25, %v1777_v62  ;;  %v1778_v27 = vadd.f32 %v1770_v48, %v1629_v31 }
 0x1cc   : > { %v1783_v34 = vmul.f32 0.25, %v1775_v63  ;;  %v1776_v1 = vadd.f32 %v1768_v11, %v1627_v45 }
 0x1cd   : > { %v1786_v40 = vmul.f32 0.25, %v1778_v27  ;;  %v1793_v30 = vsub.f32 %v3537_v44, %v1785_v22 }
 0x1ce   : > { %v1784_v26 = vmul.f32 0.25, %v1776_v1  ;;  %v1791_v55 = vsub.f32 %v3540_v51, %v1783_v34 }
 0x1cf   : > { %v2925_v47 = vpop.eup %2924  ;;  %v1794_v60 = vsub.f32 %v3543_v54, %v1786_v40 }
 0x1d0   : > { %v2927_v59 = vpop.eup %2926  ;;  %v1773_v49 = vmul.f32 %v2925_v47, %v3720_v61  ;;  %v1792_v50 = vsub.f32 %v3546_v8, %v1784_v26 }
 0x1d1   : > { %v2929_v43 = vpop.eup %2928  ;;  %v1800_v18 = vpack.c.bf16 %v1794_v60, %v1793_v30  ;;  %v1771_v31 = vmul.f32 %v2927_v59, %v3723_v6 }
 0x1d2   : > { %v2931_v29 = vpop.eup %2930  ;;  %v1781_v45 = vadd.f32 %v1773_v49, %v1632_v4  ;;  %v1774_v9 = vmul.f32 %v2929_v43, %v3727_v37  ;;  %v1799_v0 = vpack.c.bf16 %v1792_v50, %v1791_v55 }
 0x1d3   : > { %v1779_v53 = vadd.f32 %v1771_v31, %v1630_v28  ;;  %v1772_v44 = vmul.f32 %v2931_v29, %v3731_v3 }
 0x1d4   : > { %v1789_v54 = vmul.f32 0.25, %v1781_v45  ;;  %v1782_v41 = vadd.f32 %v1774_v9, %v1633_v33  ;;  %2623 = vmatprep.mubr.bf16.mxu0 %v1799_v0 }
 0x1d5   : > { %v1787_v61 = vmul.f32 0.25, %v1779_v53  ;;  %v1780_v42 = vadd.f32 %v1772_v44, %v1631_v13  ;;  %2624 = vmatmul.mubr.bf16.vlgmr.msra.gmra.mrb[8].mxu0 %v1800_v18 }
 0x1d6   : > { %v1790_v51 = vmul.f32 0.25, %v1782_v41  ;;  %v1797_v23 = vsub.f32 %v3552_v17, %v1789_v54  ;;  %v2440_v17 = vld [vmem:[%s3923_s9] ss:$0 sm:$0xff] }
 0x1d7   : > { %v1788_v8 = vmul.f32 0.25, %v1780_v42  ;;  %v1795_v12 = vsub.f32 %v3554_v20, %v1787_v61 }
 0x1d8   : > { %v1798_v6 = vsub.f32 %v3556_v24, %v1790_v51 }
 0x1d9   : > { %v1796_v37 = vsub.f32 %v3558_v25, %v1788_v8 }
 0x1da   : > { %v1802_v15 = vpack.c.bf16 %v1798_v6, %v1797_v23 }
 0x1db   : > { %v1801_v35 = vpack.c.bf16 %v1796_v37, %v1795_v12 }
 0x1dd   : > { %2627 = vmatprep.mubr.bf16.mxu0 %v1801_v35 }
 0x1de   : > { %2628 = vmatmul.mubr.bf16.gmra.mrb[12].mxu0 %v1802_v15 }
 0x23b   : > { %v2649_v3 = vpop.f32.mrb[32].mxu1 }
 0x23c   : > { %v2104_v32 = vpop.f32.mrb[33].mxu1  ;;  %v3769_v24 = vadd.f32 %v2649_v3, %v2440_v17 }
 0x23d   : > { %v2650_v4 = vpop.f32.mrb[34].mxu1  ;;  %v3771_v20 = vadd.f32 %v2440_v17, %v2104_v32 }
 0x23e   : > { %v2107_v10 = vpop.f32.mrb[35].mxu1  ;;  %v3773_v25 = vadd.f32 %v2650_v4, %v2440_v17  ;;  %v2451_v57 = vmul.f32 -1.442695, %v3769_v24 }
 0x23f   : > { %v3775_v33 = vadd.f32 %v2440_v17, %v2107_v10  ;;  %v2449_v36 = vmul.f32 -1.442695, %v3771_v20 }
 0x240   : > { %v2452_v13 = vmul.f32 -1.442695, %v3773_v25  ;;  %2932 = vpow2.f32 %v2451_v57 }
 0x241   : > { %v2450_v2 = vmul.f32 -1.442695, %v3775_v33  ;;  %2934 = vpow2.f32 %v2449_v36 }
 0x242   : > { %2936 = vpow2.f32 %v2452_v13 }
 0x243   : > { %v2653_v21 = vpop.f32.mrb[36].mxu1  ;;  %2938 = vpow2.f32 %v2450_v2 }
 0x244   : > { %v2120_v28 = vpop.f32.mrb[37].mxu1  ;;  %v3781_v5 = vadd.f32 %v2653_v21, %v2440_v17 }
 0x245   : > { %v2654_v16 = vpop.f32.mrb[38].mxu1  ;;  %v3783_v38 = vadd.f32 %v2440_v17, %v2120_v28 }
 0x246   : > { %v2123_v19 = vpop.f32.mrb[39].mxu1  ;;  %v3785_v39 = vadd.f32 %v2654_v16, %v2440_v17  ;;  %v2455_v56 = vmul.f32 -1.442695, %v3781_v5 }
 0x247   : > { %v2453_v46 = vmul.f32 -1.442695, %v3783_v38  ;;  %v3793_v52 = vadd.f32 %v2440_v17, %v2123_v19 }
 0x248   : > { %v2456_v7 = vmul.f32 -1.442695, %v3785_v39  ;;  %2940 = vpow2.f32 %v2455_v56 }
 0x249   : > { %2942 = vpow2.f32 %v2453_v46  ;;  %v2454_v60 = vmul.f32 -1.442695, %v3793_v52 }
 0x24a   : > { %v2933_v22 = vpop.eup %2932  ;;  %2944 = vpow2.f32 %v2456_v7 }
 0x24b   : > { %v2935_v40 = vpop.eup %2934  ;;  %v2161_v55 = vadd.f32 1.0, %v2933_v22 }
 0x24c   : > { %v2937_v30 = vpop.eup %2936  ;;  %v2159_v43 = vadd.f32 1.0, %v2935_v40 }
 0x24d   : > { %v2939_v49 = vpop.eup %2938  ;;  %v2162_v18 = vadd.f32 1.0, %v2937_v30 }
 0x24e   : > { %v2160_v31 = vadd.f32 1.0, %v2939_v49 }
 0x252   : > { %v2941_v44 = vpop.eup %2940 }
 0x253   : > { %v2943_v42 = vpop.eup %2942  ;;  %v2165_v28 = vadd.f32 1.0, %v2941_v44 }
 0x254   : > { %v2945_v23 = vpop.eup %2944  ;;  %v2163_v17 = vadd.f32 1.0, %v2943_v42 }
 0x255   : > { %v2166_v36 = vadd.f32 1.0, %v2945_v23 }
 0x2a8   : > { %v2625_v14 = vpop.f32.mrb[8].mxu0 }
 0x2a9   : > { %v3795_v62 = vadd.f32 %v2625_v14, %v2423_v58  ;;  %v1908_v48 = vpop.f32.mrb[9].mxu0 }
 0x2aa   : > { %v3797_v63 = vadd.f32 %v2423_v58, %v1908_v48  ;;  %v2626_v11 = vpop.f32.mrb[10].mxu0 }
 0x2ab   : > { %v2434_v27 = vmul.f32 -1.442695, %v3795_v62  ;;  %v3800_v34 = vadd.f32 %v2626_v11, %v2423_v58  ;;  %v1911_v1 = vpop.f32.mrb[11].mxu0 }
 0x2ac   : > { %v2432_v26 = vmul.f32 -1.442695, %v3797_v63  ;;  %v3803_v47 = vadd.f32 %v2423_v58, %v1911_v1 }
 0x2ad   : > { %2946 = vpow2.f32 %v2434_v27  ;;  %v2435_v59 = vmul.f32 -1.442695, %v3800_v34 }
 0x2ae   : > { %2948 = vpow2.f32 %v2432_v26  ;;  %v2433_v50 = vmul.f32 -1.442695, %v3803_v47 }
 0x2af   : > { %2950 = vpow2.f32 %v2435_v59 }
 0x2b0   : > { %2952 = vpow2.f32 %v2433_v50 }
 0x2b1   : > { %2954 = vpow2.f32 %v2454_v60  ;;  %v2629_v29 = vpop.f32.mrb[12].mxu0 }
 0x2b2   : > { %2956 = vrcp.f32 %v2161_v55  ;;  %v3808_v45 = vadd.f32 %v2629_v29, %v2423_v58  ;;  %v1924_v9 = vpop.f32.mrb[13].mxu0 }
 0x2b3   : > { %2958 = vrcp.f32 %v2159_v43  ;;  %v3810_v0 = vadd.f32 %v2423_v58, %v1924_v9  ;;  %v2630_v53 = vpop.f32.mrb[14].mxu0 }
 0x2b4   : > { %2960 = vrcp.f32 %v2162_v18  ;;  %v2438_v54 = vmul.f32 -1.442695, %v3808_v45  ;;  %v3813_v41 = vadd.f32 %v2630_v53, %v2423_v58  ;;  %v1927_v61 = vpop.f32.mrb[15].mxu0 }
 0x2b5   : > { %2962 = vrcp.f32 %v2160_v31  ;;  %v2436_v51 = vmul.f32 -1.442695, %v3810_v0  ;;  %v3816_v8 = vadd.f32 %v2423_v58, %v1927_v61 }
 0x2b6   : > { %2964 = vpow2.f32 %v2438_v54  ;;  %v2439_v6 = vmul.f32 -1.442695, %v3813_v41 }
 0x2b7   : > { %v2947_v12 = vpop.eup %2946  ;;  %2966 = vpow2.f32 %v2436_v51  ;;  %v2437_v37 = vmul.f32 -1.442695, %v3816_v8 }
 0x2b8   : > { %v2949_v15 = vpop.eup %2948  ;;  %v1965_v35 = vadd.f32 1.0, %v2947_v12  ;;  %2968 = vpow2.f32 %v2439_v6 }
 0x2b9   : > { %v2951_v3 = vpop.eup %2950  ;;  %v1963_v32 = vadd.f32 1.0, %v2949_v15  ;;  %2970 = vpow2.f32 %v2437_v37 }
 0x2ba   : > { %v2953_v4 = vpop.eup %2952  ;;  %2972 = vrcp.f32 %v1965_v35  ;;  %v1966_v10 = vadd.f32 1.0, %v2951_v3 }
 0x2bb   : > { %v2955_v21 = vpop.eup %2954  ;;  %2974 = vrcp.f32 %v1963_v32  ;;  %v1964_v16 = vadd.f32 1.0, %v2953_v4 }
 0x2bc   : > { %v2957_v19 = vpop.eup %2956  ;;  %2976 = vrcp.f32 %v1966_v10  ;;  %v2164_v2 = vadd.f32 1.0, %v2955_v21 }
 0x2bd   : > { %v2959_v57 = vpop.eup %2958  ;;  %2978 = vrcp.f32 %v1964_v16  ;;  %v2185_v26 = vmul.f32 %v2957_v19, %v3769_v24 }
 0x2be   : > { %v2961_v13 = vpop.eup %2960  ;;  %2980 = vrcp.f32 %v2165_v28  ;;  %v2183_v59 = vmul.f32 %v2959_v57, %v3771_v20 }
 0x2bf   : > { %v2963_v56 = vpop.eup %2962  ;;  %2982 = vrcp.f32 %v2163_v17  ;;  %v2186_v50 = vmul.f32 %v2961_v13, %v3773_v25 }
 0x2c0   : > { %v2965_v58 = vpop.eup %2964  ;;  %2984 = vrcp.f32 %v2166_v36  ;;  %v2184_v31 = vmul.f32 %v2963_v56, %v3775_v33 }
 0x2c1   : > { %v2967_v46 = vpop.eup %2966  ;;  %v1969_v7 = vadd.f32 1.0, %v2965_v58  ;;  %2986 = vrcp.f32 %v2164_v2 }
 0x2c2   : > { %v2969_v14 = vpop.eup %2968  ;;  %v1967_v48 = vadd.f32 1.0, %v2967_v46 }
 0x2c3   : > { %v2971_v11 = vpop.eup %2970  ;;  %2988 = vrcp.f32 %v1969_v7  ;;  %v1970_v22 = vadd.f32 1.0, %v2969_v14 }
 0x2c4   : > { %v2973_v27 = vpop.eup %2972  ;;  %2990 = vrcp.f32 %v1967_v48  ;;  %v1968_v1 = vadd.f32 1.0, %v2971_v11 }
 0x2c5   : > { %v2975_v40 = vpop.eup %2974  ;;  %v1989_v30 = vmul.f32 %v2973_v27, %v3795_v62  ;;  %2992 = vrcp.f32 %v1970_v22 }
 0x2c6   : > { %v2977_v60 = vpop.eup %2976  ;;  %v1987_v49 = vmul.f32 %v2975_v40, %v3797_v63  ;;  %2994 = vrcp.f32 %v1968_v1 }
 0x2c7   : > { %v2979_v55 = vpop.eup %2978  ;;  %v2193_v43 = vadd.f32 %v2185_v26, %v1989_v30  ;;  %v1990_v18 = vmul.f32 %v2977_v60, %v3800_v34 }
 0x2c8   : > { %v2191_v29 = vadd.f32 %v2183_v59, %v1987_v49  ;;  %v1988_v24 = vmul.f32 %v2979_v55, %v3803_v47  ;;  %v2981_v62 = vpop.eup %2980 }
 0x2c9   : > { %2202 = vst.msk [vmem:[%s3831_s2 + $0x10] sm:$0xff] %vm2199_vm6, %v2193_v43  ;;  %v2194_v20 = vadd.f32 %v2186_v50, %v1990_v18  ;;  %v2983_v25 = vpop.eup %2982  ;;  %v2189_v53 = vmul.f32 %v2981_v62, %v3781_v5 }
 0x2ca   : > { %2200 = vst.msk [vmem:[%s3831_s2] sm:$0xff] %vm2199_vm6, %v2191_v29  ;;  %v2192_v63 = vadd.f32 %v2184_v31, %v1988_v24  ;;  %v2985_v33 = vpop.eup %2984  ;;  %v2187_v61 = vmul.f32 %v2983_v25, %v3783_v38 }
 0x2cb   : > { %2203 = vst.msk [vmem:[%s3831_s2 + $0x18] sm:$0xff] %vm2199_vm6, %v2194_v20  ;;  %v2987_v34 = vpop.eup %2986  ;;  %v2190_v23 = vmul.f32 %v2985_v33, %v3785_v39 }
 0x2cc   : > { %2201 = vst.msk [vmem:[%s3831_s2 + $0x8] sm:$0xff] %vm2199_vm6, %v2192_v63 }
 0x2cd   : > { %v2989_v47 = vpop.eup %2988 }
 0x2ce   : > { %v2991_v9 = vpop.eup %2990  ;;  %v1993_v44 = vmul.f32 %v2989_v47, %v3808_v45  ;;  %v2188_v45 = vmul.f32 %v2987_v34, %v3793_v52 }
 0x2cf   : > { %v2993_v54 = vpop.eup %2992  ;;  %v1991_v42 = vmul.f32 %v2991_v9, %v3810_v0 }
 0x2d0   : > { %v2995_v51 = vpop.eup %2994  ;;  %v2197_v6 = vadd.f32 %v2189_v53, %v1993_v44  ;;  %v1994_v5 = vmul.f32 %v2993_v54, %v3813_v41 }
 0x2d1   : > { %v2195_v12 = vadd.f32 %v2187_v61, %v1991_v42  ;;  %v1992_v37 = vmul.f32 %v2995_v51, %v3816_v8 }
 0x2d2   : > { %2206 = vst.msk [vmem:[%s3831_s2 + $0x30] sm:$0xff] %vm2199_vm6, %v2197_v6  ;;  %v2198_v38 = vadd.f32 %v2190_v23, %v1994_v5 }
 0x2d3   : > { %2204 = vst.msk [vmem:[%s3831_s2 + $0x20] sm:$0xff] %vm2199_vm6, %v2195_v12  ;;  %v2196_v39 = vadd.f32 %v2188_v45, %v1992_v37 }
 0x2d4   : > { %2207 = vst.msk [vmem:[%s3831_s2 + $0x38] sm:$0xff] %vm2199_vm6, %v2198_v38 }
 0x2d5   : > { %2205 = vst.msk [vmem:[%s3831_s2 + $0x28] sm:$0xff] %vm2199_vm6, %v2196_v39 }
 0x2d6   : > { %3009 = shalt.err (!%p3006_p5)
}
 0x2d7   : > { %s3010_s27 = scalar_lea.hbm %s3856_s18, 1024  ;;  %s3014_s28 = scalar_lea.hbm %s3926_s12, 2048 }
 0x2d8   : > { %p3011_p6 = scmp.ne.s32.totalorder %s3856_s18, %s3010_s27  ;;  %p3015_p10 = scmp.lt.u32.totalorder %s3856_s18, %s3926_s12 }
 0x2d9   : > { %p3016_p11 = scmp.lt.u32.totalorder %s3014_s28, %s3010_s27  ;;  %p3018_p13 = scmp.lt.u32.totalorder %s3010_s27, %s3856_s18 }
 0x2da   : > { %p3012_p7 = pnand %p3011_p6, %p3187_p4 }
 0x2db   : > { %p3017_p12 = por %p3016_p11, %p3015_p10 }
 0x2dc   : > { %p3013_p9 = pneg %p3012_p7 }
 0x2dd   : > { %p3019_p0 = por %p3018_p13, %p3017_p12 }
 0x2df   : > { %p3020_p1 = pnand %p3019_p0, %p3013_p9 }
 0x2e1   : > { %3023 = shalt.err (!%p3020_p1)
}
 0x2e2   : > { %s3080_s20 = smov 128   ;;  %s3081_s17 = smov 8  }
 0x2e3   : > { %2684 = dma.vmem_to_hbm [thread:$0]  (%p3187_p4), %s3858_s14, 1024, %s3856_s18, %s3868_s19, %s3080_s20, %s3080_s20, %s3081_s17  }
 0x2e4 PF: > { %p2690_p2 = scmp.ge.s32.totalorder %s3074_s26, 2  ;;  %s2239_s0 = sand.u32 1, %s3054_s21  }
 0x2e5   : > { %s2240_s27 = scalar_lea.sflag [#allocation3], %s2239_s0 }
 0x2e6   : > { %p2687_p3 = pnand %p2690_p2, %p3194_p8 }
 0x2e8   : > { %3049 = dma.done.wait (!%p2687_p3), %s2240_s27, 1024  }
 0x2e9   : > { %3051 = vsyncadd (!%p2687_p3), %s2240_s27, 4294966272  ;;  %s25_s26 = sadd.s32 1, %s3074_s26   ;;  %s3935_s21 = smov %s3058_s22 }
 0x2ea   : > { %p22_p5 = scmp.ge.s32.totalorder %s25_s26, 4   ;;  %s3936_s22 = smov %s3062_s23 }
 0x2eb   : > { %s3937_s23 = smov %s3200_s16  ;;  %s3938_s24 = smov %s3070_s25 }
 0x2ec   : > { %s3939_s25 = smov %s3941_s29  ;;  %24 = sbr.rel (!%p22_p5) target bundleno = 7 (0x7), region = 104 }
 0x2f3   :  { %2245 = vsyncpa [#allocation3], 1 }
 0x2f4   :  { %2247 = vsyncpa [#allocation3 + $0x1], 1 }

</bundles_post_ra>
